<compile_context>
chip_gen: v7x
topology: tpu7x:2x2x1
jax: 0.10.0
libtpu: 0.0.40
codegen_flags: <defaults>
</compile_context>

<pallas_src>
import jax
import jax.numpy as jnp
from jax.experimental import pallas as pl
from jax.experimental.pallas import tpu as pltpu


# ----------------------------- configuration ---------------------------------
BATCH = 16                         # small demo batch (must be a multiple of B_TILE)
B_TILE = 8                         # batch rows per grid step (sublane-aligned)
SEQ = 8
VOCAB = 64
EMB_DIM = 128                      # per-modality embedding dim (stand-in for 768)
COMBINED_DIM = 2 * EMB_DIM         # 256
HIDDEN_DIM = 256                   # hidden_dim
HALF_HIDDEN = HIDDEN_DIM // 2      # 128
NUM_SIM_STEPS = 10                 # num_simulation_steps (module default)
NUM_SIDE_EFFECTS = 5
OUT_LANES = 128                    # lane-dense output slab width (eff=col0, side=cols1..5)


# ------------------------------- kernel --------------------------------------
def simulator_kernel(
    feat_ref,                                       # [B_TILE, C]   f32
    sw1_ref, sb1_ref, sw2_ref, sb2_ref, sw3_ref, sb3_ref,   # simulation_network (w: bf16, b: f32)
    fw1_ref, fb1_ref, fw2_ref, fb2_ref, fw3_ref, fb3_ref,   # fused predictors   (w: bf16, b: f32)
    out_ref,                                        # [1, (T+1)*B_TILE, 128] f32
):
    f32, bf16 = jnp.float32, jnp.bfloat16

    # Hoist weight / bias loads: the static unroll below would otherwise re-emit
    # them (and their broadcasts) NUM_SIM_STEPS times.
    sw1, sb1 = sw1_ref[...], sb1_ref[...]
    sw2, sb2 = sw2_ref[...], sb2_ref[...]
    sw3, sb3 = sw3_ref[...], sb3_ref[...]

    # ---- serial state-update loop (inherently sequential) -------------------
    state = feat_ref[...].astype(f32)               # state kept in f32
    states = [state]
    for _ in range(NUM_SIM_STEPS):
        h = jnp.dot(state.astype(bf16), sw1, preferred_element_type=f32) + sb1
        h = jnp.maximum(h, 0.0)
        h = jnp.dot(h.astype(bf16), sw2, preferred_element_type=f32) + sb2
        h = jnp.maximum(h, 0.0)
        upd = jnp.dot(h.astype(bf16), sw3, preferred_element_type=f32) + sb3
        state = state + 0.1 * upd
        states.append(state)

    # ---- batched, fused predictors over all T+1 states -----------------------
    # x: [(T+1)*B_TILE, C]  (t-major row order; unpacked in the JAX wrapper)
    x = jnp.concatenate(states, axis=0).astype(bf16)
    h = jnp.dot(x, fw1_ref[...], preferred_element_type=f32) + fb1_ref[...]
    h = jnp.maximum(h, 0.0)
    h = jnp.dot(h.astype(bf16), fw2_ref[...], preferred_element_type=f32) + fb2_ref[...]
    h = jnp.maximum(h, 0.0)
    out = jnp.dot(h.astype(bf16), fw3_ref[...], preferred_element_type=f32) + fb3_ref[...]

    out_ref[0] = out                                # single lane-dense (128-wide) store


def run_simulator(combined_features, kp):
    """One pallas_call: grid over batch tiles, weights VMEM-resident across steps."""
    b, c = combined_features.shape
    assert b % B_TILE == 0, "pad batch to a multiple of B_TILE"
    num_tiles = b // B_TILE
    t1 = NUM_SIM_STEPS + 1
    m = t1 * B_TILE

    weight_args = [
        kp["sw1"], kp["sb1"], kp["sw2"], kp["sb2"], kp["sw3"], kp["sb3"],
        kp["fw1"], kp["fb1"], kp["fw2"], kp["fb2"], kp["fw3"], kp["fb3"],
    ]
    # Full-array blocks with a constant index_map -> same block every grid step,
    # so the weights are DMA'd once and stay resident in VMEM.
    weight_specs = [pl.BlockSpec(a.shape, lambda i: (0, 0)) for a in weight_args]

    slab = pl.pallas_call(
        simulator_kernel,
        out_shape=jax.ShapeDtypeStruct((num_tiles, m, OUT_LANES), jnp.float32),
        grid=(num_tiles,),
        in_specs=[pl.BlockSpec((B_TILE, c), lambda i: (i, 0))] + weight_specs,
        out_specs=pl.BlockSpec((1, m, OUT_LANES), lambda i: (i, 0, 0)),
        compiler_params=pltpu.CompilerParams(
            dimension_semantics=("parallel",),      # shard batch tiles across TCs (v7x)
        ),
    )(combined_features, *weight_args)

    # Unpack the lane-dense slab: [tiles, (T+1)*B_TILE, 128] -> [B, T+1, 128]
    slab = slab.reshape(num_tiles, t1, B_TILE, OUT_LANES)
    slab = slab.transpose(0, 2, 1, 3).reshape(b, t1, OUT_LANES)
    eff = slab[:, :, 0:1]                            # [B, T+1, 1]
    side = slab[:, :, 1:1 + NUM_SIDE_EFFECTS]        # [B, T+1, 5]
    return {
        "efficacy": eff,
        "side_effects": side,
        "final_efficacy": eff[:, -1, :],
        "final_side_effects": side[:, -1, :],
    }


# --------------------------- parameter / feature setup ------------------------
def make_params(key):
    def lin(key, fan_in, fan_out):
        kw, kb = jax.random.split(key)
        bound = 1.0 / jnp.sqrt(fan_in)
        w = jax.random.uniform(kw, (fan_in, fan_out), jnp.float32, -bound, bound)
        b = jax.random.uniform(kb, (1, fan_out), jnp.float32, -bound, bound)
        return w, b

    keys = jax.random.split(key, 9)
    p = {}
    # simulation_network: C -> H -> H -> C
    p["sw1"], p["sb1"] = lin(keys[0], COMBINED_DIM, HIDDEN_DIM)
    p["sw2"], p["sb2"] = lin(keys[1], HIDDEN_DIM, HIDDEN_DIM)
    p["sw3"], p["sb3"] = lin(keys[2], HIDDEN_DIM, COMBINED_DIM)
    # effect_predictor: C -> H -> H/2 -> 1
    p["ew1"], p["eb1"] = lin(keys[3], COMBINED_DIM, HIDDEN_DIM)
    p["ew2"], p["eb2"] = lin(keys[4], HIDDEN_DIM, HALF_HIDDEN)
    p["ew3"], p["eb3"] = lin(keys[5], HALF_HIDDEN, 1)
    # side_effect_predictor: C -> H -> H/2 -> 5
    p["pw1"], p["pb1"] = lin(keys[6], COMBINED_DIM, HIDDEN_DIM)
    p["pw2"], p["pb2"] = lin(keys[7], HIDDEN_DIM, HALF_HIDDEN)
    p["pw3"], p["pb3"] = lin(keys[8], HALF_HIDDEN, NUM_SIDE_EFFECTS)
    return p


def pack_kernel_params(p):
    """bf16 weights / f32 biases; fuse the two predictor MLPs into one chain."""
    bf = lambda a: a.astype(jnp.bfloat16)
    kp = {
        "sw1": bf(p["sw1"]), "sb1": p["sb1"],
        "sw2": bf(p["sw2"]), "sb2": p["sb2"],
        "sw3": bf(p["sw3"]), "sb3": p["sb3"],
    }
    # Layer 1: side-by-side concat  -> [C, 2H]
    fw1 = jnp.concatenate([p["ew1"], p["pw1"]], axis=1)
    fb1 = jnp.concatenate([p["eb1"], p["pb1"]], axis=1)
    # Layer 2: block-diagonal       -> [2H, H]  (cols 0..H/2-1 = effect, rest = side)
    fw2 = jnp.zeros((2 * HIDDEN_DIM, HIDDEN_DIM), jnp.float32)
    fw2 = fw2.at[:HIDDEN_DIM, :HALF_HIDDEN].set(p["ew2"])
    fw2 = fw2.at[HIDDEN_DIM:, HALF_HIDDEN:].set(p["pw2"])
    fb2 = jnp.concatenate([p["eb2"], p["pb2"]], axis=1)
    # Layer 3: block-diagonal, padded to 128 lanes -> [H, 128]
    #          efficacy -> column 0, side effects -> columns 1..5, rest zero
    fw3 = jnp.zeros((HIDDEN_DIM, OUT_LANES), jnp.float32)
    fw3 = fw3.at[:HALF_HIDDEN, 0:1].set(p["ew3"])
    fw3 = fw3.at[HALF_HIDDEN:, 1:1 + NUM_SIDE_EFFECTS].set(p["pw3"])
    fb3 = jnp.zeros((1, OUT_LANES), jnp.float32)
    fb3 = fb3.at[:, 0:1].set(p["eb3"])
    fb3 = fb3.at[:, 1:1 + NUM_SIDE_EFFECTS].set(p["pb3"])
    kp.update({"fw1": bf(fw1), "fb1": fb1, "fw2": bf(fw2), "fb2": fb2,
               "fw3": bf(fw3), "fb3": fb3})
    return kp


def extract_features(emb_table, input_ids, attention_mask):
    # TODO(synk): pretrained HF transformer backbone (BioBERT / DrugBERT) replaced by a
    # deterministic embedding lookup + masked mean pooling; dropout is identity at inference.
    emb = emb_table[input_ids]                                        # [B, S, E]
    mask = attention_mask.astype(jnp.float32)[..., None]              # [B, S, 1]
    return (emb * mask).sum(axis=1) / jnp.maximum(mask.sum(axis=1), 1.0)   # [B, E]


# -------------------------------- reference -----------------------------------
def reference(combined_features, p):
    """Pure-JAX reference of the PyTorch math. Weights are rounded to bf16 (same
    rounding the kernel uses); activations stay f32, so the comparison isolates
    the kernel's fusion/layout against bf16-activation rounding only."""
    r = lambda a: a.astype(jnp.bfloat16).astype(jnp.float32)

    def mlp3(x, w1, b1, w2, b2, w3, b3):
        h = jnp.maximum(x @ r(w1) + b1, 0.0)
        h = jnp.maximum(h @ r(w2) + b2, 0.0)
        return h @ r(w3) + b3

    state = combined_features
    states = [state]
    for _ in range(NUM_SIM_STEPS):
        state = state + 0.1 * mlp3(state, p["sw1"], p["sb1"], p["sw2"], p["sb2"], p["sw3"], p["sb3"])
        states.append(state)
    eff = jnp.stack([mlp3(s, p["ew1"], p["eb1"], p["ew2"], p["eb2"], p["ew3"], p["eb3"]) for s in states], axis=1)
    side = jnp.stack([mlp3(s, p["pw1"], p["pb1"], p["pw2"], p["pb2"], p["pw3"], p["pb3"]) for s in states], axis=1)
    return eff, side


# ---------------------------------- main ---------------------------------------
if __name__ == "__main__":
    key = jax.random.PRNGKey(0)
    k_params, k_gemb, k_demb, k_gid, k_did = jax.random.split(key, 5)

    params = make_params(k_params)
    kernel_params = pack_kernel_params(params)

    genetic_emb_table = jax.random.normal(k_gemb, (VOCAB, EMB_DIM), jnp.float32) * 0.02
    drug_emb_table = jax.random.normal(k_demb, (VOCAB, EMB_DIM), jnp.float32) * 0.02

    genetic_input_ids = jax.random.randint(k_gid, (BATCH, SEQ), 0, VOCAB)
    drug_input_ids = jax.random.randint(k_did, (BATCH, SEQ), 0, VOCAB)
    genetic_attention_mask = jnp.ones((BATCH, SEQ), jnp.int32)
    drug_attention_mask = jnp.ones((BATCH, SEQ), jnp.int32)

    # Feature extraction + concat (glue, plain JAX).
    genetic_features = extract_features(genetic_emb_table, genetic_input_ids, genetic_attention_mask)
    drug_features = extract_features(drug_emb_table, drug_input_ids, drug_attention_mask)
    combined = jnp.concatenate([genetic_features, drug_features], axis=1)   # [B, 256]

    out = jax.block_until_ready(run_simulator(combined, kernel_params))

    # Sanity check against a pure-JAX reference of the same math (bf16-weight matched;
    # tolerance loosened for bf16 activation rounding inside the kernel).
    eff_ref, side_ref = reference(combined, params)
    assert out["efficacy"].shape == (BATCH, NUM_SIM_STEPS + 1, 1)
    assert out["side_effects"].shape == (BATCH, NUM_SIM_STEPS + 1, NUM_SIDE_EFFECTS)
    assert out["final_efficacy"].shape == (BATCH, 1)
    assert out["final_side_effects"].shape == (BATCH, NUM_SIDE_EFFECTS)
    assert jnp.allclose(out["efficacy"], eff_ref, atol=3e-2, rtol=3e-2)
    assert jnp.allclose(out["side_effects"], side_ref, atol=3e-2, rtol=3e-2)

    print("KERNEL_OK")
</pallas_src>

<mosaic_0001>
module attributes {stable_mosaic.version = 11 : i64} {
  func.func @simulator_kernel(%arg0: i32, %arg1: memref<8x256xf32, #tpu.memory_space<vmem>>, %arg2: memref<256x256xbf16, #tpu.memory_space<vmem>>, %arg3: memref<1x256xf32, #tpu.memory_space<vmem>>, %arg4: memref<256x256xbf16, #tpu.memory_space<vmem>>, %arg5: memref<1x256xf32, #tpu.memory_space<vmem>>, %arg6: memref<256x256xbf16, #tpu.memory_space<vmem>>, %arg7: memref<1x256xf32, #tpu.memory_space<vmem>>, %arg8: memref<256x512xbf16, #tpu.memory_space<vmem>>, %arg9: memref<1x512xf32, #tpu.memory_space<vmem>>, %arg10: memref<512x256xbf16, #tpu.memory_space<vmem>>, %arg11: memref<1x256xf32, #tpu.memory_space<vmem>>, %arg12: memref<256x128xbf16, #tpu.memory_space<vmem>>, %arg13: memref<1x128xf32, #tpu.memory_space<vmem>>, %arg14: memref<1x88x128xf32, #tpu.memory_space<vmem>>) attributes {dimension_semantics = [#tpu.dimension_semantics<parallel>], iteration_bounds = array<i64: 2>, scalar_prefetch = 0 : i64, scratch_operands = 0 : i64, tpu.core_type = #tpu.core_type<tc>, window_params = [{transform_indices = @transform_0, window_bounds = array<i64: 8, 256>}, {pipeline_mode = #tpu.pipeline_mode<synchronous>, transform_indices = @transform_1, window_bounds = array<i64: 256, 256>}, {pipeline_mode = #tpu.pipeline_mode<synchronous>, transform_indices = @transform_2, window_bounds = array<i64: 1, 256>}, {pipeline_mode = #tpu.pipeline_mode<synchronous>, transform_indices = @transform_3, window_bounds = array<i64: 256, 256>}, {pipeline_mode = #tpu.pipeline_mode<synchronous>, transform_indices = @transform_4, window_bounds = array<i64: 1, 256>}, {pipeline_mode = #tpu.pipeline_mode<synchronous>, transform_indices = @transform_5, window_bounds = array<i64: 256, 256>}, {pipeline_mode = #tpu.pipeline_mode<synchronous>, transform_indices = @transform_6, window_bounds = array<i64: 1, 256>}, {pipeline_mode = #tpu.pipeline_mode<synchronous>, transform_indices = @transform_7, window_bounds = array<i64: 256, 512>}, {pipeline_mode = #tpu.pipeline_mode<synchronous>, transform_indices = @transform_8, window_bounds = array<i64: 1, 512>}, {pipeline_mode = #tpu.pipeline_mode<synchronous>, transform_indices = @transform_9, window_bounds = array<i64: 512, 256>}, {pipeline_mode = #tpu.pipeline_mode<synchronous>, transform_indices = @transform_10, window_bounds = array<i64: 1, 256>}, {pipeline_mode = #tpu.pipeline_mode<synchronous>, transform_indices = @transform_11, window_bounds = array<i64: 256, 128>}, {pipeline_mode = #tpu.pipeline_mode<synchronous>, transform_indices = @transform_12, window_bounds = array<i64: 1, 128>}, {transform_indices = @transform_13, window_bounds = array<i64: 1, 88, 128>}]} {
    %c0 = arith.constant 0 : index
    %c0_0 = arith.constant 0 : index
    %0 = vector.load %arg2[%c0, %c0_0] : memref<256x256xbf16, #tpu.memory_space<vmem>>, vector<256x256xbf16>
    %c0_1 = arith.constant 0 : index
    %c0_2 = arith.constant 0 : index
    %1 = vector.load %arg3[%c0_1, %c0_2] : memref<1x256xf32, #tpu.memory_space<vmem>>, vector<1x256xf32>
    %c0_3 = arith.constant 0 : index
    %c0_4 = arith.constant 0 : index
    %2 = vector.load %arg4[%c0_3, %c0_4] : memref<256x256xbf16, #tpu.memory_space<vmem>>, vector<256x256xbf16>
    %c0_5 = arith.constant 0 : index
    %c0_6 = arith.constant 0 : index
    %3 = vector.load %arg5[%c0_5, %c0_6] : memref<1x256xf32, #tpu.memory_space<vmem>>, vector<1x256xf32>
    %c0_7 = arith.constant 0 : index
    %c0_8 = arith.constant 0 : index
    %4 = vector.load %arg6[%c0_7, %c0_8] : memref<256x256xbf16, #tpu.memory_space<vmem>>, vector<256x256xbf16>
    %c0_9 = arith.constant 0 : index
    %c0_10 = arith.constant 0 : index
    %5 = vector.load %arg7[%c0_9, %c0_10] : memref<1x256xf32, #tpu.memory_space<vmem>>, vector<1x256xf32>
    %c0_11 = arith.constant 0 : index
    %c0_12 = arith.constant 0 : index
    %6 = vector.load %arg1[%c0_11, %c0_12] : memref<8x256xf32, #tpu.memory_space<vmem>>, vector<8x256xf32>
    %7 = arith.truncf %6 : vector<8x256xf32> to vector<8x256xbf16>
    %cst = arith.constant dense<0.000000e+00> : vector<8x256xf32>
    %8 = tpu.matmul %7, %0, %cst {dimension_numbers = #tpu.dot_dimension_numbers<[1], [0], [0], [1], [0, 0, 1, 1], [], []>} : vector<8x256xbf16>, vector<256x256xbf16>, vector<8x256xf32> -> vector<8x256xf32>
    %9 = vector.broadcast %1 : vector<1x256xf32> to vector<8x256xf32>
    %10 = arith.addf %8, %9 : vector<8x256xf32>
    %cst_13 = arith.constant 0.000000e+00 : f32
    %11 = vector.broadcast %cst_13 : f32 to vector<8x256xf32>
    %12 = arith.maximumf %10, %11 : vector<8x256xf32>
    %13 = arith.truncf %12 : vector<8x256xf32> to vector<8x256xbf16>
    %cst_14 = arith.constant dense<0.000000e+00> : vector<8x256xf32>
    %14 = tpu.matmul %13, %2, %cst_14 {dimension_numbers = #tpu.dot_dimension_numbers<[1], [0], [0], [1], [0, 0, 1, 1], [], []>} : vector<8x256xbf16>, vector<256x256xbf16>, vector<8x256xf32> -> vector<8x256xf32>
    %15 = vector.broadcast %3 : vector<1x256xf32> to vector<8x256xf32>
    %16 = arith.addf %14, %15 : vector<8x256xf32>
    %cst_15 = arith.constant 0.000000e+00 : f32
    %17 = vector.broadcast %cst_15 : f32 to vector<8x256xf32>
    %18 = arith.maximumf %16, %17 : vector<8x256xf32>
    %19 = arith.truncf %18 : vector<8x256xf32> to vector<8x256xbf16>
    %cst_16 = arith.constant dense<0.000000e+00> : vector<8x256xf32>
    %20 = tpu.matmul %19, %4, %cst_16 {dimension_numbers = #tpu.dot_dimension_numbers<[1], [0], [0], [1], [0, 0, 1, 1], [], []>} : vector<8x256xbf16>, vector<256x256xbf16>, vector<8x256xf32> -> vector<8x256xf32>
    %21 = vector.broadcast %5 : vector<1x256xf32> to vector<8x256xf32>
    %22 = arith.addf %20, %21 : vector<8x256xf32>
    %cst_17 = arith.constant 1.000000e-01 : f32
    %23 = vector.broadcast %cst_17 : f32 to vector<8x256xf32>
    %24 = arith.mulf %23, %22 : vector<8x256xf32>
    %25 = arith.addf %6, %24 : vector<8x256xf32>
    %26 = arith.truncf %25 : vector<8x256xf32> to vector<8x256xbf16>
    %cst_18 = arith.constant dense<0.000000e+00> : vector<8x256xf32>
    %27 = tpu.matmul %26, %0, %cst_18 {dimension_numbers = #tpu.dot_dimension_numbers<[1], [0], [0], [1], [0, 0, 1, 1], [], []>} : vector<8x256xbf16>, vector<256x256xbf16>, vector<8x256xf32> -> vector<8x256xf32>
    %28 = vector.broadcast %1 : vector<1x256xf32> to vector<8x256xf32>
    %29 = arith.addf %27, %28 : vector<8x256xf32>
    %cst_19 = arith.constant 0.000000e+00 : f32
    %30 = vector.broadcast %cst_19 : f32 to vector<8x256xf32>
    %31 = arith.maximumf %29, %30 : vector<8x256xf32>
    %32 = arith.truncf %31 : vector<8x256xf32> to vector<8x256xbf16>
    %cst_20 = arith.constant dense<0.000000e+00> : vector<8x256xf32>
    %33 = tpu.matmul %32, %2, %cst_20 {dimension_numbers = #tpu.dot_dimension_numbers<[1], [0], [0], [1], [0, 0, 1, 1], [], []>} : vector<8x256xbf16>, vector<256x256xbf16>, vector<8x256xf32> -> vector<8x256xf32>
    %34 = vector.broadcast %3 : vector<1x256xf32> to vector<8x256xf32>
    %35 = arith.addf %33, %34 : vector<8x256xf32>
    %cst_21 = arith.constant 0.000000e+00 : f32
    %36 = vector.broadcast %cst_21 : f32 to vector<8x256xf32>
    %37 = arith.maximumf %35, %36 : vector<8x256xf32>
    %38 = arith.truncf %37 : vector<8x256xf32> to vector<8x256xbf16>
    %cst_22 = arith.constant dense<0.000000e+00> : vector<8x256xf32>
    %39 = tpu.matmul %38, %4, %cst_22 {dimension_numbers = #tpu.dot_dimension_numbers<[1], [0], [0], [1], [0, 0, 1, 1], [], []>} : vector<8x256xbf16>, vector<256x256xbf16>, vector<8x256xf32> -> vector<8x256xf32>
    %40 = vector.broadcast %5 : vector<1x256xf32> to vector<8x256xf32>
    %41 = arith.addf %39, %40 : vector<8x256xf32>
    %cst_23 = arith.constant 1.000000e-01 : f32
    %42 = vector.broadcast %cst_23 : f32 to vector<8x256xf32>
    %43 = arith.mulf %42, %41 : vector<8x256xf32>
    %44 = arith.addf %25, %43 : vector<8x256xf32>
    %45 = arith.truncf %44 : vector<8x256xf32> to vector<8x256xbf16>
    %cst_24 = arith.constant dense<0.000000e+00> : vector<8x256xf32>
    %46 = tpu.matmul %45, %0, %cst_24 {dimension_numbers = #tpu.dot_dimension_numbers<[1], [0], [0], [1], [0, 0, 1, 1], [], []>} : vector<8x256xbf16>, vector<256x256xbf16>, vector<8x256xf32> -> vector<8x256xf32>
    %47 = vector.broadcast %1 : vector<1x256xf32> to vector<8x256xf32>
    %48 = arith.addf %46, %47 : vector<8x256xf32>
    %cst_25 = arith.constant 0.000000e+00 : f32
    %49 = vector.broadcast %cst_25 : f32 to vector<8x256xf32>
    %50 = arith.maximumf %48, %49 : vector<8x256xf32>
    %51 = arith.truncf %50 : vector<8x256xf32> to vector<8x256xbf16>
    %cst_26 = arith.constant dense<0.000000e+00> : vector<8x256xf32>
    %52 = tpu.matmul %51, %2, %cst_26 {dimension_numbers = #tpu.dot_dimension_numbers<[1], [0], [0], [1], [0, 0, 1, 1], [], []>} : vector<8x256xbf16>, vector<256x256xbf16>, vector<8x256xf32> -> vector<8x256xf32>
    %53 = vector.broadcast %3 : vector<1x256xf32> to vector<8x256xf32>
    %54 = arith.addf %52, %53 : vector<8x256xf32>
    %cst_27 = arith.constant 0.000000e+00 : f32
    %55 = vector.broadcast %cst_27 : f32 to vector<8x256xf32>
    %56 = arith.maximumf %54, %55 : vector<8x256xf32>
    %57 = arith.truncf %56 : vector<8x256xf32> to vector<8x256xbf16>
    %cst_28 = arith.constant dense<0.000000e+00> : vector<8x256xf32>
    %58 = tpu.matmul %57, %4, %cst_28 {dimension_numbers = #tpu.dot_dimension_numbers<[1], [0], [0], [1], [0, 0, 1, 1], [], []>} : vector<8x256xbf16>, vector<256x256xbf16>, vector<8x256xf32> -> vector<8x256xf32>
    %59 = vector.broadcast %5 : vector<1x256xf32> to vector<8x256xf32>
    %60 = arith.addf %58, %59 : vector<8x256xf32>
    %cst_29 = arith.constant 1.000000e-01 : f32
    %61 = vector.broadcast %cst_29 : f32 to vector<8x256xf32>
    %62 = arith.mulf %61, %60 : vector<8x256xf32>
    %63 = arith.addf %44, %62 : vector<8x256xf32>
    %64 = arith.truncf %63 : vector<8x256xf32> to vector<8x256xbf16>
    %cst_30 = arith.constant dense<0.000000e+00> : vector<8x256xf32>
    %65 = tpu.matmul %64, %0, %cst_30 {dimension_numbers = #tpu.dot_dimension_numbers<[1], [0], [0], [1], [0, 0, 1, 1], [], []>} : vector<8x256xbf16>, vector<256x256xbf16>, vector<8x256xf32> -> vector<8x256xf32>
    %66 = vector.broadcast %1 : vector<1x256xf32> to vector<8x256xf32>
    %67 = arith.addf %65, %66 : vector<8x256xf32>
    %cst_31 = arith.constant 0.000000e+00 : f32
    %68 = vector.broadcast %cst_31 : f32 to vector<8x256xf32>
    %69 = arith.maximumf %67, %68 : vector<8x256xf32>
    %70 = arith.truncf %69 : vector<8x256xf32> to vector<8x256xbf16>
    %cst_32 = arith.constant dense<0.000000e+00> : vector<8x256xf32>
    %71 = tpu.matmul %70, %2, %cst_32 {dimension_numbers = #tpu.dot_dimension_numbers<[1], [0], [0], [1], [0, 0, 1, 1], [], []>} : vector<8x256xbf16>, vector<256x256xbf16>, vector<8x256xf32> -> vector<8x256xf32>
    %72 = vector.broadcast %3 : vector<1x256xf32> to vector<8x256xf32>
    %73 = arith.addf %71, %72 : vector<8x256xf32>
    %cst_33 = arith.constant 0.000000e+00 : f32
    %74 = vector.broadcast %cst_33 : f32 to vector<8x256xf32>
    %75 = arith.maximumf %73, %74 : vector<8x256xf32>
    %76 = arith.truncf %75 : vector<8x256xf32> to vector<8x256xbf16>
    %cst_34 = arith.constant dense<0.000000e+00> : vector<8x256xf32>
    %77 = tpu.matmul %76, %4, %cst_34 {dimension_numbers = #tpu.dot_dimension_numbers<[1], [0], [0], [1], [0, 0, 1, 1], [], []>} : vector<8x256xbf16>, vector<256x256xbf16>, vector<8x256xf32> -> vector<8x256xf32>
    %78 = vector.broadcast %5 : vector<1x256xf32> to vector<8x256xf32>
    %79 = arith.addf %77, %78 : vector<8x256xf32>
    %cst_35 = arith.constant 1.000000e-01 : f32
    %80 = vector.broadcast %cst_35 : f32 to vector<8x256xf32>
    %81 = arith.mulf %80, %79 : vector<8x256xf32>
    %82 = arith.addf %63, %81 : vector<8x256xf32>
    %83 = arith.truncf %82 : vector<8x256xf32> to vector<8x256xbf16>
    %cst_36 = arith.constant dense<0.000000e+00> : vector<8x256xf32>
    %84 = tpu.matmul %83, %0, %cst_36 {dimension_numbers = #tpu.dot_dimension_numbers<[1], [0], [0], [1], [0, 0, 1, 1], [], []>} : vector<8x256xbf16>, vector<256x256xbf16>, vector<8x256xf32> -> vector<8x256xf32>
    %85 = vector.broadcast %1 : vector<1x256xf32> to vector<8x256xf32>
    %86 = arith.addf %84, %85 : vector<8x256xf32>
    %cst_37 = arith.constant 0.000000e+00 : f32
    %87 = vector.broadcast %cst_37 : f32 to vector<8x256xf32>
    %88 = arith.maximumf %86, %87 : vector<8x256xf32>
    %89 = arith.truncf %88 : vector<8x256xf32> to vector<8x256xbf16>
    %cst_38 = arith.constant dense<0.000000e+00> : vector<8x256xf32>
    %90 = tpu.matmul %89, %2, %cst_38 {dimension_numbers = #tpu.dot_dimension_numbers<[1], [0], [0], [1], [0, 0, 1, 1], [], []>} : vector<8x256xbf16>, vector<256x256xbf16>, vector<8x256xf32> -> vector<8x256xf32>
    %91 = vector.broadcast %3 : vector<1x256xf32> to vector<8x256xf32>
    %92 = arith.addf %90, %91 : vector<8x256xf32>
    %cst_39 = arith.constant 0.000000e+00 : f32
    %93 = vector.broadcast %cst_39 : f32 to vector<8x256xf32>
    %94 = arith.maximumf %92, %93 : vector<8x256xf32>
    %95 = arith.truncf %94 : vector<8x256xf32> to vector<8x256xbf16>
    %cst_40 = arith.constant dense<0.000000e+00> : vector<8x256xf32>
    %96 = tpu.matmul %95, %4, %cst_40 {dimension_numbers = #tpu.dot_dimension_numbers<[1], [0], [0], [1], [0, 0, 1, 1], [], []>} : vector<8x256xbf16>, vector<256x256xbf16>, vector<8x256xf32> -> vector<8x256xf32>
    %97 = vector.broadcast %5 : vector<1x256xf32> to vector<8x256xf32>
    %98 = arith.addf %96, %97 : vector<8x256xf32>
    %cst_41 = arith.constant 1.000000e-01 : f32
    %99 = vector.broadcast %cst_41 : f32 to vector<8x256xf32>
    %100 = arith.mulf %99, %98 : vector<8x256xf32>
    %101 = arith.addf %82, %100 : vector<8x256xf32>
    %102 = arith.truncf %101 : vector<8x256xf32> to vector<8x256xbf16>
    %cst_42 = arith.constant dense<0.000000e+00> : vector<8x256xf32>
    %103 = tpu.matmul %102, %0, %cst_42 {dimension_numbers = #tpu.dot_dimension_numbers<[1], [0], [0], [1], [0, 0, 1, 1], [], []>} : vector<8x256xbf16>, vector<256x256xbf16>, vector<8x256xf32> -> vector<8x256xf32>
    %104 = vector.broadcast %1 : vector<1x256xf32> to vector<8x256xf32>
    %105 = arith.addf %103, %104 : vector<8x256xf32>
    %cst_43 = arith.constant 0.000000e+00 : f32
    %106 = vector.broadcast %cst_43 : f32 to vector<8x256xf32>
    %107 = arith.maximumf %105, %106 : vector<8x256xf32>
    %108 = arith.truncf %107 : vector<8x256xf32> to vector<8x256xbf16>
    %cst_44 = arith.constant dense<0.000000e+00> : vector<8x256xf32>
    %109 = tpu.matmul %108, %2, %cst_44 {dimension_numbers = #tpu.dot_dimension_numbers<[1], [0], [0], [1], [0, 0, 1, 1], [], []>} : vector<8x256xbf16>, vector<256x256xbf16>, vector<8x256xf32> -> vector<8x256xf32>
    %110 = vector.broadcast %3 : vector<1x256xf32> to vector<8x256xf32>
    %111 = arith.addf %109, %110 : vector<8x256xf32>
    %cst_45 = arith.constant 0.000000e+00 : f32
    %112 = vector.broadcast %cst_45 : f32 to vector<8x256xf32>
    %113 = arith.maximumf %111, %112 : vector<8x256xf32>
    %114 = arith.truncf %113 : vector<8x256xf32> to vector<8x256xbf16>
    %cst_46 = arith.constant dense<0.000000e+00> : vector<8x256xf32>
    %115 = tpu.matmul %114, %4, %cst_46 {dimension_numbers = #tpu.dot_dimension_numbers<[1], [0], [0], [1], [0, 0, 1, 1], [], []>} : vector<8x256xbf16>, vector<256x256xbf16>, vector<8x256xf32> -> vector<8x256xf32>
    %116 = vector.broadcast %5 : vector<1x256xf32> to vector<8x256xf32>
    %117 = arith.addf %115, %116 : vector<8x256xf32>
    %cst_47 = arith.constant 1.000000e-01 : f32
    %118 = vector.broadcast %cst_47 : f32 to vector<8x256xf32>
    %119 = arith.mulf %118, %117 : vector<8x256xf32>
    %120 = arith.addf %101, %119 : vector<8x256xf32>
    %121 = arith.truncf %120 : vector<8x256xf32> to vector<8x256xbf16>
    %cst_48 = arith.constant dense<0.000000e+00> : vector<8x256xf32>
    %122 = tpu.matmul %121, %0, %cst_48 {dimension_numbers = #tpu.dot_dimension_numbers<[1], [0], [0], [1], [0, 0, 1, 1], [], []>} : vector<8x256xbf16>, vector<256x256xbf16>, vector<8x256xf32> -> vector<8x256xf32>
    %123 = vector.broadcast %1 : vector<1x256xf32> to vector<8x256xf32>
    %124 = arith.addf %122, %123 : vector<8x256xf32>
    %cst_49 = arith.constant 0.000000e+00 : f32
    %125 = vector.broadcast %cst_49 : f32 to vector<8x256xf32>
    %126 = arith.maximumf %124, %125 : vector<8x256xf32>
    %127 = arith.truncf %126 : vector<8x256xf32> to vector<8x256xbf16>
    %cst_50 = arith.constant dense<0.000000e+00> : vector<8x256xf32>
    %128 = tpu.matmul %127, %2, %cst_50 {dimension_numbers = #tpu.dot_dimension_numbers<[1], [0], [0], [1], [0, 0, 1, 1], [], []>} : vector<8x256xbf16>, vector<256x256xbf16>, vector<8x256xf32> -> vector<8x256xf32>
    %129 = vector.broadcast %3 : vector<1x256xf32> to vector<8x256xf32>
    %130 = arith.addf %128, %129 : vector<8x256xf32>
    %cst_51 = arith.constant 0.000000e+00 : f32
    %131 = vector.broadcast %cst_51 : f32 to vector<8x256xf32>
    %132 = arith.maximumf %130, %131 : vector<8x256xf32>
    %133 = arith.truncf %132 : vector<8x256xf32> to vector<8x256xbf16>
    %cst_52 = arith.constant dense<0.000000e+00> : vector<8x256xf32>
    %134 = tpu.matmul %133, %4, %cst_52 {dimension_numbers = #tpu.dot_dimension_numbers<[1], [0], [0], [1], [0, 0, 1, 1], [], []>} : vector<8x256xbf16>, vector<256x256xbf16>, vector<8x256xf32> -> vector<8x256xf32>
    %135 = vector.broadcast %5 : vector<1x256xf32> to vector<8x256xf32>
    %136 = arith.addf %134, %135 : vector<8x256xf32>
    %cst_53 = arith.constant 1.000000e-01 : f32
    %137 = vector.broadcast %cst_53 : f32 to vector<8x256xf32>
    %138 = arith.mulf %137, %136 : vector<8x256xf32>
    %139 = arith.addf %120, %138 : vector<8x256xf32>
    %140 = arith.truncf %139 : vector<8x256xf32> to vector<8x256xbf16>
    %cst_54 = arith.constant dense<0.000000e+00> : vector<8x256xf32>
    %141 = tpu.matmul %140, %0, %cst_54 {dimension_numbers = #tpu.dot_dimension_numbers<[1], [0], [0], [1], [0, 0, 1, 1], [], []>} : vector<8x256xbf16>, vector<256x256xbf16>, vector<8x256xf32> -> vector<8x256xf32>
    %142 = vector.broadcast %1 : vector<1x256xf32> to vector<8x256xf32>
    %143 = arith.addf %141, %142 : vector<8x256xf32>
    %cst_55 = arith.constant 0.000000e+00 : f32
    %144 = vector.broadcast %cst_55 : f32 to vector<8x256xf32>
    %145 = arith.maximumf %143, %144 : vector<8x256xf32>
    %146 = arith.truncf %145 : vector<8x256xf32> to vector<8x256xbf16>
    %cst_56 = arith.constant dense<0.000000e+00> : vector<8x256xf32>
    %147 = tpu.matmul %146, %2, %cst_56 {dimension_numbers = #tpu.dot_dimension_numbers<[1], [0], [0], [1], [0, 0, 1, 1], [], []>} : vector<8x256xbf16>, vector<256x256xbf16>, vector<8x256xf32> -> vector<8x256xf32>
    %148 = vector.broadcast %3 : vector<1x256xf32> to vector<8x256xf32>
    %149 = arith.addf %147, %148 : vector<8x256xf32>
    %cst_57 = arith.constant 0.000000e+00 : f32
    %150 = vector.broadcast %cst_57 : f32 to vector<8x256xf32>
    %151 = arith.maximumf %149, %150 : vector<8x256xf32>
    %152 = arith.truncf %151 : vector<8x256xf32> to vector<8x256xbf16>
    %cst_58 = arith.constant dense<0.000000e+00> : vector<8x256xf32>
    %153 = tpu.matmul %152, %4, %cst_58 {dimension_numbers = #tpu.dot_dimension_numbers<[1], [0], [0], [1], [0, 0, 1, 1], [], []>} : vector<8x256xbf16>, vector<256x256xbf16>, vector<8x256xf32> -> vector<8x256xf32>
    %154 = vector.broadcast %5 : vector<1x256xf32> to vector<8x256xf32>
    %155 = arith.addf %153, %154 : vector<8x256xf32>
    %cst_59 = arith.constant 1.000000e-01 : f32
    %156 = vector.broadcast %cst_59 : f32 to vector<8x256xf32>
    %157 = arith.mulf %156, %155 : vector<8x256xf32>
    %158 = arith.addf %139, %157 : vector<8x256xf32>
    %159 = arith.truncf %158 : vector<8x256xf32> to vector<8x256xbf16>
    %cst_60 = arith.constant dense<0.000000e+00> : vector<8x256xf32>
    %160 = tpu.matmul %159, %0, %cst_60 {dimension_numbers = #tpu.dot_dimension_numbers<[1], [0], [0], [1], [0, 0, 1, 1], [], []>} : vector<8x256xbf16>, vector<256x256xbf16>, vector<8x256xf32> -> vector<8x256xf32>
    %161 = vector.broadcast %1 : vector<1x256xf32> to vector<8x256xf32>
    %162 = arith.addf %160, %161 : vector<8x256xf32>
    %cst_61 = arith.constant 0.000000e+00 : f32
    %163 = vector.broadcast %cst_61 : f32 to vector<8x256xf32>
    %164 = arith.maximumf %162, %163 : vector<8x256xf32>
    %165 = arith.truncf %164 : vector<8x256xf32> to vector<8x256xbf16>
    %cst_62 = arith.constant dense<0.000000e+00> : vector<8x256xf32>
    %166 = tpu.matmul %165, %2, %cst_62 {dimension_numbers = #tpu.dot_dimension_numbers<[1], [0], [0], [1], [0, 0, 1, 1], [], []>} : vector<8x256xbf16>, vector<256x256xbf16>, vector<8x256xf32> -> vector<8x256xf32>
    %167 = vector.broadcast %3 : vector<1x256xf32> to vector<8x256xf32>
    %168 = arith.addf %166, %167 : vector<8x256xf32>
    %cst_63 = arith.constant 0.000000e+00 : f32
    %169 = vector.broadcast %cst_63 : f32 to vector<8x256xf32>
    %170 = arith.maximumf %168, %169 : vector<8x256xf32>
    %171 = arith.truncf %170 : vector<8x256xf32> to vector<8x256xbf16>
    %cst_64 = arith.constant dense<0.000000e+00> : vector<8x256xf32>
    %172 = tpu.matmul %171, %4, %cst_64 {dimension_numbers = #tpu.dot_dimension_numbers<[1], [0], [0], [1], [0, 0, 1, 1], [], []>} : vector<8x256xbf16>, vector<256x256xbf16>, vector<8x256xf32> -> vector<8x256xf32>
    %173 = vector.broadcast %5 : vector<1x256xf32> to vector<8x256xf32>
    %174 = arith.addf %172, %173 : vector<8x256xf32>
    %cst_65 = arith.constant 1.000000e-01 : f32
    %175 = vector.broadcast %cst_65 : f32 to vector<8x256xf32>
    %176 = arith.mulf %175, %174 : vector<8x256xf32>
    %177 = arith.addf %158, %176 : vector<8x256xf32>
    %178 = arith.truncf %177 : vector<8x256xf32> to vector<8x256xbf16>
    %cst_66 = arith.constant dense<0.000000e+00> : vector<8x256xf32>
    %179 = tpu.matmul %178, %0, %cst_66 {dimension_numbers = #tpu.dot_dimension_numbers<[1], [0], [0], [1], [0, 0, 1, 1], [], []>} : vector<8x256xbf16>, vector<256x256xbf16>, vector<8x256xf32> -> vector<8x256xf32>
    %180 = vector.broadcast %1 : vector<1x256xf32> to vector<8x256xf32>
    %181 = arith.addf %179, %180 : vector<8x256xf32>
    %cst_67 = arith.constant 0.000000e+00 : f32
    %182 = vector.broadcast %cst_67 : f32 to vector<8x256xf32>
    %183 = arith.maximumf %181, %182 : vector<8x256xf32>
    %184 = arith.truncf %183 : vector<8x256xf32> to vector<8x256xbf16>
    %cst_68 = arith.constant dense<0.000000e+00> : vector<8x256xf32>
    %185 = tpu.matmul %184, %2, %cst_68 {dimension_numbers = #tpu.dot_dimension_numbers<[1], [0], [0], [1], [0, 0, 1, 1], [], []>} : vector<8x256xbf16>, vector<256x256xbf16>, vector<8x256xf32> -> vector<8x256xf32>
    %186 = vector.broadcast %3 : vector<1x256xf32> to vector<8x256xf32>
    %187 = arith.addf %185, %186 : vector<8x256xf32>
    %cst_69 = arith.constant 0.000000e+00 : f32
    %188 = vector.broadcast %cst_69 : f32 to vector<8x256xf32>
    %189 = arith.maximumf %187, %188 : vector<8x256xf32>
    %190 = arith.truncf %189 : vector<8x256xf32> to vector<8x256xbf16>
    %cst_70 = arith.constant dense<0.000000e+00> : vector<8x256xf32>
    %191 = tpu.matmul %190, %4, %cst_70 {dimension_numbers = #tpu.dot_dimension_numbers<[1], [0], [0], [1], [0, 0, 1, 1], [], []>} : vector<8x256xbf16>, vector<256x256xbf16>, vector<8x256xf32> -> vector<8x256xf32>
    %192 = vector.broadcast %5 : vector<1x256xf32> to vector<8x256xf32>
    %193 = arith.addf %191, %192 : vector<8x256xf32>
    %cst_71 = arith.constant 1.000000e-01 : f32
    %194 = vector.broadcast %cst_71 : f32 to vector<8x256xf32>
    %195 = arith.mulf %194, %193 : vector<8x256xf32>
    %196 = arith.addf %177, %195 : vector<8x256xf32>
    %197 = tpu.concatenate %6, %25, %44, %63, %82, %101, %120, %139, %158, %177, %196 in 0 : vector<8x256xf32>, vector<8x256xf32>, vector<8x256xf32>, vector<8x256xf32>, vector<8x256xf32>, vector<8x256xf32>, vector<8x256xf32>, vector<8x256xf32>, vector<8x256xf32>, vector<8x256xf32>, vector<8x256xf32> -> vector<88x256xf32>
    %198 = arith.truncf %197 : vector<88x256xf32> to vector<88x256xbf16>
    %c0_72 = arith.constant 0 : index
    %c0_73 = arith.constant 0 : index
    %199 = vector.load %arg8[%c0_72, %c0_73] : memref<256x512xbf16, #tpu.memory_space<vmem>>, vector<256x512xbf16>
    %cst_74 = arith.constant dense<0.000000e+00> : vector<88x512xf32>
    %200 = tpu.matmul %198, %199, %cst_74 {dimension_numbers = #tpu.dot_dimension_numbers<[1], [0], [0], [1], [0, 0, 1, 1], [], []>} : vector<88x256xbf16>, vector<256x512xbf16>, vector<88x512xf32> -> vector<88x512xf32>
    %c0_75 = arith.constant 0 : index
    %c0_76 = arith.constant 0 : index
    %201 = vector.load %arg9[%c0_75, %c0_76] : memref<1x512xf32, #tpu.memory_space<vmem>>, vector<1x512xf32>
    %202 = vector.broadcast %201 : vector<1x512xf32> to vector<88x512xf32>
    %203 = arith.addf %200, %202 : vector<88x512xf32>
    %cst_77 = arith.constant 0.000000e+00 : f32
    %204 = vector.broadcast %cst_77 : f32 to vector<88x512xf32>
    %205 = arith.maximumf %203, %204 : vector<88x512xf32>
    %206 = arith.truncf %205 : vector<88x512xf32> to vector<88x512xbf16>
    %c0_78 = arith.constant 0 : index
    %c0_79 = arith.constant 0 : index
    %207 = vector.load %arg10[%c0_78, %c0_79] : memref<512x256xbf16, #tpu.memory_space<vmem>>, vector<512x256xbf16>
    %cst_80 = arith.constant dense<0.000000e+00> : vector<88x256xf32>
    %208 = tpu.matmul %206, %207, %cst_80 {dimension_numbers = #tpu.dot_dimension_numbers<[1], [0], [0], [1], [0, 0, 1, 1], [], []>} : vector<88x512xbf16>, vector<512x256xbf16>, vector<88x256xf32> -> vector<88x256xf32>
    %c0_81 = arith.constant 0 : index
    %c0_82 = arith.constant 0 : index
    %209 = vector.load %arg11[%c0_81, %c0_82] : memref<1x256xf32, #tpu.memory_space<vmem>>, vector<1x256xf32>
    %210 = vector.broadcast %209 : vector<1x256xf32> to vector<88x256xf32>
    %211 = arith.addf %208, %210 : vector<88x256xf32>
    %cst_83 = arith.constant 0.000000e+00 : f32
    %212 = vector.broadcast %cst_83 : f32 to vector<88x256xf32>
    %213 = arith.maximumf %211, %212 : vector<88x256xf32>
    %214 = arith.truncf %213 : vector<88x256xf32> to vector<88x256xbf16>
    %c0_84 = arith.constant 0 : index
    %c0_85 = arith.constant 0 : index
    %215 = vector.load %arg12[%c0_84, %c0_85] : memref<256x128xbf16, #tpu.memory_space<vmem>>, vector<256x128xbf16>
    %cst_86 = arith.constant dense<0.000000e+00> : vector<88x128xf32>
    %216 = tpu.matmul %214, %215, %cst_86 {dimension_numbers = #tpu.dot_dimension_numbers<[1], [0], [0], [1], [0, 0, 1, 1], [], []>} : vector<88x256xbf16>, vector<256x128xbf16>, vector<88x128xf32> -> vector<88x128xf32>
    %c0_87 = arith.constant 0 : index
    %c0_88 = arith.constant 0 : index
    %217 = vector.load %arg13[%c0_87, %c0_88] : memref<1x128xf32, #tpu.memory_space<vmem>>, vector<1x128xf32>
    %218 = vector.broadcast %217 : vector<1x128xf32> to vector<88x128xf32>
    %219 = arith.addf %216, %218 : vector<88x128xf32>
    %c0_89 = arith.constant 0 : index
    %c0_90 = arith.constant 0 : index
    %c0_91 = arith.constant 0 : index
    %220 = vector.load %arg14[%c0_89, %c0_90, %c0_91] : memref<1x88x128xf32, #tpu.memory_space<vmem>>, vector<1x88x128xf32>
    %221 = vector.shape_cast %220 : vector<1x88x128xf32> to vector<88x128xf32>
    %222 = vector.shape_cast %219 : vector<88x128xf32> to vector<1x88x128xf32>
    tpu.vector_store %arg14[%c0_89, %c0_90, %c0_91], %222 {strides = array<i32>} : memref<1x88x128xf32, #tpu.memory_space<vmem>>, vector<1x88x128xf32>,
    return
  }
  func.func @transform_0(%arg0: i32) -> (i32, i32) {
    %c0_i32 = arith.constant 0 : i32
    %c0_i32_0 = arith.constant 0 : i32
    return %arg0, %c0_i32 : i32, i32
  }
  func.func @transform_1(%arg0: i32) -> (i32, i32) {
    %c0_i32 = arith.constant 0 : i32
    %c0_i32_0 = arith.constant 0 : i32
    %c0_i32_1 = arith.constant 0 : i32
    return %c0_i32, %c0_i32_0 : i32, i32
  }
  func.func @transform_2(%arg0: i32) -> (i32, i32) {
    %c0_i32 = arith.constant 0 : i32
    %c0_i32_0 = arith.constant 0 : i32
    %c0_i32_1 = arith.constant 0 : i32
    return %c0_i32, %c0_i32_0 : i32, i32
  }
  func.func @transform_3(%arg0: i32) -> (i32, i32) {
    %c0_i32 = arith.constant 0 : i32
    %c0_i32_0 = arith.constant 0 : i32
    %c0_i32_1 = arith.constant 0 : i32
    return %c0_i32, %c0_i32_0 : i32, i32
  }
  func.func @transform_4(%arg0: i32) -> (i32, i32) {
    %c0_i32 = arith.constant 0 : i32
    %c0_i32_0 = arith.constant 0 : i32
    %c0_i32_1 = arith.constant 0 : i32
    return %c0_i32, %c0_i32_0 : i32, i32
  }
  func.func @transform_5(%arg0: i32) -> (i32, i32) {
    %c0_i32 = arith.constant 0 : i32
    %c0_i32_0 = arith.constant 0 : i32
    %c0_i32_1 = arith.constant 0 : i32
    return %c0_i32, %c0_i32_0 : i32, i32
  }
  func.func @transform_6(%arg0: i32) -> (i32, i32) {
    %c0_i32 = arith.constant 0 : i32
    %c0_i32_0 = arith.constant 0 : i32
    %c0_i32_1 = arith.constant 0 : i32
    return %c0_i32, %c0_i32_0 : i32, i32
  }
  func.func @transform_7(%arg0: i32) -> (i32, i32) {
    %c0_i32 = arith.constant 0 : i32
    %c0_i32_0 = arith.constant 0 : i32
    %c0_i32_1 = arith.constant 0 : i32
    return %c0_i32, %c0_i32_0 : i32, i32
  }
  func.func @transform_8(%arg0: i32) -> (i32, i32) {
    %c0_i32 = arith.constant 0 : i32
    %c0_i32_0 = arith.constant 0 : i32
    %c0_i32_1 = arith.constant 0 : i32
    return %c0_i32, %c0_i32_0 : i32, i32
  }
  func.func @transform_9(%arg0: i32) -> (i32, i32) {
    %c0_i32 = arith.constant 0 : i32
    %c0_i32_0 = arith.constant 0 : i32
    %c0_i32_1 = arith.constant 0 : i32
    return %c0_i32, %c0_i32_0 : i32, i32
  }
  func.func @transform_10(%arg0: i32) -> (i32, i32) {
    %c0_i32 = arith.constant 0 : i32
    %c0_i32_0 = arith.constant 0 : i32
    %c0_i32_1 = arith.constant 0 : i32
    return %c0_i32, %c0_i32_0 : i32, i32
  }
  func.func @transform_11(%arg0: i32) -> (i32, i32) {
    %c0_i32 = arith.constant 0 : i32
    %c0_i32_0 = arith.constant 0 : i32
    %c0_i32_1 = arith.constant 0 : i32
    return %c0_i32, %c0_i32_0 : i32, i32
  }
  func.func @transform_12(%arg0: i32) -> (i32, i32) {
    %c0_i32 = arith.constant 0 : i32
    %c0_i32_0 = arith.constant 0 : i32
    %c0_i32_1 = arith.constant 0 : i32
    return %c0_i32, %c0_i32_0 : i32, i32
  }
  func.func @transform_13(%arg0: i32) -> (i32, i32, i32) {
    %c0_i32 = arith.constant 0 : i32
    %c0_i32_0 = arith.constant 0 : i32
    %c0_i32_1 = arith.constant 0 : i32
    return %arg0, %c0_i32, %c0_i32_0 : i32, i32, i32
  }
}

</mosaic_0001>

<bundles_post_ra>
// kernel: tpu_custom_call.1
= control target key start
LH: loop header
LB: loop body
LE: loop exit
PB: predicated region body
PF: predicated region fallthrough
CT: control target
= control target key end

     0   :  { %s8008_s0 = inlined_call_operand.hbm [shape: f32[16,256], index: 0, kind: input, shape index: {}]   ;;  %s8009_s1 = inlined_call_operand.hbm [shape: bf16[256,256], index: 1, kind: input, shape index: {}]   ;;  %s8010_s2 = inlined_call_operand.vmem [shape: f32[1,256], index: 2, kind: input, shape index: {}]   ;;  %s8011_s3 = inlined_call_operand.hbm [shape: bf16[256,256], index: 3, kind: input, shape index: {}]   ;;  %s8012_s4 = inlined_call_operand.vmem [shape: f32[1,256], index: 4, kind: input, shape index: {}]   ;;  %s8013_s5 = inlined_call_operand.hbm [shape: bf16[256,256], index: 5, kind: input, shape index: {}]   ;;  %s8014_s6 = inlined_call_operand.vmem [shape: f32[1,256], index: 6, kind: input, shape index: {}]   ;;  %s8015_s7 = inlined_call_operand.hbm [shape: bf16[256,512], index: 7, kind: input, shape index: {}]   ;;  %s8016_s8 = inlined_call_operand.vmem [shape: f32[1,512], index: 8, kind: input, shape index: {}]   ;;  %s8017_s9 = inlined_call_operand.hbm [shape: bf16[512,256], index: 9, kind: input, shape index: {}]   ;;  %s8018_s10 = inlined_call_operand.vmem [shape: f32[1,256], index: 10, kind: input, shape index: {}]   ;;  %s8019_s11 = inlined_call_operand.hbm [shape: bf16[256,128], index: 11, kind: input, shape index: {}]   ;;  %s8020_s12 = inlined_call_operand.vmem [shape: f32[1,128], index: 12, kind: input, shape index: {}]   ;;  %s8021_s13 = inlined_call_operand.hbm [shape: f32[2,88,128], index: 13, kind: output, shape index: {}]  }
   0x1   :  { %8379 = sst [smem:[#allocation85_spill]] %s8009_s1 }
   0x2   :  { %8380 = sst [smem:[#allocation86_spill]] %s8014_s6 }
   0x3   :  { %8381 = sst [smem:[#allocation87_spill]] %s8016_s8 }
   0x4   :  { %8382 = sst [smem:[#allocation88_spill]] %s8018_s10 }
   0x5   :  { %8383 = sst [smem:[#allocation89_spill]] %s8020_s12 }
   0x6   :  { %8384 = sst [smem:[#allocation90_spill]] %s8021_s13 }
   0x7   :  { %18 = vsyncpa [#allocation3], 0 }
   0x8   :  { %20 = vsyncpa [#allocation3 + $0x1], 0 }
   0x9   :  { %21 = vsyncpa [#allocation6], 0 }
   0xa   :  { %22 = vsyncpa [#allocation9], 0 }
   0xb   :  { %23 = vsyncpa [#allocation12], 0 }
   0xc   :  { %24 = vsyncpa [#allocation4], 0 }
   0xd   :  { %26 = vsyncpa [#allocation4 + $0x1], 0  ;;  %s5599_s25 = smov 0   ;;  %s5601_s26 = smov 0  }
   0xe   :  { %s5603_s27 = smov 0   ;;  %s5605_s28 = smov 0  }
   0xf LB: > { %s5513_s29 = smov [#allocation5]   ;;  %s5620_s14 = sadd.s32 4294967295, %s5511_s28   ;;  %s5511_s28 = sphi %s5605_s28, %s8923_s28   ;;  %s5507_s27 = sphi %s5603_s27, %s8922_s27   ;;  %s5503_s26 = sphi %s5601_s26, %s8921_s26   ;;  %s5499_s25 = sphi %s5599_s25, %s8920_s25  }
  0x10   : > { %s353_s30 = sshll.u32 %s5513_s29, 4  ;;  %p4180_p0 = scmp.ge.s32.totalorder %s5511_s28, 1  ;;  %s5625_s30 = int_to_ptr.vmem [resolvable:$true] %s353_s30 }
  0x11   : > { %p8023_p1 = scmp.eq.s32.totalorder %s5620_s14, 0  ;;  %p341_p2 = scmp.lt.s32.totalorder %s5511_s28, 3 }
  0x12   : > { %s5514_s16 = smov [#allocation8]   ;;  %s5515_s19 = smov [#allocation11]  }
  0x13   : > { %p5627_p3 = pnand %p4180_p0, %p341_p2  ;;  %s385_s17 = sshll.u32 %s5514_s16, 4  ;;  %s5640_s17 = int_to_ptr.vmem [resolvable:$true] %s385_s17 }
  0x14   : > { %s417_s20 = sshll.u32 %s5515_s19, 4  ;;  %s8387_s1 = sld [smem:[#allocation85_spill]]  ;;  %s5642_s20 = int_to_ptr.vmem [resolvable:$true] %s417_s20 }
  0x15   : > { %s8385_s15 = scalar_select %p5627_p3, 1, 0 }
  0x16   : > { %p4602_p5 = pneg %p5627_p3 }
  0x18   : > { %p5636_p6 = pnand %p4602_p5, %p8023_p1 }
  0x1a   : > { %s5235_s23 = scalar_lea.hbm %s8387_s1, 4096  ;;  %p5652_p8 = pneg %p5636_p6 }
  0x1b   : > { %p5236_p7 = scmp.ne.s32.totalorder %s8387_s1, %s5235_s23  ;;  %p5242_p11 = scmp.lt.u32.totalorder %s5235_s23, %s8387_s1 }
  0x1d   : > { %p5238_p9 = pnand %p5652_p8, %p5236_p7 }
  0x1f   : > { %p5239_p10 = pneg %p5238_p9 }
  0x21   : > { %p5244_p12 = pnand %p5242_p11, %p5239_p10 }
  0x23   : > { %5247 = shalt.err (!%p5244_p12)
}
  0x24   : > { %s5248_s21 = scalar_lea.vmem %s5625_s30, 4096  ;;  %p5256_p5 = scmp.lt.s32.totalorder %s5625_s30, %s5625_s30 }
  0x25   : > { %p5249_p13 = scmp.ne.s32.totalorder %s5625_s30, %s5248_s21  ;;  %p5257_p4 = scmp.lt.s32.totalorder %s5248_s21, %s5248_s21 }
  0x27   : > { %p5251_p0 = pnand %p5249_p13, %p5652_p8  ;;  %p5258_p7 = por %p5257_p4, %p5256_p5 }
  0x29   : > { %p5252_p2 = pneg %p5251_p0 }
  0x2b   : > { %p5259_p9 = pnand %p5258_p7, %p5252_p2 }
  0x2d   : > { %5262 = shalt.err (!%p5259_p9)
}
  0x2e   : > { %s5516_s22 = smov 128   ;;  %s5517_s13 = smov 8  }
  0x2f   : > { %4605 = dma.hbm_to_vmem [thread:$0]  (!%p5636_p6), %s8387_s1, 4096, %s5625_s30, [#allocation6], %s5516_s22, %s5516_s22, %s5517_s13  }
  0x30   : > { %s5263_s21 = scalar_lea.hbm %s8013_s5, 4096 }
  0x31   : > { %p5264_p4 = scmp.ne.s32.totalorder %s8013_s5, %s5263_s21  ;;  %p5270_p12 = scmp.lt.u32.totalorder %s5263_s21, %s8013_s5 }
  0x33   : > { %p5266_p10 = pnand %p5264_p4, %p5652_p8 }
  0x35   : > { %p5267_p11 = pneg %p5266_p10 }
  0x37   : > { %p5272_p13 = pnand %p5270_p12, %p5267_p11 }
  0x39   : > { %5275 = shalt.err (!%p5272_p13)
}
  0x3a   : > { %s5276_s30 = scalar_lea.vmem %s5640_s17, 4096  ;;  %p5284_p7 = scmp.lt.s32.totalorder %s5640_s17, %s5640_s17 }
  0x3b   : > { %p5277_p0 = scmp.ne.s32.totalorder %s5640_s17, %s5276_s30  ;;  %p5285_p9 = scmp.lt.s32.totalorder %s5276_s30, %s5276_s30 }
  0x3d   : > { %p5279_p2 = pnand %p5277_p0, %p5652_p8  ;;  %p5286_p4 = por %p5285_p9, %p5284_p7 }
  0x3f   : > { %p5280_p5 = pneg %p5279_p2 }
  0x41   : > { %p5287_p10 = pnand %p5286_p4, %p5280_p5 }
  0x43   : > { %5290 = shalt.err (!%p5287_p10)
}
  0x44   : > { %4611 = dma.hbm_to_vmem [thread:$0]  (!%p5636_p6), %s8013_s5, 4096, %s5640_s17, [#allocation9], %s5516_s22, %s5516_s22, %s5517_s13  }
  0x45   : > { %s5291_s23 = scalar_lea.hbm %s8017_s9, 8192 }
  0x46   : > { %p5292_p11 = scmp.ne.s32.totalorder %s8017_s9, %s5291_s23  ;;  %p5298_p0 = scmp.lt.u32.totalorder %s5291_s23, %s8017_s9 }
  0x48   : > { %p5294_p12 = pnand %p5292_p11, %p5652_p8 }
  0x4a   : > { %p5295_p13 = pneg %p5294_p12 }
  0x4c   : > { %p5300_p2 = pnand %p5298_p0, %p5295_p13 }
  0x4e   : > { %5303 = shalt.err (!%p5300_p2)
}
  0x4f   : > { %s5304_s17 = scalar_lea.vmem %s5642_s20, 8192  ;;  %p5312_p4 = scmp.lt.s32.totalorder %s5642_s20, %s5642_s20 }
  0x50   : > { %p5305_p5 = scmp.ne.s32.totalorder %s5642_s20, %s5304_s17  ;;  %p5313_p10 = scmp.lt.s32.totalorder %s5304_s17, %s5304_s17 }
  0x52   : > { %p5307_p7 = pnand %p5305_p5, %p5652_p8  ;;  %p5314_p11 = por %p5313_p10, %p5312_p4 }
  0x54   : > { %p5308_p9 = pneg %p5307_p7 }
  0x56   : > { %p5315_p12 = pnand %p5314_p11, %p5308_p9 }
  0x58   : > { %5318 = shalt.err (!%p5315_p12)
}
  0x59   : > { %4617 = dma.hbm_to_vmem [thread:$0]  (!%p5636_p6), %s8017_s9, 8192, %s5642_s20, [#allocation12], %s5516_s22, %s5516_s22, %s5517_s13  }
  0x5a   : > { %s5518_s8 = smov [#allocation7]   ;;  %s5519_s12 = smov [#allocation10]  }
  0x5b   : > { %s369_s10 = sshll.u32 %s5518_s8, 4  ;;  %s401_s23 = sshll.u32 %s5519_s12, 4  ;;  %s370_s10 = int_to_ptr.vmem [resolvable:$true] %s369_s10  ;;  %s402_s23 = int_to_ptr.vmem [resolvable:$true] %s401_s23 }
  0x5c   : > { %s5319_s19 = scalar_lea.hbm %s8011_s3, 4096 }
  0x5d   : > { %p5320_p13 = scmp.ne.s32.totalorder %s8011_s3, %s5319_s19  ;;  %p5326_p5 = scmp.lt.u32.totalorder %s5319_s19, %s8011_s3 }
  0x5f   : > { %p5322_p0 = pnand %p5320_p13, %p5652_p8 }
  0x61   : > { %p5323_p2 = pneg %p5322_p0 }
  0x63   : > { %p5328_p7 = pnand %p5326_p5, %p5323_p2 }
  0x65   : > { %5331 = shalt.err (!%p5328_p7)
}
  0x66   : > { %s5332_s20 = scalar_lea.vmem %s370_s10, 4096  ;;  %p5340_p11 = scmp.lt.s32.totalorder %s370_s10, %s370_s10 }
  0x67   : > { %p5333_p9 = scmp.ne.s32.totalorder %s370_s10, %s5332_s20  ;;  %p5341_p12 = scmp.lt.s32.totalorder %s5332_s20, %s5332_s20 }
  0x69   : > { %p5335_p4 = pnand %p5333_p9, %p5652_p8  ;;  %p5342_p1 = por %p5341_p12, %p5340_p11 }
  0x6b   : > { %p5336_p10 = pneg %p5335_p4 }
  0x6d   : > { %p5343_p3 = pnand %p5342_p1, %p5336_p10 }
  0x6f   : > { %5346 = shalt.err (!%p5343_p3)
}
  0x70   : > { %4608 = dma.hbm_to_vmem [thread:$0]  (!%p5636_p6), %s8011_s3, 4096, %s370_s10, [#allocation6], %s5516_s22, %s5516_s22, %s5517_s13  }
  0x71   : > { %s5347_s24 = scalar_lea.hbm %s8015_s7, 8192 }
  0x72   : > { %p5348_p1 = scmp.ne.s32.totalorder %s8015_s7, %s5347_s24  ;;  %p5354_p0 = scmp.lt.u32.totalorder %s5347_s24, %s8015_s7 }
  0x74   : > { %p5350_p3 = pnand %p5348_p1, %p5652_p8 }
  0x76   : > { %p5351_p13 = pneg %p5350_p3 }
  0x78   : > { %p5356_p2 = pnand %p5354_p0, %p5351_p13 }
  0x7a   : > { %5359 = shalt.err (!%p5356_p2)
}
  0x7b   : > { %s5360_s30 = scalar_lea.vmem %s402_s23, 8192  ;;  %p5368_p4 = scmp.lt.s32.totalorder %s402_s23, %s402_s23 }
  0x7c   : > { %p5361_p5 = scmp.ne.s32.totalorder %s402_s23, %s5360_s30  ;;  %p5369_p10 = scmp.lt.s32.totalorder %s5360_s30, %s5360_s30 }
  0x7e   : > { %p5363_p7 = pnand %p5361_p5, %p5652_p8  ;;  %p5370_p11 = por %p5369_p10, %p5368_p4 }
  0x80   : > { %p5364_p9 = pneg %p5363_p7 }
  0x82   : > { %p5371_p12 = pnand %p5370_p11, %p5364_p9 }
  0x84   : > { %5374 = shalt.err (!%p5371_p12)
}
  0x85   : > { %s5520_s22 = smov 256   ;;  %s5521_s13 = smov 16  }
  0x86   : > { %4614 = dma.hbm_to_vmem [thread:$0]  (!%p5636_p6), %s8015_s7, 8192, %s402_s23, [#allocation9], %s5520_s22, %s5520_s22, %s5521_s13  }
  0x87   : > { %s5522_s1 = smov [#allocation13]   ;;  %s5375_s24 = scalar_lea.hbm %s8019_s11, 2048 }
  0x88   : > { %s433_s6 = sshll.u32 %s5522_s1, 4  ;;  %p5376_p1 = scmp.ne.s32.totalorder %s8019_s11, %s5375_s24  ;;  %s434_s6 = int_to_ptr.vmem [resolvable:$true] %s433_s6 }
  0x89   : > { %p5382_p0 = scmp.lt.u32.totalorder %s5375_s24, %s8019_s11 }
  0x8a   : > { %p5378_p3 = pnand %p5376_p1, %p5652_p8 }
  0x8c   : > { %p5379_p13 = pneg %p5378_p3 }
  0x8e   : > { %p5384_p2 = pnand %p5382_p0, %p5379_p13 }
  0x90   : > { %5387 = shalt.err (!%p5384_p2)
}
  0x91   : > { %s5388_s23 = scalar_lea.vmem %s434_s6, 2048  ;;  %p5396_p4 = scmp.lt.s32.totalorder %s434_s6, %s434_s6 }
  0x92   : > { %p5389_p5 = scmp.ne.s32.totalorder %s434_s6, %s5388_s23  ;;  %p5397_p10 = scmp.lt.s32.totalorder %s5388_s23, %s5388_s23 }
  0x94   : > { %p5391_p7 = pnand %p5389_p5, %p5652_p8  ;;  %p5398_p11 = por %p5397_p10, %p5396_p4 }
  0x96   : > { %p5392_p9 = pneg %p5391_p7 }
  0x98   : > { %p5399_p12 = pnand %p5398_p11, %p5392_p9 }
  0x9a   : > { %5402 = shalt.err (!%p5399_p12)
}
  0x9b   : > { %s5523_s30 = smov 64   ;;  %s5524_s16 = smov 4  }
  0x9c   : > { %4620 = dma.hbm_to_vmem [thread:$0]  (!%p5636_p6), %s8019_s11, 2048, %s434_s6, [#allocation12], %s5523_s30, %s5523_s30, %s5524_s16  }
  0x9d   : > { %s4179_s10 = sadd.s32 4294967294, %s5511_s28   ;;  %s5787_s20 = sadd.s32 1, %s5511_s28  }
  0x9e   : > { %s36_s1 = ssub.s32 %s5511_s28, %s5787_s20  ;;  %s39_s8 = sadd.s32 1, %s5507_s27 }
  0x9f   : > { %p37_p8 = scmp.eq.s32.totalorder %s36_s1, 0  ;;  %p46_p1 = scmp.ne.s32.totalorder %s5507_s27, %s5503_s26 }
  0xa0   : > { %p47_p3 = scmp.eq.s32.totalorder %s5511_s28, 0  ;;  %p52_p13 = scmp.ne.s32.totalorder %s5503_s26, %s5499_s25 }
  0xa1   : > { %s5798_s12 = scalar_select %p37_p8, %s5507_s27, %s39_s8  }
  0xa2   : > { %p5800_p0 = por %p47_p3, %p46_p1  ;;  %p8390_p2 = scmp.eq.s32.totalorder %s5620_s14, 0 }
  0xa3   : > { %p328_p5 = scmp.eq.s32.totalorder %s5620_s14, 1  ;;  %p334_p7 = scmp.eq.s32.totalorder %s4179_s10, 1 }
  0xa4   : > { %p5806_p6 = por %p8390_p2, %p52_p13  ;;  %p4635_p9 = scmp.lt.s32.totalorder %s5511_s28, 2 }
  0xa5   : > { %s450_s24 = sand.u32 1, %s5507_s27   ;;  %p5813_p4 = por %p328_p5, %p46_p1 }
  0xa6   : > { %p5817_p10 = por %p334_p7, %p52_p13  ;;  %s4188_s21 = sshll.u32 %s450_s24, 4 }
  0xa7   : > { %s8392_s29 = scalar_select %p5813_p4, 1, 0 }
  0xa8   : > { %s8393_s19 = scalar_select %p5817_p10, 1, 0 }
  0xa9   : > { %s4443_s17 = sshll.u32 %s5511_s28, 8  ;;  %s454_s22 = scalar_lea.vmem [#allocation2], %s4188_s21 }
  0xaa   : > { %s5825_s16 = scalar_lea.hbm %s8008_s0, %s4443_s17  ;;  %s462_s13 = sshll.u32 %s454_s22, 4  ;;  %s5827_s13 = int_to_ptr.vmem [resolvable:$true] %s462_s13 }
  0xab   : > { %p5831_p11 = pnand %p4635_p9, %p5800_p0  ;;  %s451_s1 = scalar_lea.sflag [#allocation3], %s450_s24 }
  0xac   : > { %s5403_s8 = scalar_lea.hbm %s5825_s16, 256  ;;  %s5408_s23 = scalar_lea.hbm %s8008_s0, 512 }
  0xad   : > { %p5404_p12 = scmp.ne.s32.totalorder %s5825_s16, %s5403_s8  ;;  %p5405_p8 = pneg %p5831_p11 }
  0xae   : > { %p5409_p13 = scmp.lt.u32.totalorder %s5825_s16, %s8008_s0  ;;  %p5410_p0 = scmp.lt.u32.totalorder %s5408_s23, %s5403_s8 }
  0xaf   : > { %p5406_p1 = pnand %p5405_p8, %p5404_p12  ;;  %p5412_p5 = scmp.lt.u32.totalorder %s5403_s8, %s5825_s16 }
  0xb0   : > { %p5411_p2 = por %p5410_p0, %p5409_p13 }
  0xb1   : > { %p5407_p3 = pneg %p5406_p1 }
  0xb2   : > { %p5413_p7 = por %p5412_p5, %p5411_p2 }
  0xb4   : > { %p5414_p9 = pnand %p5413_p7, %p5407_p3 }
  0xb6   : > { %5417 = shalt.err (!%p5414_p9)
}
  0xb7   : > { %s5418_s24 = scalar_lea.vmem %s5827_s13, 256  ;;  %s5525_s22 = smov [#allocation2]  }
  0xb8   : > { %p5419_p12 = scmp.ne.s32.totalorder %s5827_s13, %s5418_s24  ;;  %s5423_s21 = sshll.u32 %s5525_s22, 4  ;;  %s5424_s21 = int_to_ptr.vmem [resolvable:$false] %s5423_s21 }
  0xb9   : > { %s5425_s17 = scalar_lea.vmem %s5424_s21, 512  ;;  %p5426_p4 = scmp.lt.s32.totalorder %s5827_s13, %s5424_s21 }
  0xba   : > { %p5421_p1 = pnand %p5419_p12, %p5405_p8  ;;  %p5427_p13 = scmp.lt.s32.totalorder %s5425_s17, %s5418_s24 }
  0xbc   : > { %p5422_p10 = pneg %p5421_p1  ;;  %p5428_p0 = por %p5427_p13, %p5426_p4 }
  0xbe   : > { %p5429_p2 = pnand %p5428_p0, %p5422_p10 }
  0xc0   : > { %5432 = shalt.err (!%p5429_p2)
}
  0xc1   : > { %4624 = dma.hbm_to_vmem [thread:$0]  (!%p5831_p11), %s5825_s16, 256, %s5827_s13, %s451_s1  }
  0xc2   : > { %p8395_p3 = scmp.ne.s32.totalorder %s8385_s15, 0 }
  0xc4   : > { %471 = sbr.rel (%p8395_p3) target bundleno = 7623 (0x1dc7), region = 72 }
  0xcb   : > { %s5863_s8 = sand.u32 1, %s5503_s26  }
  0xcc   : > { %s4192_s23 = sshll.u32 %s5863_s8, 4  ;;  %s474_s18 = scalar_lea.sflag [#allocation3], %s5863_s8 }
  0xcd   : > { %s5867_s30 = scalar_lea.vmem [#allocation2], %s4192_s23 }
  0xce   : > { %5478 = dma.done.wait (%p5806_p6), %s474_s18, 256  }
  0xcf   : > { %5480 = vsyncadd (%p5806_p6), %s474_s18, 4294967040  ;;  %p8396_p4 = scmp.eq.s32.totalorder %s5620_s14, 0 }
  0xd1   : > { %5482 = dma.done.wait (%p8396_p4), [#allocation6], 8192   ;;  %p8397_p10 = pmov %p8396_p4 }
  0xd2   : > { %p8398_p11 = pmov %p8396_p4 }
  0xd3   : > { %5484 = vsyncadd (%p8397_p10), [#allocation6], 4294959104 }
  0xd4   : > { %5486 = dma.done.wait (%p8398_p11), [#allocation9], 12288   ;;  %p8399_p8 = pmov %p8396_p4 }
  0xd5   : > { %p8400_p5 = pmov %p8396_p4 }
  0xd6   : > { %5488 = vsyncadd (%p8399_p8), [#allocation9], 4294955008 }
  0xd7   : > { %5490 = dma.done.wait (%p8400_p5), [#allocation12], 10240   ;;  %p8401_p7 = pmov %p8396_p4 }
  0xd8   : > { %v5885_v0 = vld [vmem:[#allocation5 + $0x4] ss:$8 sps:$4 sm:$0xff]   ;;  %v5887_v1 = vld [vmem:[#allocation5] ss:$8 sps:$4 sm:$0xff]   ;;  %v5890_v2 = vld [vmem:[#allocation5 + $0x14] ss:$8 sps:$4 sm:$0xff]  }
  0xd9   : > { %5492 = vsyncadd (%p8401_p7), [#allocation12], 4294957056  ;;  %819 = vmatprep.subr.bf16.mxu0 %v5885_v0  ;;  %v5893_v3 = vld [vmem:[#allocation5 + $0x10] ss:$8 sps:$4 sm:$0xff]   ;;  %v5896_v4 = vld [vmem:[#allocation5 + $0x24] ss:$8 sps:$4 sm:$0xff]  }
  0xda   : > { %820 = vmatpush1.bf16.msra.mxu0 %v5887_v1  ;;  %v5899_v5 = vld [vmem:[#allocation5 + $0x20] ss:$8 sps:$4 sm:$0xff]   ;;  %v5902_v6 = vld [vmem:[#allocation5 + $0x34] ss:$8 sps:$4 sm:$0xff]   ;;  %v5905_v7 = vld [vmem:[#allocation5 + $0x30] ss:$8 sps:$4 sm:$0xff]  }
  0xdb   : > { %821 = vmatprep.subr.bf16.mxu0 %v5890_v2  ;;  %v5908_v8 = vld [vmem:[#allocation5 + $0x44] ss:$8 sps:$4 sm:$0xff]   ;;  %v5911_v9 = vld [vmem:[#allocation5 + $0x40] ss:$8 sps:$4 sm:$0xff]   ;;  %v5914_v10 = vld [vmem:[#allocation5 + $0x54] ss:$8 sps:$4 sm:$0xff]  }
  0xdc   : > { %v5917_v11 = vld [vmem:[#allocation5 + $0x50] ss:$8 sps:$4 sm:$0xff]   ;;  %v5920_v12 = vld [vmem:[#allocation5 + $0x64] ss:$8 sps:$4 sm:$0xff]   ;;  %v5922_v13 = vld [vmem:[#allocation5 + $0x60] ss:$8 sps:$4 sm:$0xff]  }
  0xdd   : > { %v5925_v14 = vld [vmem:[%s5867_s30 + $0x8] sm:$0xff]  ;;  %v6041_v54 = vld [vmem:[%s5867_s30] sm:$0xff]  ;;  %s8470_s24 = sld [smem:[#allocation86_spill]]  ;;  %s8910_s17 = sld [smem:[#allocation87_spill]] }
  0xde   : > { %822 = vmatpush1.bf16.msra.mxu0 %v5893_v3  ;;  %8402 = vst [vmem:[#allocation20_spill] sm:$0xff] %v5925_v14  ;;  %v647_v15 = vpack.c.bf16 %v5925_v14, %v5925_v14  ;;  %v5929_v16 = vld [vmem:[#allocation7 + $0x4] ss:$8 sps:$4 sm:$0xff]   ;;  %v5932_v17 = vld [vmem:[#allocation7] ss:$8 sps:$4 sm:$0xff]   ;;  %8407 = vst [vmem:[#allocation25_spill] sm:$0xff] %v6041_v54  ;;  %v646_v58 = vpack.c.bf16 %v6041_v54, %v6041_v54 }
  0xdf   : > { %823 = vmatprep.subr.bf16.mxu0 %v5896_v4  ;;  %v5935_v18 = vld [vmem:[#allocation5 + $0x74] ss:$8 sps:$4 sm:$0xff]   ;;  %v5939_v20 = vld [vmem:[#allocation5 + $0x70] ss:$8 sps:$4 sm:$0xff]   ;;  %1035 = vmatprep.subr.bf16.mxu1 %v5929_v16  ;;  %v5947_v22 = vld [vmem:[#allocation7 + $0x24] ss:$8 sps:$4 sm:$0xff]  }
  0xe0   : > { %851 = vmatprep.mubr.bf16.mxu0 %v647_v15  ;;  %v5937_v19 = vld [vmem:[#allocation7 + $0x14] ss:$8 sps:$4 sm:$0xff]   ;;  %1036 = vmatpush1.bf16.msra.mxu1 %v5932_v17  ;;  %v5943_v21 = vld [vmem:[#allocation7 + $0x10] ss:$8 sps:$4 sm:$0xff]   ;;  %v5950_v23 = vld [vmem:[#allocation5 + $0x84] ss:$8 sps:$4 sm:$0xff]  }
  0xe1   : > { %1037 = vmatprep.subr.bf16.mxu1 %v5937_v19  ;;  %v5952_v24 = vld [vmem:[#allocation5 + $0x80] ss:$8 sps:$4 sm:$0xff]   ;;  %v5959_v26 = vld [vmem:[#allocation7 + $0x34] ss:$8 sps:$4 sm:$0xff]   ;;  %v5964_v28 = vld [vmem:[#allocation5 + $0x90] ss:$8 sps:$4 sm:$0xff]  }
  0xe2   : > { %824 = vmatpush1.bf16.msra.mxu0 %v5899_v5  ;;  %v5955_v25 = vld [vmem:[#allocation7 + $0x20] ss:$8 sps:$4 sm:$0xff]   ;;  %v5962_v27 = vld [vmem:[#allocation5 + $0x94] ss:$8 sps:$4 sm:$0xff]   ;;  %v5967_v29 = vld [vmem:[#allocation7 + $0x30] ss:$8 sps:$4 sm:$0xff]  }
  0xe3   : > { %825 = vmatprep.subr.bf16.mxu0 %v5902_v6  ;;  %v5971_v30 = vld [vmem:[#allocation7 + $0x44] ss:$8 sps:$4 sm:$0xff]   ;;  %v5976_v32 = vld [vmem:[#allocation5 + $0xa0] ss:$8 sps:$4 sm:$0xff]   ;;  %v5983_v34 = vld [vmem:[#allocation7 + $0x54] ss:$8 sps:$4 sm:$0xff]  }
  0xe4   : > { %1038 = vmatpush1.bf16.msra.mxu1 %v5943_v21  ;;  %v5974_v31 = vld [vmem:[#allocation5 + $0xa4] ss:$8 sps:$4 sm:$0xff]   ;;  %v5979_v33 = vld [vmem:[#allocation7 + $0x40] ss:$8 sps:$4 sm:$0xff]   ;;  %v5986_v35 = vld [vmem:[#allocation5 + $0xb4] ss:$8 sps:$4 sm:$0xff]  }
  0xe5   : > { %1039 = vmatprep.subr.bf16.mxu1 %v5947_v22  ;;  %v5988_v36 = vld [vmem:[#allocation7 + $0x50] ss:$8 sps:$4 sm:$0xff]   ;;  %v5992_v38 = vld [vmem:[#allocation7 + $0x64] ss:$8 sps:$4 sm:$0xff]   ;;  %v6000_v40 = vld [vmem:[#allocation7 + $0x60] ss:$8 sps:$4 sm:$0xff]  }
  0xe6   : > { %826 = vmatpush1.bf16.msra.mxu0 %v5905_v7  ;;  %v5990_v37 = vld [vmem:[#allocation5 + $0xb0] ss:$8 sps:$4 sm:$0xff]   ;;  %v5994_v39 = vld [vmem:[#allocation5 + $0xc4] ss:$8 sps:$4 sm:$0xff]   ;;  %v6002_v41 = vld [vmem:[#allocation5 + $0xc0] ss:$8 sps:$4 sm:$0xff]  }
  0xe7   : > { %827 = vmatprep.subr.bf16.mxu0 %v5908_v8  ;;  %v6004_v42 = vld [vmem:[#allocation7 + $0x74] ss:$8 sps:$4 sm:$0xff]   ;;  %v6012_v44 = vld [vmem:[#allocation7 + $0x70] ss:$8 sps:$4 sm:$0xff]   ;;  %v6016_v46 = vld [vmem:[#allocation7 + $0x84] ss:$8 sps:$4 sm:$0xff]  }
  0xe8   : > { %1040 = vmatpush1.bf16.msra.mxu1 %v5955_v25  ;;  %v6006_v43 = vld [vmem:[#allocation5 + $0xd4] ss:$8 sps:$4 sm:$0xff]   ;;  %v6014_v45 = vld [vmem:[#allocation5 + $0xd0] ss:$8 sps:$4 sm:$0xff]   ;;  %8403 = vst [vmem:[#allocation21_spill] sm:$0xff] %v6016_v46  ;;  %s4572_s15 = smul.u32 88, %s5863_s8 }
  0xe9   : > { %1041 = vmatprep.subr.bf16.mxu1 %v5959_v26  ;;  %v6018_v47 = vld [vmem:[#allocation5 + $0xe4] ss:$8 sps:$4 sm:$0xff]   ;;  %v6024_v48 = vld [vmem:[#allocation7 + $0x80] ss:$8 sps:$4 sm:$0xff]   ;;  %v6028_v50 = vld [vmem:[#allocation7 + $0x94] ss:$8 sps:$4 sm:$0xff]  }
  0xea   : > { %828 = vmatpush1.bf16.msra.mxu0 %v5911_v9  ;;  %8404 = vst [vmem:[#allocation22_spill] sm:$0xff] %v6024_v48  ;;  %v6026_v49 = vld [vmem:[#allocation5 + $0xe0] ss:$8 sps:$4 sm:$0xff]   ;;  %8405 = vst [vmem:[#allocation23_spill] sm:$0xff] %v6028_v50  ;;  %v6030_v51 = vld [vmem:[#allocation5 + $0xf4] ss:$8 sps:$4 sm:$0xff]  }
  0xeb   : > { %829 = vmatprep.subr.bf16.mxu0 %v5914_v10  ;;  %v6036_v52 = vld [vmem:[#allocation7 + $0x90] ss:$8 sps:$4 sm:$0xff]   ;;  %v6043_v55 = vld [vmem:[#allocation7 + $0xa4] ss:$8 sps:$4 sm:$0xff]   ;;  %v6049_v56 = vld [vmem:[#allocation7 + $0xa0] ss:$8 sps:$4 sm:$0xff]  }
  0xec   : > { %1042 = vmatpush1.bf16.msra.mxu1 %v5967_v29  ;;  %8406 = vst [vmem:[#allocation24_spill] sm:$0xff] %v6036_v52  ;;  %v6038_v53 = vld [vmem:[#allocation5 + $0xf0] ss:$8 sps:$4 sm:$0xff]   ;;  %8408 = vst [vmem:[#allocation26_spill] sm:$0xff] %v6043_v55  ;;  %v6051_v57 = vld [vmem:[#allocation7 + $0xb4] ss:$8 sps:$4 sm:$0xff]  }
  0xed   : > { %1043 = vmatprep.subr.bf16.mxu1 %v5971_v30  ;;  %8409 = vst [vmem:[#allocation27_spill] sm:$0xff] %v6049_v56  ;;  %8410 = vst [vmem:[#allocation28_spill] sm:$0xff] %v6051_v57  ;;  %v6058_v59 = vld [vmem:[#allocation7 + $0xb0] ss:$8 sps:$4 sm:$0xff]   ;;  %v6060_v60 = vld [vmem:[#allocation7 + $0xc4] ss:$8 sps:$4 sm:$0xff]  }
  0xee   : > { %830 = vmatpush1.bf16.msra.mxu0 %v5917_v11  ;;  %8411 = vst [vmem:[#allocation29_spill] sm:$0xff] %v6058_v59  ;;  %8412 = vst [vmem:[#allocation30_spill] sm:$0xff] %v6060_v60  ;;  %v6064_v61 = vld [vmem:[#allocation7 + $0xc0] ss:$8 sps:$4 sm:$0xff]   ;;  %v6066_v62 = vld [vmem:[#allocation7 + $0xd4] ss:$8 sps:$4 sm:$0xff]  }
  0xef   : > { %831 = vmatprep.subr.bf16.mxu0 %v5920_v12  ;;  %8413 = vst [vmem:[#allocation31_spill] sm:$0xff] %v6064_v61  ;;  %8414 = vst [vmem:[#allocation32_spill] sm:$0xff] %v6066_v62  ;;  %v6070_v63 = vld [vmem:[#allocation7 + $0xd0] ss:$8 sps:$4 sm:$0xff]   ;;  %v6075_v15 = vld [vmem:[#allocation7 + $0xe4] ss:$8 sps:$4 sm:$0xff]  }
  0xf0   : > { %1044 = vmatpush1.bf16.msra.mxu1 %v5979_v33  ;;  %8415 = vst [vmem:[#allocation33_spill] sm:$0xff] %v6070_v63  ;;  %8416 = vst [vmem:[#allocation34_spill] sm:$0xff] %v6075_v15  ;;  %v6081_v14 = vld [vmem:[#allocation7 + $0xf4] ss:$8 sps:$4 sm:$0xff]   ;;  %v6083_v54 = vld [vmem:[#allocation7 + $0xf0] ss:$8 sps:$4 sm:$0xff]  }
  0xf1   : > { %1045 = vmatprep.subr.bf16.mxu1 %v5983_v34  ;;  %8418 = vst [vmem:[#allocation36_spill] sm:$0xff] %v6081_v14  ;;  %8419 = vst [vmem:[#allocation37_spill] sm:$0xff] %v6083_v54  ;;  %s8915_s13 = sld [smem:[#allocation89_spill]]  ;;  %s7944_s10 = scalar_lea.vmem [#allocation14], %s4572_s15 }
  0xf2   : > { %832 = vmatpush1.bf16.msra.mxu0 %v5922_v13  ;;  %s4573_s1 = smul.u32 1408, %s5620_s14  ;;  %s4036_s14 = scalar_lea.sflag [#allocation4], %s5863_s8 }
  0xf3   : > { %833 = vmatprep.subr.bf16.mxu0 %v5935_v18  ;;  %p8917_p9 = scmp.ne.s32.totalorder %s8392_s29, 0 }
  0xf4   : > { %1046 = vmatpush1.bf16.msra.mxu1 %v5988_v36 }
  0xf5   : > { %1047 = vmatprep.subr.bf16.mxu1 %v5992_v38 }
  0xf6   : > { %834 = vmatpush1.bf16.msra.mxu0 %v5939_v20 }
  0xf7   : > { %835 = vmatprep.subr.bf16.mxu0 %v5950_v23 }
  0xf8   : > { %1048 = vmatpush1.bf16.msra.mxu1 %v6000_v40 }
  0xf9   : > { %1049 = vmatprep.subr.bf16.mxu1 %v6004_v42 }
  0xfa   : > { %836 = vmatpush1.bf16.msra.mxu0 %v5952_v24 }
  0xfb   : > { %837 = vmatprep.subr.bf16.mxu0 %v5962_v27 }
  0xfc   : > { %1050 = vmatpush1.bf16.msra.mxu1 %v6012_v44 }
  0xfd   : > { %1051 = vmatprep.subr.bf16.mxu1 %v6016_v46 }
  0xfe   : > { %838 = vmatpush1.bf16.msra.mxu0 %v5964_v28 }
  0xff   : > { %839 = vmatprep.subr.bf16.mxu0 %v5974_v31 }
 0x100   : > { %1052 = vmatpush1.bf16.msra.mxu1 %v6024_v48 }
 0x101   : > { %1053 = vmatprep.subr.bf16.mxu1 %v6028_v50 }
 0x102   : > { %840 = vmatpush1.bf16.msra.mxu0 %v5976_v32 }
 0x103   : > { %841 = vmatprep.subr.bf16.mxu0 %v5986_v35 }
 0x104   : > { %1054 = vmatpush1.bf16.msra.mxu1 %v6036_v52 }
 0x105   : > { %1055 = vmatprep.subr.bf16.mxu1 %v6043_v55 }
 0x106   : > { %842 = vmatpush1.bf16.msra.mxu0 %v5990_v37 }
 0x107   : > { %843 = vmatprep.subr.bf16.mxu0 %v5994_v39 }
 0x108   : > { %1056 = vmatpush1.bf16.msra.mxu1 %v6049_v56 }
 0x109   : > { %1057 = vmatprep.subr.bf16.mxu1 %v6051_v57 }
 0x10a   : > { %844 = vmatpush1.bf16.msra.mxu0 %v6002_v41 }
 0x10b   : > { %845 = vmatprep.subr.bf16.mxu0 %v6006_v43 }
 0x10c   : > { %1058 = vmatpush1.bf16.msra.mxu1 %v6058_v59 }
 0x10d   : > { %1059 = vmatprep.subr.bf16.mxu1 %v6060_v60 }
 0x10e   : > { %846 = vmatpush1.bf16.msra.mxu0 %v6014_v45 }
 0x10f   : > { %847 = vmatprep.subr.bf16.mxu0 %v6018_v47 }
 0x110   : > { %1060 = vmatpush1.bf16.msra.mxu1 %v6064_v61  ;;  %v6092_v61 = vld [vmem:[#allocation8 + $0x14] ss:$8 sps:$4 sm:$0xff]  }
 0x111   : > { %1061 = vmatprep.subr.bf16.mxu1 %v6066_v62  ;;  %v6088_v62 = vld [vmem:[#allocation8 + $0x4] ss:$8 sps:$4 sm:$0xff]   ;;  %8421 = vst [vmem:[#allocation39_spill] sm:$0xff] %v6092_v61 }
 0x112   : > { %848 = vmatpush1.bf16.msra.mxu0 %v6026_v49 }
 0x113   : > { %849 = vmatprep.subr.bf16.mxu0 %v6030_v51 }
 0x114   : > { %1062 = vmatpush1.bf16.msra.mxu1 %v6070_v63  ;;  %v6090_v63 = vld [vmem:[#allocation8] ss:$8 sps:$4 sm:$0xff]  }
 0x115   : > { %1063 = vmatprep.subr.bf16.mxu1 %v6075_v15  ;;  %8420 = vst [vmem:[#allocation38_spill] sm:$0xff] %v6090_v63  ;;  %v6099_v15 = vld [vmem:[#allocation8 + $0x24] ss:$8 sps:$4 sm:$0xff]  }
 0x116   : > { %850 = vmatpush1.bf16.msra.mxu0 %v6038_v53  ;;  %8423 = vst [vmem:[#allocation41_spill] sm:$0xff] %v6099_v15 }
 0x117   : > { %1251 = vmatprep.subr.bf16.mxu0 %v6088_v62 }
 0x119   : > { %852 = vmatmul.mubr.bf16.vlgmr.msra.gmra.mrb[0].mxu0 %v646_v58  ;;  %v6077_v58 = vld [vmem:[#allocation7 + $0xe0] ss:$8 sps:$4 sm:$0xff]  }
 0x11a   : > { %8417 = vst [vmem:[#allocation35_spill] sm:$0xff] %v6077_v58  ;;  %1064 = vmatpush1.bf16.msra.mxu1 %v6077_v58  ;;  %1252 = vmatpush1.bf16.msra.mxu0 %v6090_v63  ;;  %v6096_v58 = vld [vmem:[#allocation8 + $0x10] ss:$8 sps:$4 sm:$0xff]   ;;  %v6111_v63 = vld [vmem:[#allocation8 + $0x44] ss:$8 sps:$4 sm:$0xff]  }
 0x11b   : > { %1065 = vmatprep.subr.bf16.mxu1 %v6081_v14  ;;  %8422 = vst [vmem:[#allocation40_spill] sm:$0xff] %v6096_v58  ;;  %1253 = vmatprep.subr.bf16.mxu0 %v6092_v61  ;;  %v6108_v14 = vld [vmem:[#allocation8 + $0x30] ss:$8 sps:$4 sm:$0xff]   ;;  %8427 = vst [vmem:[#allocation45_spill] sm:$0xff] %v6111_v63  ;;  %v6114_v61 = vld [vmem:[#allocation8 + $0x40] ss:$8 sps:$4 sm:$0xff]  }
 0x11c   : > { %8426 = vst [vmem:[#allocation44_spill] sm:$0xff] %v6108_v14  ;;  %8428 = vst [vmem:[#allocation46_spill] sm:$0xff] %v6114_v61 }
 0x11e   : > { %1066 = vmatpush1.bf16.msra.mxu1 %v6083_v54  ;;  %1254 = vmatpush1.bf16.msra.mxu0 %v6096_v58  ;;  %v6102_v54 = vld [vmem:[#allocation8 + $0x20] ss:$8 sps:$4 sm:$0xff]   ;;  %v6117_v58 = vld [vmem:[#allocation8 + $0x54] ss:$8 sps:$4 sm:$0xff]  }
 0x11f   : > { %1298 = vmatprep.subr.bf16.mxu1 %v5885_v0  ;;  %8424 = vst [vmem:[#allocation42_spill] sm:$0xff] %v6102_v54  ;;  %1255 = vmatprep.subr.bf16.mxu0 %v6099_v15  ;;  %v6105_v0 = vld [vmem:[#allocation8 + $0x34] ss:$8 sps:$4 sm:$0xff]   ;;  %8429 = vst [vmem:[#allocation47_spill] sm:$0xff] %v6117_v58  ;;  %v6120_v15 = vld [vmem:[#allocation8 + $0x50] ss:$8 sps:$4 sm:$0xff]  }
 0x120   : > { %8425 = vst [vmem:[#allocation43_spill] sm:$0xff] %v6105_v0  ;;  %8430 = vst [vmem:[#allocation48_spill] sm:$0xff] %v6120_v15 }
 0x122   : > { %1256 = vmatpush1.bf16.msra.mxu0 %v6102_v54  ;;  %v6123_v54 = vld [vmem:[#allocation8 + $0x64] ss:$8 sps:$4 sm:$0xff]  }
 0x123   : > { %1257 = vmatprep.subr.bf16.mxu0 %v6105_v0  ;;  %8431 = vst [vmem:[#allocation49_spill] sm:$0xff] %v6123_v54  ;;  %v6126_v0 = vld [vmem:[#allocation8 + $0x60] ss:$8 sps:$4 sm:$0xff]  }
 0x124   : > { %8432 = vst [vmem:[#allocation50_spill] sm:$0xff] %v6126_v0 }
 0x126   : > { %1258 = vmatpush1.bf16.msra.mxu0 %v6108_v14  ;;  %v6129_v14 = vld [vmem:[#allocation8 + $0x74] ss:$8 sps:$4 sm:$0xff]  }
 0x127   : > { %1259 = vmatprep.subr.bf16.mxu0 %v6111_v63  ;;  %8433 = vst [vmem:[#allocation51_spill] sm:$0xff] %v6129_v14  ;;  %v6132_v63 = vld [vmem:[#allocation8 + $0x70] ss:$8 sps:$4 sm:$0xff]  }
 0x128   : > { %8434 = vst [vmem:[#allocation52_spill] sm:$0xff] %v6132_v63 }
 0x12a   : > { %1260 = vmatpush1.bf16.msra.mxu0 %v6114_v61  ;;  %v6135_v61 = vld [vmem:[#allocation8 + $0x84] ss:$8 sps:$4 sm:$0xff]  }
 0x12b   : > { %1261 = vmatprep.subr.bf16.mxu0 %v6117_v58  ;;  %8435 = vst [vmem:[#allocation53_spill] sm:$0xff] %v6135_v61  ;;  %v6138_v58 = vld [vmem:[#allocation8 + $0x80] ss:$8 sps:$4 sm:$0xff]  }
 0x12c   : > { %8436 = vst [vmem:[#allocation54_spill] sm:$0xff] %v6138_v58 }
 0x12e   : > { %1262 = vmatpush1.bf16.msra.mxu0 %v6120_v15  ;;  %v6141_v15 = vld [vmem:[#allocation8 + $0x94] ss:$8 sps:$4 sm:$0xff]  }
 0x12f   : > { %1263 = vmatprep.subr.bf16.mxu0 %v6123_v54  ;;  %8437 = vst [vmem:[#allocation55_spill] sm:$0xff] %v6141_v15  ;;  %v6144_v54 = vld [vmem:[#allocation8 + $0x90] ss:$8 sps:$4 sm:$0xff]  }
 0x130   : > { %8438 = vst [vmem:[#allocation56_spill] sm:$0xff] %v6144_v54 }
 0x132   : > { %1264 = vmatpush1.bf16.msra.mxu0 %v6126_v0  ;;  %v6147_v0 = vld [vmem:[#allocation8 + $0xa4] ss:$8 sps:$4 sm:$0xff]  }
 0x133   : > { %1265 = vmatprep.subr.bf16.mxu0 %v6129_v14  ;;  %8439 = vst [vmem:[#allocation57_spill] sm:$0xff] %v6147_v0  ;;  %v6150_v14 = vld [vmem:[#allocation8 + $0xa0] ss:$8 sps:$4 sm:$0xff]  }
 0x134   : > { %8440 = vst [vmem:[#allocation58_spill] sm:$0xff] %v6150_v14 }
 0x136   : > { %1266 = vmatpush1.bf16.msra.mxu0 %v6132_v63  ;;  %v6153_v63 = vld [vmem:[#allocation8 + $0xb4] ss:$8 sps:$4 sm:$0xff]  }
 0x137   : > { %1267 = vmatprep.subr.bf16.mxu0 %v6135_v61  ;;  %8441 = vst [vmem:[#allocation59_spill] sm:$0xff] %v6153_v63  ;;  %v6156_v61 = vld [vmem:[#allocation8 + $0xb0] ss:$8 sps:$4 sm:$0xff]  }
 0x138   : > { %8442 = vst [vmem:[#allocation60_spill] sm:$0xff] %v6156_v61 }
 0x13a   : > { %1268 = vmatpush1.bf16.msra.mxu0 %v6138_v58  ;;  %v6159_v58 = vld [vmem:[#allocation8 + $0xc4] ss:$8 sps:$4 sm:$0xff]  }
 0x13b   : > { %1269 = vmatprep.subr.bf16.mxu0 %v6141_v15  ;;  %8443 = vst [vmem:[#allocation61_spill] sm:$0xff] %v6159_v58  ;;  %v6162_v15 = vld [vmem:[#allocation8 + $0xc0] ss:$8 sps:$4 sm:$0xff]  }
 0x13c   : > { %8444 = vst [vmem:[#allocation62_spill] sm:$0xff] %v6162_v15 }
 0x13e   : > { %1270 = vmatpush1.bf16.msra.mxu0 %v6144_v54  ;;  %v6165_v54 = vld [vmem:[#allocation8 + $0xd4] ss:$8 sps:$4 sm:$0xff]  }
 0x13f   : > { %1271 = vmatprep.subr.bf16.mxu0 %v6147_v0  ;;  %8445 = vst [vmem:[#allocation63_spill] sm:$0xff] %v6165_v54  ;;  %v6168_v0 = vld [vmem:[#allocation8 + $0xd0] ss:$8 sps:$4 sm:$0xff]  }
 0x140   : > { %8446 = vst [vmem:[#allocation64_spill] sm:$0xff] %v6168_v0 }
 0x142   : > { %1272 = vmatpush1.bf16.msra.mxu0 %v6150_v14  ;;  %v649_v14 = vlaneseq }
 0x143   : > { %1273 = vmatprep.subr.bf16.mxu0 %v6153_v63 }
 0x144   : > { %v6172_v63 = vshrl.u32 %v649_v14, 7 }
 0x146   : > { %1274 = vmatpush1.bf16.msra.mxu0 %v6156_v61  ;;  %8447 = vst [vmem:[#allocation65_spill] sm:$0xff] %v6172_v63  ;;  %v6175_v60 = vsub.s32 0, %v6172_v63  ;;  %v6181_v61 = vsub.s32 1, %v6172_v63  ;;  %v8495_v63 = vld [vmem:[#allocation58_spill] sm:$0xff] }
 0x147   : > { %1275 = vmatprep.subr.bf16.mxu0 %v6159_v58  ;;  %v577_v58 = vld [vmem:[%s8010_s2] sm:$0x3] }
 0x148   : > { %8448 = vst [vmem:[#allocation66_spill] sm:$0xff] %v6175_v60  ;;  %8449 = vst [vmem:[#allocation67_spill] sm:$0xff] %v6181_v61 }
 0x14a   : > { %1276 = vmatpush1.bf16.msra.mxu0 %v6162_v15  ;;  %v6184_v15 = vrot.slane %v577_v58, %v6175_v60 }
 0x14b   : > { %1277 = vmatprep.subr.bf16.mxu0 %v6165_v54  ;;  %v6187_v54 = vrot.slane %v577_v58, %v6181_v61 }
 0x14e   : > { %1278 = vmatpush1.bf16.msra.mxu0 %v6168_v0 }
 0x1ec   : > { %v853_v0 = vpop.f32.mrb[0].mxu0 }
 0x1ed   : > { %v854_v14 = vadd.f32 %v853_v0, %v6184_v15  ;;  %v855_v59 = vpop.f32.mrb[1].mxu0  ;;  %v8471_v0 = vld [vmem:[#allocation25_spill] sm:$0xff] }
 0x1ee   : > { %v856_v57 = vadd.f32 %v855_v59, %v6187_v54  ;;  %v857_v56 = vpop.f32.mrb[2].mxu0 }
 0x1ef   : > { %v860_v55 = vmax.f32 %v854_v14, 0.0  ;;  %v858_v52 = vpop.f32.mrb[3].mxu0 }
 0x1f0   : > { %v861_v50 = vmax.f32 %v856_v57, 0.0 }
 0x1f1   : > { %v862_v46 = vpack.c.bf16 %v860_v55, %v860_v55 }
 0x1f2   : > { %v863_v48 = vpack.c.bf16 %v861_v50, %v861_v50 }
 0x1f4   : > { %1067 = vmatprep.mubr.bf16.mxu1 %v863_v48 }
 0x1f5   : > { %1068 = vmatmul.mubr.bf16.vlgmr.msra.gmra.mrb[0].mxu1 %v862_v46 }
 0x1f6   : > { %1299 = vmatpush1.bf16.msra.mxu1 %v5887_v1  ;;  %v6223_v1 = vld [vmem:[#allocation8 + $0xe4] ss:$8 sps:$4 sm:$0xff]  }
 0x1f7   : > { %1300 = vmatprep.subr.bf16.mxu1 %v5890_v2  ;;  %8450 = vst [vmem:[#allocation68_spill] sm:$0xff] %v6223_v1  ;;  %v6225_v2 = vld [vmem:[#allocation8 + $0xe0] ss:$8 sps:$4 sm:$0xff]   ;;  %1279 = vmatprep.subr.bf16.mxu0 %v6223_v1 }
 0x1f8   : > { %8451 = vst [vmem:[#allocation69_spill] sm:$0xff] %v6225_v2  ;;  %1280 = vmatpush1.bf16.msra.mxu0 %v6225_v2 }
 0x1fa   : > { %1301 = vmatpush1.bf16.msra.mxu1 %v5893_v3  ;;  %v6229_v3 = vld [vmem:[#allocation8 + $0xf4] ss:$8 sps:$4 sm:$0xff]  }
 0x1fb   : > { %1302 = vmatprep.subr.bf16.mxu1 %v5896_v4  ;;  %8452 = vst [vmem:[#allocation70_spill] sm:$0xff] %v6229_v3  ;;  %v6231_v4 = vld [vmem:[#allocation8 + $0xf0] ss:$8 sps:$4 sm:$0xff]   ;;  %1281 = vmatprep.subr.bf16.mxu0 %v6229_v3 }
 0x1fc   : > { %8453 = vst [vmem:[#allocation71_spill] sm:$0xff] %v6231_v4  ;;  %1282 = vmatpush1.bf16.msra.mxu0 %v6231_v4 }
 0x1fd   : > { %1343 = vmatprep.subr.bf16.mxu0 %v5929_v16 }
 0x1fe   : > { %1303 = vmatpush1.bf16.msra.mxu1 %v5899_v5  ;;  %v610_v5 = vld [vmem:[%s8012_s4] sm:$0x3] }
 0x1ff   : > { %1304 = vmatprep.subr.bf16.mxu1 %v5902_v6  ;;  %v6240_v6 = vrot.slane %v610_v5, %v6175_v60 }
 0x202   : > { %1305 = vmatpush1.bf16.msra.mxu1 %v5905_v7  ;;  %v6243_v7 = vrot.slane %v610_v5, %v6181_v61  ;;  %v8473_v5 = vld [vmem:[#allocation20_spill] sm:$0xff] }
 0x203   : > { %1306 = vmatprep.subr.bf16.mxu1 %v5908_v8 }
 0x206   : > { %1307 = vmatpush1.bf16.msra.mxu1 %v5911_v9 }
 0x207   : > { %1308 = vmatprep.subr.bf16.mxu1 %v5914_v10 }
 0x20a   : > { %1309 = vmatpush1.bf16.msra.mxu1 %v5917_v11 }
 0x20b   : > { %1310 = vmatprep.subr.bf16.mxu1 %v5920_v12 }
 0x20e   : > { %1311 = vmatpush1.bf16.msra.mxu1 %v5922_v13 }
 0x20f   : > { %1312 = vmatprep.subr.bf16.mxu1 %v5935_v18 }
 0x212   : > { %1313 = vmatpush1.bf16.msra.mxu1 %v5939_v20 }
 0x213   : > { %1314 = vmatprep.subr.bf16.mxu1 %v5950_v23 }
 0x216   : > { %1315 = vmatpush1.bf16.msra.mxu1 %v5952_v24  ;;  %v8458_v24 = vld [vmem:[#allocation26_spill] sm:$0xff] }
 0x217   : > { %1316 = vmatprep.subr.bf16.mxu1 %v5962_v27  ;;  %v8461_v27 = vld [vmem:[#allocation29_spill] sm:$0xff] }
 0x21a   : > { %1317 = vmatpush1.bf16.msra.mxu1 %v5964_v28  ;;  %v8462_v28 = vld [vmem:[#allocation30_spill] sm:$0xff] }
 0x21b   : > { %1318 = vmatprep.subr.bf16.mxu1 %v5974_v31  ;;  %v8465_v31 = vld [vmem:[#allocation33_spill] sm:$0xff] }
 0x21e   : > { %1319 = vmatpush1.bf16.msra.mxu1 %v5976_v32  ;;  %v8466_v32 = vld [vmem:[#allocation34_spill] sm:$0xff] }
 0x21f   : > { %1320 = vmatprep.subr.bf16.mxu1 %v5986_v35 }
 0x222   : > { %1321 = vmatpush1.bf16.msra.mxu1 %v5990_v37 }
 0x223   : > { %1322 = vmatprep.subr.bf16.mxu1 %v5994_v39 }
 0x226   : > { %1323 = vmatpush1.bf16.msra.mxu1 %v6002_v41 }
 0x227   : > { %1324 = vmatprep.subr.bf16.mxu1 %v6006_v43 }
 0x22a   : > { %1325 = vmatpush1.bf16.msra.mxu1 %v6014_v45 }
 0x22b   : > { %1326 = vmatprep.subr.bf16.mxu1 %v6018_v47 }
 0x22e   : > { %1327 = vmatpush1.bf16.msra.mxu1 %v6026_v49 }
 0x22f   : > { %1328 = vmatprep.subr.bf16.mxu1 %v6030_v51 }
 0x232   : > { %1329 = vmatpush1.bf16.msra.mxu1 %v6038_v53 }
 0x233   : > { %1388 = vmatprep.subr.bf16.mxu1 %v6088_v62 }
 0x2c8   : > { %v1069_v8 = vpop.f32.mrb[0].mxu1 }
 0x2c9   : > { %v1070_v9 = vadd.f32 %v1069_v8, %v6240_v6  ;;  %v1071_v10 = vpop.f32.mrb[1].mxu1 }
 0x2ca   : > { %v1072_v11 = vadd.f32 %v1071_v10, %v6243_v7  ;;  %v1073_v12 = vpop.f32.mrb[2].mxu1 }
 0x2cb   : > { %v1076_v13 = vmax.f32 %v1070_v9, 0.0  ;;  %v1074_v18 = vpop.f32.mrb[3].mxu1  ;;  %v8476_v12 = vld [vmem:[#allocation39_spill] sm:$0xff] }
 0x2cc   : > { %v1077_v16 = vmax.f32 %v1072_v11, 0.0  ;;  %v8475_v11 = vld [vmem:[#allocation38_spill] sm:$0xff]  ;;  %v8478_v18 = vld [vmem:[#allocation41_spill] sm:$0xff] }
 0x2cd   : > { %v1078_v23 = vpack.c.bf16 %v1076_v13, %v1076_v13  ;;  %v8477_v13 = vld [vmem:[#allocation40_spill] sm:$0xff] }
 0x2ce   : > { %v1079_v20 = vpack.c.bf16 %v1077_v16, %v1077_v16  ;;  %v8479_v16 = vld [vmem:[#allocation42_spill] sm:$0xff] }
 0x2d0   : > { %1283 = vmatprep.mubr.bf16.mxu0 %v1079_v20  ;;  %v8480_v20 = vld [vmem:[#allocation43_spill] sm:$0xff] }
 0x2d1   : > { %1284 = vmatmul.mubr.bf16.vlgmr.msra.gmra.mrb[4].mxu0 %v1078_v23  ;;  %v8481_v23 = vld [vmem:[#allocation44_spill] sm:$0xff] }
 0x2d2   : > { %1344 = vmatpush1.bf16.msra.mxu0 %v5932_v17  ;;  %v8454_v17 = vld [vmem:[#allocation21_spill] sm:$0xff] }
 0x2d3   : > { %1345 = vmatprep.subr.bf16.mxu0 %v5937_v19  ;;  %v8455_v19 = vld [vmem:[#allocation22_spill] sm:$0xff] }
 0x2d6   : > { %1346 = vmatpush1.bf16.msra.mxu0 %v5943_v21  ;;  %v8456_v21 = vld [vmem:[#allocation23_spill] sm:$0xff] }
 0x2d7   : > { %1347 = vmatprep.subr.bf16.mxu0 %v5947_v22  ;;  %v8457_v22 = vld [vmem:[#allocation24_spill] sm:$0xff] }
 0x2da   : > { %1348 = vmatpush1.bf16.msra.mxu0 %v5955_v25  ;;  %v8459_v25 = vld [vmem:[#allocation27_spill] sm:$0xff] }
 0x2db   : > { %1349 = vmatprep.subr.bf16.mxu0 %v5959_v26  ;;  %v8460_v26 = vld [vmem:[#allocation28_spill] sm:$0xff] }
 0x2de   : > { %1350 = vmatpush1.bf16.msra.mxu0 %v5967_v29  ;;  %v8463_v29 = vld [vmem:[#allocation31_spill] sm:$0xff] }
 0x2df   : > { %1351 = vmatprep.subr.bf16.mxu0 %v5971_v30  ;;  %v8464_v30 = vld [vmem:[#allocation32_spill] sm:$0xff] }
 0x2e2   : > { %1352 = vmatpush1.bf16.msra.mxu0 %v5979_v33  ;;  %v8467_v33 = vld [vmem:[#allocation35_spill] sm:$0xff] }
 0x2e3   : > { %1353 = vmatprep.subr.bf16.mxu0 %v5983_v34  ;;  %v8468_v34 = vld [vmem:[#allocation36_spill] sm:$0xff] }
 0x2e6   : > { %1354 = vmatpush1.bf16.msra.mxu0 %v5988_v36  ;;  %v8469_v36 = vld [vmem:[#allocation37_spill] sm:$0xff] }
 0x2e7   : > { %1355 = vmatprep.subr.bf16.mxu0 %v5992_v38  ;;  %v6278_v38 = vld [vmem:[#allocation5 + $0x4] ss:$8 sps:$4 sm:$0xff]  }
 0x2ea   : > { %1356 = vmatpush1.bf16.msra.mxu0 %v6000_v40  ;;  %v643_v40 = vld [vmem:[%s8470_s24] sm:$0x3]  ;;  %s4049_s24 = sshll.u32 %s7944_s10, 4  ;;  %s7963_s24 = int_to_ptr.vmem [resolvable:$true] %s4049_s24 }
 0x2eb   : > { %1357 = vmatprep.subr.bf16.mxu0 %v6004_v42  ;;  %v6285_v42 = vrot.slane %v643_v40, %v6175_v60  ;;  %v6288_v46 = vrot.slane %v643_v40, %v6181_v61  ;;  %v8482_v40 = vld [vmem:[#allocation45_spill] sm:$0xff]  ;;  %v8496_v61 = vld [vmem:[#allocation59_spill] sm:$0xff]  ;;  %v8497_v60 = vld [vmem:[#allocation60_spill] sm:$0xff]  ;;  %s5433_s18 = scalar_lea.vmem %s7963_s24, 1408 }
 0x2ec   : > { %p5434_p6 = scmp.ne.s32.totalorder %s7963_s24, %s5433_s18 }
 0x2ee   : > { %1358 = vmatpush1.bf16.msra.mxu0 %v6012_v44  ;;  %p5435_p12 = pnand %p5434_p6, %p8917_p9 }
 0x2ef   : > { %1359 = vmatprep.subr.bf16.mxu0 %v8454_v17 }
 0x2f0   : > { %p5436_p1 = pneg %p5435_p12 }
 0x2f2   : > { %1360 = vmatpush1.bf16.msra.mxu0 %v8455_v19 }
 0x2f3   : > { %1361 = vmatprep.subr.bf16.mxu0 %v8456_v21 }
 0x2f6   : > { %1362 = vmatpush1.bf16.msra.mxu0 %v8457_v22 }
 0x2f7   : > { %1363 = vmatprep.subr.bf16.mxu0 %v8458_v24 }
 0x2fa   : > { %1364 = vmatpush1.bf16.msra.mxu0 %v8459_v25 }
 0x2fb   : > { %1365 = vmatprep.subr.bf16.mxu0 %v8460_v26 }
 0x2fe   : > { %1366 = vmatpush1.bf16.msra.mxu0 %v8461_v27 }
 0x2ff   : > { %1367 = vmatprep.subr.bf16.mxu0 %v8462_v28 }
 0x302   : > { %1368 = vmatpush1.bf16.msra.mxu0 %v8463_v29 }
 0x303   : > { %1369 = vmatprep.subr.bf16.mxu0 %v8464_v30 }
 0x306   : > { %1370 = vmatpush1.bf16.msra.mxu0 %v8465_v31 }
 0x307   : > { %1371 = vmatprep.subr.bf16.mxu0 %v8466_v32 }
 0x30a   : > { %1372 = vmatpush1.bf16.msra.mxu0 %v8467_v33 }
 0x30b   : > { %1373 = vmatprep.subr.bf16.mxu0 %v8468_v34 }
 0x30e   : > { %1374 = vmatpush1.bf16.msra.mxu0 %v8469_v36 }
 0x30f   : > { %1435 = vmatprep.subr.bf16.mxu0 %v6278_v38 }
 0x3a4   : > { %v1285_v48 = vpop.f32.mrb[4].mxu0 }
 0x3a5   : > { %v1286_v50 = vadd.f32 %v1285_v48, %v6285_v42  ;;  %v1287_v52 = vpop.f32.mrb[5].mxu0  ;;  %v8483_v48 = vld [vmem:[#allocation46_spill] sm:$0xff] }
 0x3a6   : > { %v1288_v55 = vadd.f32 %v1287_v52, %v6288_v46  ;;  %v1289_v56 = vpop.f32.mrb[6].mxu0  ;;  %v8485_v52 = vld [vmem:[#allocation48_spill] sm:$0xff] }
 0x3a7   : > { %v1292_v57 = vmul.f32 0.1, %v1286_v50  ;;  %v1290_v59 = vpop.f32.mrb[7].mxu0  ;;  %v8484_v50 = vld [vmem:[#allocation47_spill] sm:$0xff]  ;;  %v8487_v56 = vld [vmem:[#allocation50_spill] sm:$0xff] }
 0x3a8   : > { %v1293_v58 = vmul.f32 0.1, %v1288_v55  ;;  %v8486_v55 = vld [vmem:[#allocation49_spill] sm:$0xff]  ;;  %v8489_v59 = vld [vmem:[#allocation52_spill] sm:$0xff] }
 0x3a9   : > { %v6293_v14 = vadd.f32 %v1292_v57, %v8471_v0  ;;  %v8488_v57 = vld [vmem:[#allocation51_spill] sm:$0xff]  ;;  %v8491_v0 = vld [vmem:[#allocation54_spill] sm:$0xff] }
 0x3aa   : > { %v6296_v8 = vadd.f32 %v1293_v58, %v8473_v5  ;;  %v8490_v58 = vld [vmem:[#allocation53_spill] sm:$0xff]  ;;  %v8492_v5 = vld [vmem:[#allocation55_spill] sm:$0xff] }
 0x3ab   : > { %8472 = vst [vmem:[#allocation21_spill] sm:$0xff] %v6293_v14  ;;  %v1296_v10 = vpack.c.bf16 %v6293_v14, %v6293_v14 }
 0x3ac   : > { %8474 = vst [vmem:[#allocation22_spill] sm:$0xff] %v6296_v8  ;;  %v1297_v9 = vpack.c.bf16 %v6296_v8, %v6296_v8 }
 0x3ae   : > { %1330 = vmatprep.mubr.bf16.mxu1 %v1297_v9  ;;  %v8493_v9 = vld [vmem:[#allocation56_spill] sm:$0xff] }
 0x3af   : > { %1331 = vmatmul.mubr.bf16.vlgmr.msra.gmra.mrb[4].mxu1 %v1296_v10  ;;  %v8494_v10 = vld [vmem:[#allocation57_spill] sm:$0xff] }
 0x3b0   : > { %1389 = vmatpush1.bf16.msra.mxu1 %v8475_v11 }
 0x3b1   : > { %1390 = vmatprep.subr.bf16.mxu1 %v8476_v12 }
 0x3b4   : > { %1391 = vmatpush1.bf16.msra.mxu1 %v8477_v13 }
 0x3b5   : > { %1392 = vmatprep.subr.bf16.mxu1 %v8478_v18 }
 0x3b8   : > { %1393 = vmatpush1.bf16.msra.mxu1 %v8479_v16 }
 0x3b9   : > { %1394 = vmatprep.subr.bf16.mxu1 %v8480_v20 }
 0x3bc   : > { %1395 = vmatpush1.bf16.msra.mxu1 %v8481_v23 }
 0x3bd   : > { %1396 = vmatprep.subr.bf16.mxu1 %v8482_v40 }
 0x3c0   : > { %1397 = vmatpush1.bf16.msra.mxu1 %v8483_v48 }
 0x3c1   : > { %1398 = vmatprep.subr.bf16.mxu1 %v8484_v50 }
 0x3c4   : > { %1399 = vmatpush1.bf16.msra.mxu1 %v8485_v52 }
 0x3c5   : > { %1400 = vmatprep.subr.bf16.mxu1 %v8486_v55 }
 0x3c8   : > { %1401 = vmatpush1.bf16.msra.mxu1 %v8487_v56  ;;  %v8498_v56 = vld [vmem:[#allocation61_spill] sm:$0xff] }
 0x3c9   : > { %1402 = vmatprep.subr.bf16.mxu1 %v8488_v57  ;;  %v8499_v57 = vld [vmem:[#allocation62_spill] sm:$0xff] }
 0x3cc   : > { %1403 = vmatpush1.bf16.msra.mxu1 %v8489_v59  ;;  %v8500_v59 = vld [vmem:[#allocation63_spill] sm:$0xff] }
 0x3cd   : > { %1404 = vmatprep.subr.bf16.mxu1 %v8490_v58  ;;  %v8501_v58 = vld [vmem:[#allocation64_spill] sm:$0xff] }
 0x3d0   : > { %1405 = vmatpush1.bf16.msra.mxu1 %v8491_v0 }
 0x3d1   : > { %1406 = vmatprep.subr.bf16.mxu1 %v8492_v5 }
 0x3d4   : > { %1407 = vmatpush1.bf16.msra.mxu1 %v8493_v9 }
 0x3d5   : > { %1408 = vmatprep.subr.bf16.mxu1 %v8494_v10 }
 0x3d8   : > { %1409 = vmatpush1.bf16.msra.mxu1 %v8495_v63  ;;  %v6333_v63 = vld [vmem:[#allocation7 + $0x4] ss:$8 sps:$4 sm:$0xff]  }
 0x3d9   : > { %1410 = vmatprep.subr.bf16.mxu1 %v8496_v61 }
 0x3dc   : > { %1411 = vmatpush1.bf16.msra.mxu1 %v8497_v60 }
 0x3dd   : > { %1412 = vmatprep.subr.bf16.mxu1 %v8498_v56 }
 0x3e0   : > { %1413 = vmatpush1.bf16.msra.mxu1 %v8499_v57 }
 0x3e1   : > { %1414 = vmatprep.subr.bf16.mxu1 %v8500_v59 }
 0x3e4   : > { %1415 = vmatpush1.bf16.msra.mxu1 %v8501_v58 }
 0x3e5   : > { %1416 = vmatprep.subr.bf16.mxu1 %v6223_v1 }
 0x3e8   : > { %1417 = vmatpush1.bf16.msra.mxu1 %v6225_v2 }
 0x3e9   : > { %1418 = vmatprep.subr.bf16.mxu1 %v6229_v3  ;;  %v6338_v3 = vld [vmem:[#allocation5] ss:$8 sps:$4 sm:$0xff]  }
 0x3ec   : > { %1419 = vmatpush1.bf16.msra.mxu1 %v6231_v4  ;;  %v6341_v4 = vld [vmem:[#allocation5 + $0x14] ss:$8 sps:$4 sm:$0xff]  }
 0x3ed   : > { %1480 = vmatprep.subr.bf16.mxu1 %v6333_v63 }
 0x482   : > { %v1332_v60 = vpop.f32.mrb[4].mxu1 }
 0x483   : > { %v1333_v56 = vadd.f32 %v1332_v60, %v6184_v15  ;;  %v1334_v57 = vpop.f32.mrb[5].mxu1  ;;  %v6344_v60 = vld [vmem:[#allocation5 + $0x10] ss:$8 sps:$4 sm:$0xff]  }
 0x484   : > { %v1335_v59 = vadd.f32 %v1334_v57, %v6187_v54  ;;  %v1336_v61 = vpop.f32.mrb[6].mxu1  ;;  %v6359_v57 = vld [vmem:[#allocation5 + $0x44] ss:$8 sps:$4 sm:$0xff]  }
 0x485   : > { %v1339_v58 = vmax.f32 %v1333_v56, 0.0  ;;  %v1337_v10 = vpop.f32.mrb[7].mxu1  ;;  %v6347_v61 = vld [vmem:[#allocation5 + $0x24] ss:$8 sps:$4 sm:$0xff]   ;;  %v6356_v56 = vld [vmem:[#allocation5 + $0x30] ss:$8 sps:$4 sm:$0xff]  }
 0x486   : > { %v1340_v1 = vmax.f32 %v1335_v59, 0.0  ;;  %8502 = vst [vmem:[#allocation23_spill] sm:$0xff] %v6356_v56  ;;  %8503 = vst [vmem:[#allocation24_spill] sm:$0xff] %v6359_v57  ;;  %v6362_v59 = vld [vmem:[#allocation5 + $0x40] ss:$8 sps:$4 sm:$0xff]  }
 0x487   : > { %v1341_v2 = vpack.c.bf16 %v1339_v58, %v1339_v58  ;;  %8504 = vst [vmem:[#allocation26_spill] sm:$0xff] %v6362_v59  ;;  %v6365_v58 = vld [vmem:[#allocation5 + $0x54] ss:$8 sps:$4 sm:$0xff]   ;;  %v6371_v10 = vld [vmem:[#allocation5 + $0x64] ss:$8 sps:$4 sm:$0xff]  }
 0x488   : > { %v1342_v9 = vpack.c.bf16 %v1340_v1, %v1340_v1  ;;  %v6350_v1 = vld [vmem:[#allocation5 + $0x20] ss:$8 sps:$4 sm:$0xff]   ;;  %8505 = vst [vmem:[#allocation27_spill] sm:$0xff] %v6365_v58  ;;  %8507 = vst [vmem:[#allocation29_spill] sm:$0xff] %v6371_v10 }
 0x48a   : > { %1375 = vmatprep.mubr.bf16.mxu0 %v1342_v9  ;;  %v6368_v9 = vld [vmem:[#allocation5 + $0x50] ss:$8 sps:$4 sm:$0xff]  }
 0x48b   : > { %1376 = vmatmul.mubr.bf16.vlgmr.msra.gmra.mrb[8].mxu0 %v1341_v2  ;;  %v6353_v2 = vld [vmem:[#allocation5 + $0x34] ss:$8 sps:$4 sm:$0xff]   ;;  %8506 = vst [vmem:[#allocation28_spill] sm:$0xff] %v6368_v9 }
 0x48c   : > { %1436 = vmatpush1.bf16.msra.mxu0 %v6338_v3 }
 0x48d   : > { %1437 = vmatprep.subr.bf16.mxu0 %v6341_v4 }
 0x490   : > { %1438 = vmatpush1.bf16.msra.mxu0 %v6344_v60 }
 0x491   : > { %1439 = vmatprep.subr.bf16.mxu0 %v6347_v61 }
 0x494   : > { %1440 = vmatpush1.bf16.msra.mxu0 %v6350_v1 }
 0x495   : > { %1441 = vmatprep.subr.bf16.mxu0 %v6353_v2 }
 0x498   : > { %1442 = vmatpush1.bf16.msra.mxu0 %v6356_v56  ;;  %v6374_v56 = vld [vmem:[#allocation5 + $0x60] ss:$8 sps:$4 sm:$0xff]  }
 0x499   : > { %1443 = vmatprep.subr.bf16.mxu0 %v6359_v57  ;;  %8508 = vst [vmem:[#allocation30_spill] sm:$0xff] %v6374_v56  ;;  %v6377_v57 = vld [vmem:[#allocation5 + $0x74] ss:$8 sps:$4 sm:$0xff]  }
 0x49a   : > { %8509 = vst [vmem:[#allocation31_spill] sm:$0xff] %v6377_v57 }
 0x49c   : > { %1444 = vmatpush1.bf16.msra.mxu0 %v6362_v59  ;;  %v6380_v59 = vld [vmem:[#allocation5 + $0x70] ss:$8 sps:$4 sm:$0xff]  }
 0x49d   : > { %1445 = vmatprep.subr.bf16.mxu0 %v6365_v58  ;;  %8510 = vst [vmem:[#allocation32_spill] sm:$0xff] %v6380_v59  ;;  %v6383_v58 = vld [vmem:[#allocation5 + $0x84] ss:$8 sps:$4 sm:$0xff]  }
 0x49e   : > { %8511 = vst [vmem:[#allocation33_spill] sm:$0xff] %v6383_v58 }
 0x4a0   : > { %1446 = vmatpush1.bf16.msra.mxu0 %v6368_v9  ;;  %v6386_v9 = vld [vmem:[#allocation5 + $0x80] ss:$8 sps:$4 sm:$0xff]  }
 0x4a1   : > { %1447 = vmatprep.subr.bf16.mxu0 %v6371_v10  ;;  %8512 = vst [vmem:[#allocation34_spill] sm:$0xff] %v6386_v9  ;;  %v6389_v10 = vld [vmem:[#allocation5 + $0x94] ss:$8 sps:$4 sm:$0xff]  }
 0x4a2   : > { %8513 = vst [vmem:[#allocation35_spill] sm:$0xff] %v6389_v10 }
 0x4a4   : > { %1448 = vmatpush1.bf16.msra.mxu0 %v6374_v56  ;;  %v6392_v56 = vld [vmem:[#allocation5 + $0x90] ss:$8 sps:$4 sm:$0xff]  }
 0x4a5   : > { %1449 = vmatprep.subr.bf16.mxu0 %v6377_v57  ;;  %8514 = vst [vmem:[#allocation36_spill] sm:$0xff] %v6392_v56  ;;  %v6395_v57 = vld [vmem:[#allocation5 + $0xa4] ss:$8 sps:$4 sm:$0xff]  }
 0x4a6   : > { %8515 = vst [vmem:[#allocation37_spill] sm:$0xff] %v6395_v57 }
 0x4a8   : > { %1450 = vmatpush1.bf16.msra.mxu0 %v6380_v59  ;;  %v6398_v59 = vld [vmem:[#allocation5 + $0xa0] ss:$8 sps:$4 sm:$0xff]  }
 0x4a9   : > { %1451 = vmatprep.subr.bf16.mxu0 %v6383_v58  ;;  %8516 = vst [vmem:[#allocation25_spill] sm:$0xff] %v6398_v59 }
 0x4ac   : > { %1452 = vmatpush1.bf16.msra.mxu0 %v6386_v9 }
 0x4ad   : > { %1453 = vmatprep.subr.bf16.mxu0 %v6389_v10 }
 0x4b0   : > { %1454 = vmatpush1.bf16.msra.mxu0 %v6392_v56 }
 0x4b1   : > { %1455 = vmatprep.subr.bf16.mxu0 %v6395_v57 }
 0x4b4   : > { %1456 = vmatpush1.bf16.msra.mxu0 %v6398_v59 }
 0x4b5   : > { %1457 = vmatprep.subr.bf16.mxu0 %v5986_v35 }
 0x4b8   : > { %1458 = vmatpush1.bf16.msra.mxu0 %v5990_v37 }
 0x4b9   : > { %1459 = vmatprep.subr.bf16.mxu0 %v5994_v39 }
 0x4bc   : > { %1460 = vmatpush1.bf16.msra.mxu0 %v6002_v41 }
 0x4bd   : > { %1461 = vmatprep.subr.bf16.mxu0 %v6006_v43 }
 0x4c0   : > { %1462 = vmatpush1.bf16.msra.mxu0 %v6014_v45 }
 0x4c1   : > { %1463 = vmatprep.subr.bf16.mxu0 %v6018_v47 }
 0x4c4   : > { %1464 = vmatpush1.bf16.msra.mxu0 %v6026_v49  ;;  %v6414_v49 = vld [vmem:[#allocation7] ss:$8 sps:$4 sm:$0xff]  }
 0x4c5   : > { %1465 = vmatprep.subr.bf16.mxu0 %v6030_v51  ;;  %v6417_v51 = vld [vmem:[#allocation7 + $0x14] ss:$8 sps:$4 sm:$0xff]  }
 0x4c8   : > { %1466 = vmatpush1.bf16.msra.mxu0 %v6038_v53  ;;  %v6420_v53 = vld [vmem:[#allocation7 + $0x10] ss:$8 sps:$4 sm:$0xff]  }
 0x4c9   : > { %1525 = vmatprep.subr.bf16.mxu0 %v6088_v62 }
 0x55e   : > { %v1377_v35 = vpop.f32.mrb[8].mxu0 }
 0x55f   : > { %v1378_v37 = vadd.f32 %v1377_v35, %v6240_v6  ;;  %v1379_v39 = vpop.f32.mrb[9].mxu0  ;;  %v6432_v35 = vld [vmem:[#allocation7 + $0x30] ss:$8 sps:$4 sm:$0xff]  }
 0x560   : > { %v1380_v41 = vadd.f32 %v1379_v39, %v6243_v7  ;;  %v1381_v59 = vpop.f32.mrb[10].mxu0  ;;  %v6438_v39 = vld [vmem:[#allocation7 + $0x40] ss:$8 sps:$4 sm:$0xff]  }
 0x561   : > { %v1384_v43 = vmax.f32 %v1378_v37, 0.0  ;;  %v1382_v57 = vpop.f32.mrb[11].mxu0  ;;  %v6423_v59 = vld [vmem:[#allocation7 + $0x24] ss:$8 sps:$4 sm:$0xff]  }
 0x562   : > { %v1385_v45 = vmax.f32 %v1380_v41, 0.0  ;;  %v6426_v57 = vld [vmem:[#allocation7 + $0x20] ss:$8 sps:$4 sm:$0xff]   ;;  %v6435_v37 = vld [vmem:[#allocation7 + $0x44] ss:$8 sps:$4 sm:$0xff]  }
 0x563   : > { %v1386_v47 = vpack.c.bf16 %v1384_v43, %v1384_v43  ;;  %8517 = vst [vmem:[#allocation20_spill] sm:$0xff] %v6435_v37  ;;  %v6441_v41 = vld [vmem:[#allocation7 + $0x54] ss:$8 sps:$4 sm:$0xff]   ;;  %v6444_v43 = vld [vmem:[#allocation7 + $0x50] ss:$8 sps:$4 sm:$0xff]  }
 0x564   : > { %v1387_v56 = vpack.c.bf16 %v1385_v45, %v1385_v45  ;;  %v6447_v45 = vld [vmem:[#allocation7 + $0x64] ss:$8 sps:$4 sm:$0xff]  }
 0x566   : > { %1420 = vmatprep.mubr.bf16.mxu1 %v1387_v56  ;;  %v6429_v56 = vld [vmem:[#allocation7 + $0x34] ss:$8 sps:$4 sm:$0xff]  }
 0x567   : > { %1421 = vmatmul.mubr.bf16.vlgmr.msra.gmra.mrb[8].mxu1 %v1386_v47  ;;  %v6450_v47 = vld [vmem:[#allocation7 + $0x60] ss:$8 sps:$4 sm:$0xff]  }
 0x568   : > { %1481 = vmatpush1.bf16.msra.mxu1 %v6414_v49 }
 0x569   : > { %1482 = vmatprep.subr.bf16.mxu1 %v6417_v51 }
 0x56c   : > { %1483 = vmatpush1.bf16.msra.mxu1 %v6420_v53 }
 0x56d   : > { %1484 = vmatprep.subr.bf16.mxu1 %v6423_v59 }
 0x570   : > { %1485 = vmatpush1.bf16.msra.mxu1 %v6426_v57 }
 0x571   : > { %1486 = vmatprep.subr.bf16.mxu1 %v6429_v56 }
 0x574   : > { %1487 = vmatpush1.bf16.msra.mxu1 %v6432_v35 }
 0x575   : > { %1488 = vmatprep.subr.bf16.mxu1 %v6435_v37  ;;  %v6453_v37 = vld [vmem:[#allocation7 + $0x74] ss:$8 sps:$4 sm:$0xff]  }
 0x578   : > { %1489 = vmatpush1.bf16.msra.mxu1 %v6438_v39 }
 0x579   : > { %1490 = vmatprep.subr.bf16.mxu1 %v6441_v41 }
 0x57c   : > { %1491 = vmatpush1.bf16.msra.mxu1 %v6444_v43 }
 0x57d   : > { %1492 = vmatprep.subr.bf16.mxu1 %v6447_v45 }
 0x580   : > { %1493 = vmatpush1.bf16.msra.mxu1 %v6450_v47 }
 0x581   : > { %1494 = vmatprep.subr.bf16.mxu1 %v6453_v37 }
 0x584   : > { %1495 = vmatpush1.bf16.msra.mxu1 %v6012_v44 }
 0x585   : > { %1496 = vmatprep.subr.bf16.mxu1 %v8454_v17 }
 0x588   : > { %1497 = vmatpush1.bf16.msra.mxu1 %v8455_v19 }
 0x589   : > { %1498 = vmatprep.subr.bf16.mxu1 %v8456_v21 }
 0x58c   : > { %1499 = vmatpush1.bf16.msra.mxu1 %v8457_v22 }
 0x58d   : > { %1500 = vmatprep.subr.bf16.mxu1 %v8458_v24 }
 0x590   : > { %1501 = vmatpush1.bf16.msra.mxu1 %v8459_v25 }
 0x591   : > { %1502 = vmatprep.subr.bf16.mxu1 %v8460_v26 }
 0x594   : > { %1503 = vmatpush1.bf16.msra.mxu1 %v8461_v27 }
 0x595   : > { %1504 = vmatprep.subr.bf16.mxu1 %v8462_v28 }
 0x598   : > { %1505 = vmatpush1.bf16.msra.mxu1 %v8463_v29 }
 0x599   : > { %1506 = vmatprep.subr.bf16.mxu1 %v8464_v30 }
 0x59c   : > { %1507 = vmatpush1.bf16.msra.mxu1 %v8465_v31  ;;  %v8520_v31 = vld [vmem:[#allocation50_spill] sm:$0xff] }
 0x59d   : > { %1508 = vmatprep.subr.bf16.mxu1 %v8466_v32 }
 0x5a0   : > { %1509 = vmatpush1.bf16.msra.mxu1 %v8467_v33 }
 0x5a1   : > { %1510 = vmatprep.subr.bf16.mxu1 %v8468_v34 }
 0x5a4   : > { %1511 = vmatpush1.bf16.msra.mxu1 %v8469_v36 }
 0x5a5   : > { %1572 = vmatprep.subr.bf16.mxu1 %v6278_v38 }
 0x63a   : > { %v1422_v44 = vpop.f32.mrb[8].mxu1 }
 0x63b   : > { %v1423_v17 = vadd.f32 %v1422_v44, %v6285_v42  ;;  %v1424_v19 = vpop.f32.mrb[9].mxu1  ;;  %v8521_v44 = vld [vmem:[#allocation51_spill] sm:$0xff] }
 0x63c   : > { %v1425_v21 = vadd.f32 %v1424_v19, %v6288_v46  ;;  %v1426_v22 = vpop.f32.mrb[10].mxu1  ;;  %v8523_v19 = vld [vmem:[#allocation53_spill] sm:$0xff] }
 0x63d   : > { %v1429_v24 = vmul.f32 0.1, %v1423_v17  ;;  %v1427_v25 = vpop.f32.mrb[11].mxu1  ;;  %v8522_v17 = vld [vmem:[#allocation52_spill] sm:$0xff]  ;;  %v8525_v22 = vld [vmem:[#allocation57_spill] sm:$0xff] }
 0x63e   : > { %v1430_v26 = vmul.f32 0.1, %v1425_v21  ;;  %v8524_v21 = vld [vmem:[#allocation56_spill] sm:$0xff]  ;;  %v8527_v25 = vld [vmem:[#allocation59_spill] sm:$0xff] }
 0x63f   : > { %v6477_v27 = vadd.f32 %v1429_v24, %v6293_v14  ;;  %v8526_v24 = vld [vmem:[#allocation58_spill] sm:$0xff]  ;;  %v8531_v14 = vld [vmem:[#allocation63_spill] sm:$0xff] }
 0x640   : > { %v6480_v28 = vadd.f32 %v1430_v26, %v6296_v8  ;;  %v8528_v26 = vld [vmem:[#allocation60_spill] sm:$0xff] }
 0x641   : > { %8518 = vst [vmem:[#allocation38_spill] sm:$0xff] %v6477_v27  ;;  %v1433_v30 = vpack.c.bf16 %v6477_v27, %v6477_v27  ;;  %v8532_v8 = vld [vmem:[#allocation64_spill] sm:$0xff] }
 0x642   : > { %8519 = vst [vmem:[#allocation39_spill] sm:$0xff] %v6480_v28  ;;  %v1434_v29 = vpack.c.bf16 %v6480_v28, %v6480_v28 }
 0x644   : > { %1467 = vmatprep.mubr.bf16.mxu0 %v1434_v29  ;;  %v8529_v29 = vld [vmem:[#allocation61_spill] sm:$0xff] }
 0x645   : > { %1468 = vmatmul.mubr.bf16.vlgmr.msra.gmra.mrb[12].mxu0 %v1433_v30  ;;  %v8530_v30 = vld [vmem:[#allocation62_spill] sm:$0xff] }
 0x646   : > { %1526 = vmatpush1.bf16.msra.mxu0 %v8475_v11 }
 0x647   : > { %1527 = vmatprep.subr.bf16.mxu0 %v8476_v12 }
 0x64a   : > { %1528 = vmatpush1.bf16.msra.mxu0 %v8477_v13 }
 0x64b   : > { %1529 = vmatprep.subr.bf16.mxu0 %v8478_v18 }
 0x64e   : > { %1530 = vmatpush1.bf16.msra.mxu0 %v8479_v16 }
 0x64f   : > { %1531 = vmatprep.subr.bf16.mxu0 %v8480_v20 }
 0x652   : > { %1532 = vmatpush1.bf16.msra.mxu0 %v8481_v23 }
 0x653   : > { %1533 = vmatprep.subr.bf16.mxu0 %v8482_v40 }
 0x656   : > { %1534 = vmatpush1.bf16.msra.mxu0 %v8483_v48 }
 0x657   : > { %1535 = vmatprep.subr.bf16.mxu0 %v8484_v50 }
 0x65a   : > { %1536 = vmatpush1.bf16.msra.mxu0 %v8485_v52 }
 0x65b   : > { %1537 = vmatprep.subr.bf16.mxu0 %v8486_v55 }
 0x65e   : > { %1538 = vmatpush1.bf16.msra.mxu0 %v8520_v31 }
 0x65f   : > { %1539 = vmatprep.subr.bf16.mxu0 %v8521_v44 }
 0x662   : > { %1540 = vmatpush1.bf16.msra.mxu0 %v8522_v17 }
 0x663   : > { %1541 = vmatprep.subr.bf16.mxu0 %v8523_v19 }
 0x666   : > { %1542 = vmatpush1.bf16.msra.mxu0 %v8491_v0  ;;  %v8533_v0 = vld [vmem:[#allocation68_spill] sm:$0xff] }
 0x667   : > { %1543 = vmatprep.subr.bf16.mxu0 %v8492_v5  ;;  %v8534_v5 = vld [vmem:[#allocation69_spill] sm:$0xff] }
 0x66a   : > { %1544 = vmatpush1.bf16.msra.mxu0 %v8524_v21  ;;  %v8535_v21 = vld [vmem:[#allocation70_spill] sm:$0xff] }
 0x66b   : > { %1545 = vmatprep.subr.bf16.mxu0 %v8525_v22  ;;  %v8536_v22 = vld [vmem:[#allocation71_spill] sm:$0xff] }
 0x66e   : > { %1546 = vmatpush1.bf16.msra.mxu0 %v8526_v24 }
 0x66f   : > { %1547 = vmatprep.subr.bf16.mxu0 %v8527_v25 }
 0x672   : > { %1548 = vmatpush1.bf16.msra.mxu0 %v8528_v26 }
 0x673   : > { %1549 = vmatprep.subr.bf16.mxu0 %v8529_v29 }
 0x676   : > { %1550 = vmatpush1.bf16.msra.mxu0 %v8530_v30 }
 0x677   : > { %1551 = vmatprep.subr.bf16.mxu0 %v8531_v14 }
 0x67a   : > { %1552 = vmatpush1.bf16.msra.mxu0 %v8532_v8 }
 0x67b   : > { %1553 = vmatprep.subr.bf16.mxu0 %v8533_v0 }
 0x67e   : > { %1554 = vmatpush1.bf16.msra.mxu0 %v8534_v5 }
 0x67f   : > { %1555 = vmatprep.subr.bf16.mxu0 %v8535_v21 }
 0x682   : > { %1556 = vmatpush1.bf16.msra.mxu0 %v8536_v22 }
 0x683   : > { %1617 = vmatprep.subr.bf16.mxu0 %v6333_v63 }
 0x718   : > { %v1469_v25 = vpop.f32.mrb[12].mxu0 }
 0x719   : > { %v1470_v26 = vadd.f32 %v1469_v25, %v6184_v15  ;;  %v1471_v29 = vpop.f32.mrb[13].mxu0  ;;  %v8543_v25 = vld [vmem:[#allocation30_spill] sm:$0xff] }
 0x71a   : > { %v1472_v30 = vadd.f32 %v1471_v29, %v6187_v54  ;;  %v1473_v24 = vpop.f32.mrb[14].mxu0  ;;  %v8545_v29 = vld [vmem:[#allocation32_spill] sm:$0xff] }
 0x71b   : > { %v1476_v14 = vmax.f32 %v1470_v26, 0.0  ;;  %v1474_v19 = vpop.f32.mrb[15].mxu0  ;;  %v8537_v24 = vld [vmem:[#allocation23_spill] sm:$0xff] }
 0x71c   : > { %v1477_v8 = vmax.f32 %v1472_v30, 0.0  ;;  %v8538_v19 = vld [vmem:[#allocation24_spill] sm:$0xff]  ;;  %v8544_v26 = vld [vmem:[#allocation31_spill] sm:$0xff] }
 0x71d   : > { %v1478_v0 = vpack.c.bf16 %v1476_v14, %v1476_v14  ;;  %v8540_v14 = vld [vmem:[#allocation27_spill] sm:$0xff]  ;;  %v8546_v30 = vld [vmem:[#allocation36_spill] sm:$0xff] }
 0x71e   : > { %v1479_v17 = vpack.c.bf16 %v1477_v8, %v1477_v8  ;;  %v8539_v8 = vld [vmem:[#allocation26_spill] sm:$0xff] }
 0x720   : > { %1512 = vmatprep.mubr.bf16.mxu1 %v1479_v17  ;;  %v8542_v17 = vld [vmem:[#allocation29_spill] sm:$0xff] }
 0x721   : > { %1513 = vmatmul.mubr.bf16.vlgmr.msra.gmra.mrb[12].mxu1 %v1478_v0  ;;  %v8541_v0 = vld [vmem:[#allocation28_spill] sm:$0xff] }
 0x722   : > { %1573 = vmatpush1.bf16.msra.mxu1 %v6338_v3 }
 0x723   : > { %1574 = vmatprep.subr.bf16.mxu1 %v6341_v4 }
 0x726   : > { %1575 = vmatpush1.bf16.msra.mxu1 %v6344_v60 }
 0x727   : > { %1576 = vmatprep.subr.bf16.mxu1 %v6347_v61 }
 0x72a   : > { %1577 = vmatpush1.bf16.msra.mxu1 %v6350_v1 }
 0x72b   : > { %1578 = vmatprep.subr.bf16.mxu1 %v6353_v2 }
 0x72e   : > { %1579 = vmatpush1.bf16.msra.mxu1 %v8537_v24 }
 0x72f   : > { %1580 = vmatprep.subr.bf16.mxu1 %v8538_v19 }
 0x732   : > { %1581 = vmatpush1.bf16.msra.mxu1 %v8539_v8  ;;  %v8547_v8 = vld [vmem:[#allocation37_spill] sm:$0xff] }
 0x733   : > { %1582 = vmatprep.subr.bf16.mxu1 %v8540_v14  ;;  %v8548_v14 = vld [vmem:[#allocation25_spill] sm:$0xff] }
 0x736   : > { %1583 = vmatpush1.bf16.msra.mxu1 %v8541_v0  ;;  %v6541_v0 = vld [vmem:[#allocation5 + $0xb4] ss:$8 sps:$4 sm:$0xff]  }
 0x737   : > { %1584 = vmatprep.subr.bf16.mxu1 %v8542_v17  ;;  %8549 = vst [vmem:[#allocation40_spill] sm:$0xff] %v6541_v0 }
 0x73a   : > { %1585 = vmatpush1.bf16.msra.mxu1 %v8543_v25  ;;  %v6544_v25 = vld [vmem:[#allocation5 + $0xb0] ss:$8 sps:$4 sm:$0xff]  }
 0x73b   : > { %1586 = vmatprep.subr.bf16.mxu1 %v8544_v26  ;;  %8550 = vst [vmem:[#allocation41_spill] sm:$0xff] %v6544_v25 }
 0x73e   : > { %1587 = vmatpush1.bf16.msra.mxu1 %v8545_v29  ;;  %v6547_v29 = vld [vmem:[#allocation5 + $0xc4] ss:$8 sps:$4 sm:$0xff]  }
 0x73f   : > { %1588 = vmatprep.subr.bf16.mxu1 %v6383_v58  ;;  %8551 = vst [vmem:[#allocation42_spill] sm:$0xff] %v6547_v29 }
 0x742   : > { %1589 = vmatpush1.bf16.msra.mxu1 %v6386_v9  ;;  %v6550_v9 = vld [vmem:[#allocation5 + $0xc0] ss:$8 sps:$4 sm:$0xff]  }
 0x743   : > { %1590 = vmatprep.subr.bf16.mxu1 %v6389_v10  ;;  %8552 = vst [vmem:[#allocation43_spill] sm:$0xff] %v6550_v9 }
 0x746   : > { %1591 = vmatpush1.bf16.msra.mxu1 %v8546_v30  ;;  %v6553_v30 = vld [vmem:[#allocation5 + $0xd4] ss:$8 sps:$4 sm:$0xff]  }
 0x747   : > { %1592 = vmatprep.subr.bf16.mxu1 %v8547_v8  ;;  %8553 = vst [vmem:[#allocation44_spill] sm:$0xff] %v6553_v30 }
 0x74a   : > { %1593 = vmatpush1.bf16.msra.mxu1 %v8548_v14  ;;  %v6556_v14 = vld [vmem:[#allocation5 + $0xd0] ss:$8 sps:$4 sm:$0xff]  }
 0x74b   : > { %1594 = vmatprep.subr.bf16.mxu1 %v6541_v0  ;;  %8554 = vst [vmem:[#allocation45_spill] sm:$0xff] %v6556_v14  ;;  %v6559_v0 = vld [vmem:[#allocation5 + $0xe4] ss:$8 sps:$4 sm:$0xff]  }
 0x74c   : > { %8555 = vst [vmem:[#allocation46_spill] sm:$0xff] %v6559_v0 }
 0x74e   : > { %1595 = vmatpush1.bf16.msra.mxu1 %v6544_v25  ;;  %v6562_v25 = vld [vmem:[#allocation5 + $0xe0] ss:$8 sps:$4 sm:$0xff]  }
 0x74f   : > { %1596 = vmatprep.subr.bf16.mxu1 %v6547_v29  ;;  %8556 = vst [vmem:[#allocation47_spill] sm:$0xff] %v6562_v25  ;;  %v6565_v29 = vld [vmem:[#allocation5 + $0xf4] ss:$8 sps:$4 sm:$0xff]  }
 0x752   : > { %1597 = vmatpush1.bf16.msra.mxu1 %v6550_v9  ;;  %v6568_v9 = vld [vmem:[#allocation5 + $0xf0] ss:$8 sps:$4 sm:$0xff]  }
 0x753   : > { %1598 = vmatprep.subr.bf16.mxu1 %v6553_v30 }
 0x756   : > { %1599 = vmatpush1.bf16.msra.mxu1 %v6556_v14 }
 0x757   : > { %1600 = vmatprep.subr.bf16.mxu1 %v6559_v0 }
 0x75a   : > { %1601 = vmatpush1.bf16.msra.mxu1 %v6562_v25 }
 0x75b   : > { %1602 = vmatprep.subr.bf16.mxu1 %v6565_v29 }
 0x75e   : > { %1603 = vmatpush1.bf16.msra.mxu1 %v6568_v9 }
 0x75f   : > { %1662 = vmatprep.subr.bf16.mxu1 %v6088_v62  ;;  %v8557_v62 = vld [vmem:[#allocation20_spill] sm:$0xff] }
 0x7f4   : > { %v1514_v30 = vpop.f32.mrb[12].mxu1 }
 0x7f5   : > { %v1515_v14 = vadd.f32 %v1514_v30, %v6240_v6  ;;  %v1516_v8 = vpop.f32.mrb[13].mxu1  ;;  %v6615_v30 = vld [vmem:[#allocation7 + $0xc4] ss:$8 sps:$4 sm:$0xff]  }
 0x7f6   : > { %v1517_v0 = vadd.f32 %v1516_v8, %v6243_v7  ;;  %v1518_v10 = vpop.f32.mrb[14].mxu1  ;;  %v6597_v8 = vld [vmem:[#allocation7 + $0x94] ss:$8 sps:$4 sm:$0xff]   ;;  %8566 = vst [vmem:[#allocation20_spill] sm:$0xff] %v6615_v30 }
 0x7f7   : > { %v1521_v58 = vmax.f32 %v1515_v14, 0.0  ;;  %v1519_v26 = vpop.f32.mrb[15].mxu1  ;;  %v6591_v10 = vld [vmem:[#allocation7 + $0x84] ss:$8 sps:$4 sm:$0xff]   ;;  %8560 = vst [vmem:[#allocation50_spill] sm:$0xff] %v6597_v8 }
 0x7f8   : > { %v1522_v25 = vmax.f32 %v1517_v0, 0.0  ;;  %8558 = vst [vmem:[#allocation48_spill] sm:$0xff] %v6591_v10  ;;  %v6600_v14 = vld [vmem:[#allocation7 + $0x90] ss:$8 sps:$4 sm:$0xff]   ;;  %v6603_v0 = vld [vmem:[#allocation7 + $0xa4] ss:$8 sps:$4 sm:$0xff]  }
 0x7f9   : > { %v1523_v19 = vpack.c.bf16 %v1521_v58, %v1521_v58  ;;  %v6588_v58 = vld [vmem:[#allocation7 + $0x70] ss:$8 sps:$4 sm:$0xff]   ;;  %8561 = vst [vmem:[#allocation51_spill] sm:$0xff] %v6600_v14  ;;  %8562 = vst [vmem:[#allocation69_spill] sm:$0xff] %v6603_v0 }
 0x7fa   : > { %v1524_v17 = vpack.c.bf16 %v1522_v25, %v1522_v25  ;;  %v6609_v25 = vld [vmem:[#allocation7 + $0xb4] ss:$8 sps:$4 sm:$0xff]   ;;  %v6612_v26 = vld [vmem:[#allocation7 + $0xb0] ss:$8 sps:$4 sm:$0xff]  }
 0x7fb   : > { %8564 = vst [vmem:[#allocation71_spill] sm:$0xff] %v6609_v25  ;;  %8565 = vst [vmem:[#allocation23_spill] sm:$0xff] %v6612_v26 }
 0x7fc   : > { %1557 = vmatprep.mubr.bf16.mxu0 %v1524_v17  ;;  %v6606_v17 = vld [vmem:[#allocation7 + $0xa0] ss:$8 sps:$4 sm:$0xff]  }
 0x7fd   : > { %1558 = vmatmul.mubr.bf16.vlgmr.msra.gmra.mrb[16].mxu0 %v1523_v19  ;;  %v6594_v19 = vld [vmem:[#allocation7 + $0x80] ss:$8 sps:$4 sm:$0xff]   ;;  %8563 = vst [vmem:[#allocation70_spill] sm:$0xff] %v6606_v17 }
 0x7fe   : > { %1618 = vmatpush1.bf16.msra.mxu0 %v6414_v49  ;;  %8559 = vst [vmem:[#allocation49_spill] sm:$0xff] %v6594_v19 }
 0x7ff   : > { %1619 = vmatprep.subr.bf16.mxu0 %v6417_v51 }
 0x802   : > { %1620 = vmatpush1.bf16.msra.mxu0 %v6420_v53 }
 0x803   : > { %1621 = vmatprep.subr.bf16.mxu0 %v6423_v59 }
 0x806   : > { %1622 = vmatpush1.bf16.msra.mxu0 %v6426_v57 }
 0x807   : > { %1623 = vmatprep.subr.bf16.mxu0 %v6429_v56 }
 0x80a   : > { %1624 = vmatpush1.bf16.msra.mxu0 %v6432_v35 }
 0x80b   : > { %1625 = vmatprep.subr.bf16.mxu0 %v8557_v62 }
 0x80e   : > { %1626 = vmatpush1.bf16.msra.mxu0 %v6438_v39 }
 0x80f   : > { %1627 = vmatprep.subr.bf16.mxu0 %v6441_v41 }
 0x812   : > { %1628 = vmatpush1.bf16.msra.mxu0 %v6444_v43 }
 0x813   : > { %1629 = vmatprep.subr.bf16.mxu0 %v6447_v45 }
 0x816   : > { %1630 = vmatpush1.bf16.msra.mxu0 %v6450_v47 }
 0x817   : > { %1631 = vmatprep.subr.bf16.mxu0 %v6453_v37 }
 0x81a   : > { %1632 = vmatpush1.bf16.msra.mxu0 %v6588_v58 }
 0x81b   : > { %1633 = vmatprep.subr.bf16.mxu0 %v6591_v10 }
 0x81e   : > { %1634 = vmatpush1.bf16.msra.mxu0 %v6594_v19 }
 0x81f   : > { %1635 = vmatprep.subr.bf16.mxu0 %v6597_v8 }
 0x822   : > { %1636 = vmatpush1.bf16.msra.mxu0 %v6600_v14  ;;  %v6618_v14 = vld [vmem:[#allocation7 + $0xc0] ss:$8 sps:$4 sm:$0xff]  }
 0x823   : > { %1637 = vmatprep.subr.bf16.mxu0 %v6603_v0  ;;  %8567 = vst [vmem:[#allocation72_spill] sm:$0xff] %v6618_v14  ;;  %v6621_v0 = vld [vmem:[#allocation7 + $0xd4] ss:$8 sps:$4 sm:$0xff]  }
 0x824   : > { %8568 = vst [vmem:[#allocation73_spill] sm:$0xff] %v6621_v0 }
 0x826   : > { %1638 = vmatpush1.bf16.msra.mxu0 %v6606_v17  ;;  %v6624_v17 = vld [vmem:[#allocation7 + $0xd0] ss:$8 sps:$4 sm:$0xff]  }
 0x827   : > { %1639 = vmatprep.subr.bf16.mxu0 %v6609_v25  ;;  %8569 = vst [vmem:[#allocation74_spill] sm:$0xff] %v6624_v17 }
 0x82a   : > { %1640 = vmatpush1.bf16.msra.mxu0 %v6612_v26 }
 0x82b   : > { %1641 = vmatprep.subr.bf16.mxu0 %v6615_v30 }
 0x82e   : > { %1642 = vmatpush1.bf16.msra.mxu0 %v6618_v14 }
 0x82f   : > { %1643 = vmatprep.subr.bf16.mxu0 %v6621_v0 }
 0x832   : > { %1644 = vmatpush1.bf16.msra.mxu0 %v6624_v17 }
 0x833   : > { %1645 = vmatprep.subr.bf16.mxu0 %v8466_v32 }
 0x836   : > { %1646 = vmatpush1.bf16.msra.mxu0 %v8467_v33 }
 0x837   : > { %1647 = vmatprep.subr.bf16.mxu0 %v8468_v34 }
 0x83a   : > { %1648 = vmatpush1.bf16.msra.mxu0 %v8469_v36 }
 0x83b   : > { %1709 = vmatprep.subr.bf16.mxu0 %v6278_v38 }
 0x8d0   : > { %v1559_v30 = vpop.f32.mrb[16].mxu0 }
 0x8d1   : > { %v1560_v14 = vadd.f32 %v1559_v30, %v6285_v42  ;;  %v1561_v26 = vpop.f32.mrb[17].mxu0 }
 0x8d2   : > { %v1562_v0 = vadd.f32 %v1561_v26, %v6288_v46  ;;  %v1563_v25 = vpop.f32.mrb[18].mxu0 }
 0x8d3   : > { %v1566_v8 = vmul.f32 0.1, %v1560_v14  ;;  %v1564_v19 = vpop.f32.mrb[19].mxu0 }
 0x8d4   : > { %v1567_v17 = vmul.f32 0.1, %v1562_v0 }
 0x8d5   : > { %v6635_v32 = vadd.f32 %v1566_v8, %v6477_v27 }
 0x8d6   : > { %v6638_v33 = vadd.f32 %v1567_v17, %v6480_v28 }
 0x8d7   : > { %8570 = vst [vmem:[#allocation75_spill] sm:$0xff] %v6635_v32  ;;  %v1570_v36 = vpack.c.bf16 %v6635_v32, %v6635_v32 }
 0x8d8   : > { %8571 = vst [vmem:[#allocation76_spill] sm:$0xff] %v6638_v33  ;;  %v1571_v34 = vpack.c.bf16 %v6638_v33, %v6638_v33 }
 0x8da   : > { %1604 = vmatprep.mubr.bf16.mxu1 %v1571_v34 }
 0x8db   : > { %1605 = vmatmul.mubr.bf16.vlgmr.msra.gmra.mrb[16].mxu1 %v1570_v36 }
 0x8dc   : > { %1663 = vmatpush1.bf16.msra.mxu1 %v8475_v11  ;;  %v8572_v11 = vld [vmem:[#allocation52_spill] sm:$0xff] }
 0x8dd   : > { %1664 = vmatprep.subr.bf16.mxu1 %v8476_v12  ;;  %v8573_v12 = vld [vmem:[#allocation53_spill] sm:$0xff] }
 0x8e0   : > { %1665 = vmatpush1.bf16.msra.mxu1 %v8477_v13  ;;  %v8574_v13 = vld [vmem:[#allocation54_spill] sm:$0xff] }
 0x8e1   : > { %1666 = vmatprep.subr.bf16.mxu1 %v8478_v18  ;;  %v8575_v18 = vld [vmem:[#allocation55_spill] sm:$0xff] }
 0x8e4   : > { %1667 = vmatpush1.bf16.msra.mxu1 %v8479_v16  ;;  %v8576_v16 = vld [vmem:[#allocation56_spill] sm:$0xff] }
 0x8e5   : > { %1668 = vmatprep.subr.bf16.mxu1 %v8480_v20  ;;  %v8577_v20 = vld [vmem:[#allocation57_spill] sm:$0xff] }
 0x8e8   : > { %1669 = vmatpush1.bf16.msra.mxu1 %v8481_v23  ;;  %v8578_v23 = vld [vmem:[#allocation58_spill] sm:$0xff] }
 0x8e9   : > { %1670 = vmatprep.subr.bf16.mxu1 %v8482_v40  ;;  %v8579_v40 = vld [vmem:[#allocation59_spill] sm:$0xff] }
 0x8ec   : > { %1671 = vmatpush1.bf16.msra.mxu1 %v8483_v48  ;;  %v8580_v48 = vld [vmem:[#allocation60_spill] sm:$0xff] }
 0x8ed   : > { %1672 = vmatprep.subr.bf16.mxu1 %v8484_v50  ;;  %v8581_v50 = vld [vmem:[#allocation61_spill] sm:$0xff] }
 0x8f0   : > { %1673 = vmatpush1.bf16.msra.mxu1 %v8485_v52  ;;  %v8582_v52 = vld [vmem:[#allocation62_spill] sm:$0xff] }
 0x8f1   : > { %1674 = vmatprep.subr.bf16.mxu1 %v8486_v55  ;;  %v8583_v55 = vld [vmem:[#allocation63_spill] sm:$0xff] }
 0x8f4   : > { %1675 = vmatpush1.bf16.msra.mxu1 %v8520_v31  ;;  %v8584_v31 = vld [vmem:[#allocation64_spill] sm:$0xff] }
 0x8f5   : > { %1676 = vmatprep.subr.bf16.mxu1 %v8521_v44  ;;  %v8585_v44 = vld [vmem:[#allocation68_spill] sm:$0xff] }
 0x8f8   : > { %1677 = vmatpush1.bf16.msra.mxu1 %v8572_v11  ;;  %v8586_v11 = vld [vmem:[#allocation24_spill] sm:$0xff] }
 0x8f9   : > { %1678 = vmatprep.subr.bf16.mxu1 %v8573_v12  ;;  %v8587_v12 = vld [vmem:[#allocation26_spill] sm:$0xff] }
 0x8fc   : > { %1679 = vmatpush1.bf16.msra.mxu1 %v8574_v13  ;;  %v8588_v13 = vld [vmem:[#allocation27_spill] sm:$0xff] }
 0x8fd   : > { %1680 = vmatprep.subr.bf16.mxu1 %v8575_v18  ;;  %v8589_v18 = vld [vmem:[#allocation28_spill] sm:$0xff] }
 0x900   : > { %1681 = vmatpush1.bf16.msra.mxu1 %v8576_v16  ;;  %v8590_v16 = vld [vmem:[#allocation29_spill] sm:$0xff] }
 0x901   : > { %1682 = vmatprep.subr.bf16.mxu1 %v8577_v20  ;;  %v8591_v20 = vld [vmem:[#allocation30_spill] sm:$0xff] }
 0x904   : > { %1683 = vmatpush1.bf16.msra.mxu1 %v8578_v23  ;;  %v8592_v23 = vld [vmem:[#allocation31_spill] sm:$0xff] }
 0x905   : > { %1684 = vmatprep.subr.bf16.mxu1 %v8579_v40  ;;  %v8593_v40 = vld [vmem:[#allocation32_spill] sm:$0xff] }
 0x908   : > { %1685 = vmatpush1.bf16.msra.mxu1 %v8580_v48  ;;  %v8594_v48 = vld [vmem:[#allocation33_spill] sm:$0xff] }
 0x909   : > { %1686 = vmatprep.subr.bf16.mxu1 %v8581_v50  ;;  %v8595_v50 = vld [vmem:[#allocation34_spill] sm:$0xff] }
 0x90c   : > { %1687 = vmatpush1.bf16.msra.mxu1 %v8582_v52  ;;  %v8596_v52 = vld [vmem:[#allocation35_spill] sm:$0xff] }
 0x90d   : > { %1688 = vmatprep.subr.bf16.mxu1 %v8583_v55  ;;  %v8597_v55 = vld [vmem:[#allocation36_spill] sm:$0xff] }
 0x910   : > { %1689 = vmatpush1.bf16.msra.mxu1 %v8584_v31  ;;  %v8598_v31 = vld [vmem:[#allocation37_spill] sm:$0xff] }
 0x911   : > { %1690 = vmatprep.subr.bf16.mxu1 %v8585_v44 }
 0x914   : > { %1691 = vmatpush1.bf16.msra.mxu1 %v8534_v5 }
 0x915   : > { %1692 = vmatprep.subr.bf16.mxu1 %v8535_v21 }
 0x918   : > { %1693 = vmatpush1.bf16.msra.mxu1 %v8536_v22 }
 0x919   : > { %1754 = vmatprep.subr.bf16.mxu1 %v6333_v63 }
 0x9ae   : > { %v1606_v19 = vpop.f32.mrb[16].mxu1 }
 0x9af   : > { %v1607_v8 = vadd.f32 %v1606_v19, %v6184_v15  ;;  %v1608_v14 = vpop.f32.mrb[17].mxu1  ;;  %v8599_v19 = vld [vmem:[#allocation25_spill] sm:$0xff] }
 0x9b0   : > { %v1609_v0 = vadd.f32 %v1608_v14, %v6187_v54  ;;  %v1610_v17 = vpop.f32.mrb[18].mxu1  ;;  %v8601_v14 = vld [vmem:[#allocation41_spill] sm:$0xff] }
 0x9b1   : > { %v1613_v25 = vmax.f32 %v1607_v8, 0.0  ;;  %v1611_v26 = vpop.f32.mrb[19].mxu1  ;;  %v8600_v8 = vld [vmem:[#allocation40_spill] sm:$0xff]  ;;  %v8603_v17 = vld [vmem:[#allocation43_spill] sm:$0xff] }
 0x9b2   : > { %v1614_v30 = vmax.f32 %v1609_v0, 0.0  ;;  %v8602_v0 = vld [vmem:[#allocation42_spill] sm:$0xff]  ;;  %v8605_v26 = vld [vmem:[#allocation45_spill] sm:$0xff] }
 0x9b3   : > { %v1615_v36 = vpack.c.bf16 %v1613_v25, %v1613_v25  ;;  %v8604_v25 = vld [vmem:[#allocation44_spill] sm:$0xff] }
 0x9b4   : > { %v1616_v34 = vpack.c.bf16 %v1614_v30, %v1614_v30  ;;  %v8606_v30 = vld [vmem:[#allocation46_spill] sm:$0xff] }
 0x9b6   : > { %1649 = vmatprep.mubr.bf16.mxu0 %v1616_v34  ;;  %v8607_v34 = vld [vmem:[#allocation47_spill] sm:$0xff] }
 0x9b7   : > { %1650 = vmatmul.mubr.bf16.vlgmr.msra.gmra.mrb[20].mxu0 %v1615_v36  ;;  %v6709_v36 = vld [vmem:[#allocation8 + $0x4] ss:$8 sps:$4 sm:$0xff]  }
 0x9b8   : > { %1710 = vmatpush1.bf16.msra.mxu0 %v6338_v3 }
 0x9b9   : > { %1711 = vmatprep.subr.bf16.mxu0 %v6341_v4 }
 0x9bc   : > { %1712 = vmatpush1.bf16.msra.mxu0 %v6344_v60 }
 0x9bd   : > { %1713 = vmatprep.subr.bf16.mxu0 %v6347_v61 }
 0x9c0   : > { %1714 = vmatpush1.bf16.msra.mxu0 %v6350_v1 }
 0x9c1   : > { %1715 = vmatprep.subr.bf16.mxu0 %v6353_v2 }
 0x9c4   : > { %1716 = vmatpush1.bf16.msra.mxu0 %v8537_v24 }
 0x9c5   : > { %1717 = vmatprep.subr.bf16.mxu0 %v8586_v11 }
 0x9c8   : > { %1718 = vmatpush1.bf16.msra.mxu0 %v8587_v12 }
 0x9c9   : > { %1719 = vmatprep.subr.bf16.mxu0 %v8588_v13 }
 0x9cc   : > { %1720 = vmatpush1.bf16.msra.mxu0 %v8589_v18 }
 0x9cd   : > { %1721 = vmatprep.subr.bf16.mxu0 %v8590_v16 }
 0x9d0   : > { %1722 = vmatpush1.bf16.msra.mxu0 %v8591_v20 }
 0x9d1   : > { %1723 = vmatprep.subr.bf16.mxu0 %v8592_v23 }
 0x9d4   : > { %1724 = vmatpush1.bf16.msra.mxu0 %v8593_v40 }
 0x9d5   : > { %1725 = vmatprep.subr.bf16.mxu0 %v8594_v48 }
 0x9d8   : > { %1726 = vmatpush1.bf16.msra.mxu0 %v8595_v50 }
 0x9d9   : > { %1727 = vmatprep.subr.bf16.mxu0 %v8596_v52 }
 0x9dc   : > { %1728 = vmatpush1.bf16.msra.mxu0 %v8597_v55 }
 0x9dd   : > { %1729 = vmatprep.subr.bf16.mxu0 %v8598_v31 }
 0x9e0   : > { %1730 = vmatpush1.bf16.msra.mxu0 %v8599_v19 }
 0x9e1   : > { %1731 = vmatprep.subr.bf16.mxu0 %v8600_v8 }
 0x9e4   : > { %1732 = vmatpush1.bf16.msra.mxu0 %v8601_v14 }
 0x9e5   : > { %1733 = vmatprep.subr.bf16.mxu0 %v8602_v0 }
 0x9e8   : > { %1734 = vmatpush1.bf16.msra.mxu0 %v8603_v17 }
 0x9e9   : > { %1735 = vmatprep.subr.bf16.mxu0 %v8604_v25 }
 0x9ec   : > { %1736 = vmatpush1.bf16.msra.mxu0 %v8605_v26 }
 0x9ed   : > { %1737 = vmatprep.subr.bf16.mxu0 %v8606_v30 }
 0x9f0   : > { %1738 = vmatpush1.bf16.msra.mxu0 %v8607_v34 }
 0x9f1   : > { %1739 = vmatprep.subr.bf16.mxu0 %v6565_v29 }
 0x9f4   : > { %1740 = vmatpush1.bf16.msra.mxu0 %v6568_v9 }
 0x9f5   : > { %1799 = vmatprep.subr.bf16.mxu0 %v6709_v36 }
 0xa8a   : > { %v1651_v27 = vpop.f32.mrb[20].mxu0 }
 0xa8b   : > { %v1652_v28 = vadd.f32 %v1651_v27, %v6240_v6  ;;  %v1653_v17 = vpop.f32.mrb[21].mxu0  ;;  %v8608_v27 = vld [vmem:[#allocation49_spill] sm:$0xff] }
 0xa8c   : > { %v1654_v25 = vadd.f32 %v1653_v17, %v6243_v7  ;;  %v1655_v0 = vpop.f32.mrb[22].mxu0  ;;  %v8613_v17 = vld [vmem:[#allocation71_spill] sm:$0xff] }
 0xa8d   : > { %v1658_v26 = vmax.f32 %v1652_v28, 0.0  ;;  %v1656_v14 = vpop.f32.mrb[23].mxu0  ;;  %v8609_v28 = vld [vmem:[#allocation50_spill] sm:$0xff] }
 0xa8e   : > { %v1659_v30 = vmax.f32 %v1654_v25, 0.0  ;;  %v8611_v14 = vld [vmem:[#allocation69_spill] sm:$0xff]  ;;  %v8612_v0 = vld [vmem:[#allocation70_spill] sm:$0xff]  ;;  %v8614_v25 = vld [vmem:[#allocation23_spill] sm:$0xff] }
 0xa8f   : > { %v1660_v34 = vpack.c.bf16 %v1658_v26, %v1658_v26  ;;  %v8615_v26 = vld [vmem:[#allocation20_spill] sm:$0xff] }
 0xa90   : > { %v1661_v8 = vpack.c.bf16 %v1659_v30, %v1659_v30  ;;  %v8616_v30 = vld [vmem:[#allocation72_spill] sm:$0xff] }
 0xa92   : > { %1694 = vmatprep.mubr.bf16.mxu1 %v1661_v8  ;;  %v8610_v8 = vld [vmem:[#allocation51_spill] sm:$0xff] }
 0xa93   : > { %1695 = vmatmul.mubr.bf16.vlgmr.msra.gmra.mrb[20].mxu1 %v1660_v34  ;;  %v8617_v34 = vld [vmem:[#allocation73_spill] sm:$0xff] }
 0xa94   : > { %1755 = vmatpush1.bf16.msra.mxu1 %v6414_v49 }
 0xa95   : > { %1756 = vmatprep.subr.bf16.mxu1 %v6417_v51 }
 0xa98   : > { %1757 = vmatpush1.bf16.msra.mxu1 %v6420_v53 }
 0xa99   : > { %1758 = vmatprep.subr.bf16.mxu1 %v6423_v59 }
 0xa9c   : > { %1759 = vmatpush1.bf16.msra.mxu1 %v6426_v57 }
 0xa9d   : > { %1760 = vmatprep.subr.bf16.mxu1 %v6429_v56 }
 0xaa0   : > { %1761 = vmatpush1.bf16.msra.mxu1 %v6432_v35 }
 0xaa1   : > { %1762 = vmatprep.subr.bf16.mxu1 %v8557_v62 }
 0xaa4   : > { %1763 = vmatpush1.bf16.msra.mxu1 %v6438_v39 }
 0xaa5   : > { %1764 = vmatprep.subr.bf16.mxu1 %v6441_v41 }
 0xaa8   : > { %1765 = vmatpush1.bf16.msra.mxu1 %v6444_v43 }
 0xaa9   : > { %1766 = vmatprep.subr.bf16.mxu1 %v6447_v45 }
 0xaac   : > { %1767 = vmatpush1.bf16.msra.mxu1 %v6450_v47 }
 0xaad   : > { %1768 = vmatprep.subr.bf16.mxu1 %v6453_v37 }
 0xab0   : > { %1769 = vmatpush1.bf16.msra.mxu1 %v6588_v58 }
 0xab1   : > { %1770 = vmatprep.subr.bf16.mxu1 %v6591_v10  ;;  %v8618_v10 = vld [vmem:[#allocation74_spill] sm:$0xff] }
 0xab4   : > { %1771 = vmatpush1.bf16.msra.mxu1 %v8608_v27  ;;  %v6741_v27 = vld [vmem:[#allocation7 + $0xe4] ss:$8 sps:$4 sm:$0xff]  }
 0xab5   : > { %1772 = vmatprep.subr.bf16.mxu1 %v8609_v28  ;;  %8619 = vst [vmem:[#allocation52_spill] sm:$0xff] %v6741_v27 }
 0xab8   : > { %1773 = vmatpush1.bf16.msra.mxu1 %v8610_v8  ;;  %v6744_v8 = vld [vmem:[#allocation7 + $0xe0] ss:$8 sps:$4 sm:$0xff]  }
 0xab9   : > { %1774 = vmatprep.subr.bf16.mxu1 %v8611_v14  ;;  %8620 = vst [vmem:[#allocation53_spill] sm:$0xff] %v6744_v8 }
 0xabc   : > { %1775 = vmatpush1.bf16.msra.mxu1 %v8612_v0  ;;  %v6747_v0 = vld [vmem:[#allocation7 + $0xf4] ss:$8 sps:$4 sm:$0xff]  }
 0xabd   : > { %1776 = vmatprep.subr.bf16.mxu1 %v8613_v17  ;;  %8621 = vst [vmem:[#allocation54_spill] sm:$0xff] %v6747_v0 }
 0xac0   : > { %1777 = vmatpush1.bf16.msra.mxu1 %v8614_v25  ;;  %v6750_v25 = vld [vmem:[#allocation7 + $0xf0] ss:$8 sps:$4 sm:$0xff]  }
 0xac1   : > { %1778 = vmatprep.subr.bf16.mxu1 %v8615_v26  ;;  %8622 = vst [vmem:[#allocation55_spill] sm:$0xff] %v6750_v25 }
 0xac4   : > { %1779 = vmatpush1.bf16.msra.mxu1 %v8616_v30 }
 0xac5   : > { %1780 = vmatprep.subr.bf16.mxu1 %v8617_v34 }
 0xac8   : > { %1781 = vmatpush1.bf16.msra.mxu1 %v8618_v10 }
 0xac9   : > { %1782 = vmatprep.subr.bf16.mxu1 %v6741_v27 }
 0xacc   : > { %1783 = vmatpush1.bf16.msra.mxu1 %v6744_v8 }
 0xacd   : > { %1784 = vmatprep.subr.bf16.mxu1 %v6747_v0 }
 0xad0   : > { %1785 = vmatpush1.bf16.msra.mxu1 %v6750_v25 }
 0xad1   : > { %1846 = vmatprep.subr.bf16.mxu1 %v6278_v38 }
 0xb66   : > { %v1696_v34 = vpop.f32.mrb[20].mxu1 }
 0xb67   : > { %v1697_v10 = vadd.f32 %v1696_v34, %v6285_v42  ;;  %v1698_v30 = vpop.f32.mrb[21].mxu1  ;;  %v6766_v34 = vld [vmem:[#allocation8] ss:$8 sps:$4 sm:$0xff]  }
 0xb68   : > { %v1699_v27 = vadd.f32 %v1698_v30, %v6288_v46  ;;  %v1700_v26 = vpop.f32.mrb[22].mxu1  ;;  %v6790_v30 = vld [vmem:[#allocation8 + $0x40] ss:$8 sps:$4 sm:$0xff]  }
 0xb69   : > { %v1703_v17 = vmul.f32 0.1, %v1697_v10  ;;  %v1701_v14 = vpop.f32.mrb[23].mxu1  ;;  %v6769_v10 = vld [vmem:[#allocation8 + $0x14] ss:$8 sps:$4 sm:$0xff]   ;;  %8630 = vst [vmem:[#allocation63_spill] sm:$0xff] %v6790_v30 }
 0xb6a   : > { %v1704_v8 = vmul.f32 0.1, %v1699_v27  ;;  %v6772_v27 = vld [vmem:[#allocation8 + $0x10] ss:$8 sps:$4 sm:$0xff]   ;;  %v6778_v14 = vld [vmem:[#allocation8 + $0x20] ss:$8 sps:$4 sm:$0xff]  }
 0xb6b   : > { %v6757_v28 = vadd.f32 %v1703_v17, %v6635_v32  ;;  %8626 = vst [vmem:[#allocation59_spill] sm:$0xff] %v6778_v14  ;;  %v6781_v17 = vld [vmem:[#allocation8 + $0x34] ss:$8 sps:$4 sm:$0xff]   ;;  %v6787_v26 = vld [vmem:[#allocation8 + $0x44] ss:$8 sps:$4 sm:$0xff]  }
 0xb6c   : > { %v6760_v0 = vadd.f32 %v1704_v8, %v6638_v33  ;;  %v6775_v8 = vld [vmem:[#allocation8 + $0x24] ss:$8 sps:$4 sm:$0xff]   ;;  %8627 = vst [vmem:[#allocation60_spill] sm:$0xff] %v6781_v17  ;;  %8629 = vst [vmem:[#allocation62_spill] sm:$0xff] %v6787_v26  ;;  %v6796_v32 = vld [vmem:[#allocation8 + $0x50] ss:$8 sps:$4 sm:$0xff]  }
 0xb6d   : > { %8623 = vst [vmem:[#allocation56_spill] sm:$0xff] %v6757_v28  ;;  %v1707_v38 = vpack.c.bf16 %v6757_v28, %v6757_v28  ;;  %8625 = vst [vmem:[#allocation58_spill] sm:$0xff] %v6775_v8  ;;  %v6799_v33 = vld [vmem:[#allocation8 + $0x64] ss:$8 sps:$4 sm:$0xff]  }
 0xb6e   : > { %8624 = vst [vmem:[#allocation57_spill] sm:$0xff] %v6760_v0  ;;  %v1708_v25 = vpack.c.bf16 %v6760_v0, %v6760_v0  ;;  %8632 = vst [vmem:[#allocation68_spill] sm:$0xff] %v6796_v32 }
 0xb6f   : > { %8633 = vst [vmem:[#allocation24_spill] sm:$0xff] %v6799_v33 }
 0xb70   : > { %1741 = vmatprep.mubr.bf16.mxu0 %v1708_v25  ;;  %v6784_v25 = vld [vmem:[#allocation8 + $0x30] ss:$8 sps:$4 sm:$0xff]  }
 0xb71   : > { %1742 = vmatmul.mubr.bf16.vlgmr.msra.gmra.mrb[24].mxu0 %v1707_v38  ;;  %8628 = vst [vmem:[#allocation61_spill] sm:$0xff] %v6784_v25  ;;  %v6793_v38 = vld [vmem:[#allocation8 + $0x54] ss:$8 sps:$4 sm:$0xff]  }
 0xb72   : > { %1800 = vmatpush1.bf16.msra.mxu0 %v6766_v34  ;;  %8631 = vst [vmem:[#allocation64_spill] sm:$0xff] %v6793_v38 }
 0xb73   : > { %1801 = vmatprep.subr.bf16.mxu0 %v6769_v10 }
 0xb76   : > { %1802 = vmatpush1.bf16.msra.mxu0 %v6772_v27 }
 0xb77   : > { %1803 = vmatprep.subr.bf16.mxu0 %v6775_v8 }
 0xb7a   : > { %1804 = vmatpush1.bf16.msra.mxu0 %v6778_v14 }
 0xb7b   : > { %1805 = vmatprep.subr.bf16.mxu0 %v6781_v17 }
 0xb7e   : > { %1806 = vmatpush1.bf16.msra.mxu0 %v6784_v25  ;;  %v6802_v25 = vld [vmem:[#allocation8 + $0x60] ss:$8 sps:$4 sm:$0xff]  }
 0xb7f   : > { %1807 = vmatprep.subr.bf16.mxu0 %v6787_v26  ;;  %8634 = vst [vmem:[#allocation26_spill] sm:$0xff] %v6802_v25  ;;  %v6805_v26 = vld [vmem:[#allocation8 + $0x74] ss:$8 sps:$4 sm:$0xff]  }
 0xb80   : > { %8635 = vst [vmem:[#allocation27_spill] sm:$0xff] %v6805_v26 }
 0xb82   : > { %1808 = vmatpush1.bf16.msra.mxu0 %v6790_v30  ;;  %v6808_v30 = vld [vmem:[#allocation8 + $0x70] ss:$8 sps:$4 sm:$0xff]  }
 0xb83   : > { %1809 = vmatprep.subr.bf16.mxu0 %v6793_v38  ;;  %8636 = vst [vmem:[#allocation28_spill] sm:$0xff] %v6808_v30  ;;  %v6811_v38 = vld [vmem:[#allocation8 + $0x84] ss:$8 sps:$4 sm:$0xff]  }
 0xb84   : > { %8637 = vst [vmem:[#allocation29_spill] sm:$0xff] %v6811_v38 }
 0xb86   : > { %1810 = vmatpush1.bf16.msra.mxu0 %v6796_v32  ;;  %v6814_v32 = vld [vmem:[#allocation8 + $0x80] ss:$8 sps:$4 sm:$0xff]  }
 0xb87   : > { %1811 = vmatprep.subr.bf16.mxu0 %v6799_v33  ;;  %8638 = vst [vmem:[#allocation30_spill] sm:$0xff] %v6814_v32  ;;  %v6817_v33 = vld [vmem:[#allocation8 + $0x94] ss:$8 sps:$4 sm:$0xff]  }
 0xb88   : > { %8639 = vst [vmem:[#allocation31_spill] sm:$0xff] %v6817_v33 }
 0xb8a   : > { %1812 = vmatpush1.bf16.msra.mxu0 %v6802_v25  ;;  %v6820_v25 = vld [vmem:[#allocation8 + $0x90] ss:$8 sps:$4 sm:$0xff]  }
 0xb8b   : > { %1813 = vmatprep.subr.bf16.mxu0 %v6805_v26  ;;  %8640 = vst [vmem:[#allocation32_spill] sm:$0xff] %v6820_v25  ;;  %v6823_v26 = vld [vmem:[#allocation8 + $0xa4] ss:$8 sps:$4 sm:$0xff]  }
 0xb8c   : > { %8641 = vst [vmem:[#allocation33_spill] sm:$0xff] %v6823_v26 }
 0xb8e   : > { %1814 = vmatpush1.bf16.msra.mxu0 %v6808_v30  ;;  %v6826_v30 = vld [vmem:[#allocation8 + $0xa0] ss:$8 sps:$4 sm:$0xff]  }
 0xb8f   : > { %1815 = vmatprep.subr.bf16.mxu0 %v6811_v38  ;;  %8642 = vst [vmem:[#allocation34_spill] sm:$0xff] %v6826_v30  ;;  %v6829_v38 = vld [vmem:[#allocation8 + $0xb4] ss:$8 sps:$4 sm:$0xff]  }
 0xb90   : > { %8643 = vst [vmem:[#allocation35_spill] sm:$0xff] %v6829_v38 }
 0xb92   : > { %1816 = vmatpush1.bf16.msra.mxu0 %v6814_v32  ;;  %v6832_v32 = vld [vmem:[#allocation8 + $0xb0] ss:$8 sps:$4 sm:$0xff]  }
 0xb93   : > { %1817 = vmatprep.subr.bf16.mxu0 %v6817_v33  ;;  %8644 = vst [vmem:[#allocation36_spill] sm:$0xff] %v6832_v32  ;;  %v6835_v33 = vld [vmem:[#allocation8 + $0xc4] ss:$8 sps:$4 sm:$0xff]  }
 0xb94   : > { %8645 = vst [vmem:[#allocation37_spill] sm:$0xff] %v6835_v33 }
 0xb96   : > { %1818 = vmatpush1.bf16.msra.mxu0 %v6820_v25  ;;  %v6838_v25 = vld [vmem:[#allocation8 + $0xc0] ss:$8 sps:$4 sm:$0xff]  }
 0xb97   : > { %1819 = vmatprep.subr.bf16.mxu0 %v6823_v26  ;;  %8646 = vst [vmem:[#allocation25_spill] sm:$0xff] %v6838_v25  ;;  %v6841_v26 = vld [vmem:[#allocation8 + $0xd4] ss:$8 sps:$4 sm:$0xff]  }
 0xb98   : > { %8647 = vst [vmem:[#allocation77_spill] sm:$0xff] %v6841_v26 }
 0xb9a   : > { %1820 = vmatpush1.bf16.msra.mxu0 %v6826_v30  ;;  %v6844_v30 = vld [vmem:[#allocation8 + $0xd0] ss:$8 sps:$4 sm:$0xff]  }
 0xb9b   : > { %1821 = vmatprep.subr.bf16.mxu0 %v6829_v38  ;;  %8648 = vst [vmem:[#allocation78_spill] sm:$0xff] %v6844_v30 }
 0xb9e   : > { %1822 = vmatpush1.bf16.msra.mxu0 %v6832_v32 }
 0xb9f   : > { %1823 = vmatprep.subr.bf16.mxu0 %v6835_v33 }
 0xba2   : > { %1824 = vmatpush1.bf16.msra.mxu0 %v6838_v25 }
 0xba3   : > { %1825 = vmatprep.subr.bf16.mxu0 %v6841_v26 }
 0xba6   : > { %1826 = vmatpush1.bf16.msra.mxu0 %v6844_v30 }
 0xba7   : > { %1827 = vmatprep.subr.bf16.mxu0 %v8585_v44 }
 0xbaa   : > { %1828 = vmatpush1.bf16.msra.mxu0 %v8534_v5  ;;  %v8652_v5 = vld [vmem:[#allocation43_spill] sm:$0xff] }
 0xbab   : > { %1829 = vmatprep.subr.bf16.mxu0 %v8535_v21 }
 0xbae   : > { %1830 = vmatpush1.bf16.msra.mxu0 %v8536_v22 }
 0xbaf   : > { %1891 = vmatprep.subr.bf16.mxu0 %v6333_v63  ;;  %v8649_v63 = vld [vmem:[#allocation40_spill] sm:$0xff] }
 0xc44   : > { %v1743_v33 = vpop.f32.mrb[24].mxu0 }
 0xc45   : > { %v1744_v25 = vadd.f32 %v1743_v33, %v6184_v15  ;;  %v1745_v32 = vpop.f32.mrb[25].mxu0 }
 0xc46   : > { %v1746_v26 = vadd.f32 %v1745_v32, %v6187_v54  ;;  %v1747_v38 = vpop.f32.mrb[26].mxu0 }
 0xc47   : > { %v1750_v17 = vmax.f32 %v1744_v25, 0.0  ;;  %v1748_v14 = vpop.f32.mrb[27].mxu0  ;;  %v8675_v38 = vld [vmem:[#allocation58_spill] sm:$0xff] }
 0xc48   : > { %v1751_v30 = vmax.f32 %v1746_v26, 0.0 }
 0xc49   : > { %v1752_v44 = vpack.c.bf16 %v1750_v17, %v1750_v17 }
 0xc4a   : > { %v1753_v8 = vpack.c.bf16 %v1751_v30, %v1751_v30 }
 0xc4c   : > { %1786 = vmatprep.mubr.bf16.mxu1 %v1753_v8 }
 0xc4d   : > { %1787 = vmatmul.mubr.bf16.vlgmr.msra.gmra.mrb[24].mxu1 %v1752_v44  ;;  %v8676_v44 = vld [vmem:[#allocation59_spill] sm:$0xff] }
 0xc4e   : > { %1847 = vmatpush1.bf16.msra.mxu1 %v6338_v3  ;;  %v8650_v3 = vld [vmem:[#allocation41_spill] sm:$0xff] }
 0xc4f   : > { %1848 = vmatprep.subr.bf16.mxu1 %v6341_v4  ;;  %v8651_v4 = vld [vmem:[#allocation42_spill] sm:$0xff] }
 0xc52   : > { %1849 = vmatpush1.bf16.msra.mxu1 %v6344_v60  ;;  %v8653_v60 = vld [vmem:[#allocation44_spill] sm:$0xff] }
 0xc53   : > { %1850 = vmatprep.subr.bf16.mxu1 %v6347_v61  ;;  %v8654_v61 = vld [vmem:[#allocation45_spill] sm:$0xff] }
 0xc56   : > { %1851 = vmatpush1.bf16.msra.mxu1 %v6350_v1  ;;  %v8655_v1 = vld [vmem:[#allocation46_spill] sm:$0xff] }
 0xc57   : > { %1852 = vmatprep.subr.bf16.mxu1 %v6353_v2  ;;  %v8656_v2 = vld [vmem:[#allocation47_spill] sm:$0xff] }
 0xc5a   : > { %1853 = vmatpush1.bf16.msra.mxu1 %v8537_v24 }
 0xc5b   : > { %1854 = vmatprep.subr.bf16.mxu1 %v8586_v11 }
 0xc5e   : > { %1855 = vmatpush1.bf16.msra.mxu1 %v8587_v12 }
 0xc5f   : > { %1856 = vmatprep.subr.bf16.mxu1 %v8588_v13 }
 0xc62   : > { %1857 = vmatpush1.bf16.msra.mxu1 %v8589_v18 }
 0xc63   : > { %1858 = vmatprep.subr.bf16.mxu1 %v8590_v16 }
 0xc66   : > { %1859 = vmatpush1.bf16.msra.mxu1 %v8591_v20  ;;  %v8671_v20 = vld [vmem:[#allocation54_spill] sm:$0xff] }
 0xc67   : > { %1860 = vmatprep.subr.bf16.mxu1 %v8592_v23  ;;  %v8672_v23 = vld [vmem:[#allocation55_spill] sm:$0xff] }
 0xc6a   : > { %1861 = vmatpush1.bf16.msra.mxu1 %v8593_v40  ;;  %v6919_v40 = vld [vmem:[#allocation5 + $0x4] ss:$8 sps:$4 sm:$0xff]  }
 0xc6b   : > { %1862 = vmatprep.subr.bf16.mxu1 %v8594_v48 }
 0xc6e   : > { %1863 = vmatpush1.bf16.msra.mxu1 %v8595_v50 }
 0xc6f   : > { %1864 = vmatprep.subr.bf16.mxu1 %v8596_v52 }
 0xc72   : > { %1865 = vmatpush1.bf16.msra.mxu1 %v8597_v55 }
 0xc73   : > { %1866 = vmatprep.subr.bf16.mxu1 %v8598_v31 }
 0xc76   : > { %1867 = vmatpush1.bf16.msra.mxu1 %v8599_v19 }
 0xc77   : > { %1868 = vmatprep.subr.bf16.mxu1 %v8649_v63 }
 0xc7a   : > { %1869 = vmatpush1.bf16.msra.mxu1 %v8650_v3 }
 0xc7b   : > { %1870 = vmatprep.subr.bf16.mxu1 %v8651_v4 }
 0xc7e   : > { %1871 = vmatpush1.bf16.msra.mxu1 %v8652_v5 }
 0xc7f   : > { %1872 = vmatprep.subr.bf16.mxu1 %v8653_v60 }
 0xc82   : > { %1873 = vmatpush1.bf16.msra.mxu1 %v8654_v61 }
 0xc83   : > { %1874 = vmatprep.subr.bf16.mxu1 %v8655_v1 }
 0xc86   : > { %1875 = vmatpush1.bf16.msra.mxu1 %v8656_v2 }
 0xc87   : > { %1876 = vmatprep.subr.bf16.mxu1 %v6565_v29 }
 0xc8a   : > { %1877 = vmatpush1.bf16.msra.mxu1 %v6568_v9 }
 0xc8b   : > { %1936 = vmatprep.subr.bf16.mxu1 %v6709_v36 }
 0xd20   : > { %v1788_v21 = vpop.f32.mrb[24].mxu1 }
 0xd21   : > { %v1789_v22 = vadd.f32 %v1788_v21, %v6240_v6  ;;  %v1790_v24 = vpop.f32.mrb[25].mxu1  ;;  %v8677_v21 = vld [vmem:[#allocation60_spill] sm:$0xff] }
 0xd22   : > { %v1791_v32 = vadd.f32 %v1790_v24, %v6243_v7  ;;  %v1792_v33 = vpop.f32.mrb[26].mxu1  ;;  %v8679_v24 = vld [vmem:[#allocation62_spill] sm:$0xff] }
 0xd23   : > { %v1795_v11 = vmax.f32 %v1789_v22, 0.0  ;;  %v1793_v12 = vpop.f32.mrb[27].mxu1  ;;  %v8678_v22 = vld [vmem:[#allocation61_spill] sm:$0xff]  ;;  %v8681_v33 = vld [vmem:[#allocation64_spill] sm:$0xff] }
 0xd24   : > { %v1796_v13 = vmax.f32 %v1791_v32, 0.0  ;;  %v8680_v32 = vld [vmem:[#allocation63_spill] sm:$0xff]  ;;  %v8683_v12 = vld [vmem:[#allocation24_spill] sm:$0xff] }
 0xd25   : > { %v1797_v16 = vpack.c.bf16 %v1795_v11, %v1795_v11  ;;  %v8682_v11 = vld [vmem:[#allocation68_spill] sm:$0xff] }
 0xd26   : > { %v1798_v18 = vpack.c.bf16 %v1796_v13, %v1796_v13  ;;  %v8684_v13 = vld [vmem:[#allocation26_spill] sm:$0xff] }
 0xd28   : > { %1831 = vmatprep.mubr.bf16.mxu0 %v1798_v18  ;;  %v8685_v18 = vld [vmem:[#allocation27_spill] sm:$0xff] }
 0xd29   : > { %1832 = vmatmul.mubr.bf16.vlgmr.msra.gmra.mrb[28].mxu0 %v1797_v16  ;;  %v8686_v16 = vld [vmem:[#allocation28_spill] sm:$0xff] }
 0xd2a   : > { %1892 = vmatpush1.bf16.msra.mxu0 %v6414_v49  ;;  %v8657_v49 = vld [vmem:[#allocation48_spill] sm:$0xff] }
 0xd2b   : > { %1893 = vmatprep.subr.bf16.mxu0 %v6417_v51  ;;  %v8658_v51 = vld [vmem:[#allocation49_spill] sm:$0xff] }
 0xd2e   : > { %1894 = vmatpush1.bf16.msra.mxu0 %v6420_v53  ;;  %v8659_v53 = vld [vmem:[#allocation50_spill] sm:$0xff] }
 0xd2f   : > { %1895 = vmatprep.subr.bf16.mxu0 %v6423_v59  ;;  %v8660_v59 = vld [vmem:[#allocation51_spill] sm:$0xff] }
 0xd32   : > { %1896 = vmatpush1.bf16.msra.mxu0 %v6426_v57  ;;  %v8661_v57 = vld [vmem:[#allocation69_spill] sm:$0xff] }
 0xd33   : > { %1897 = vmatprep.subr.bf16.mxu0 %v6429_v56  ;;  %v8662_v56 = vld [vmem:[#allocation70_spill] sm:$0xff] }
 0xd36   : > { %1898 = vmatpush1.bf16.msra.mxu0 %v6432_v35  ;;  %v8663_v35 = vld [vmem:[#allocation71_spill] sm:$0xff] }
 0xd37   : > { %1899 = vmatprep.subr.bf16.mxu0 %v8557_v62  ;;  %v8670_v62 = vld [vmem:[#allocation53_spill] sm:$0xff] }
 0xd3a   : > { %1900 = vmatpush1.bf16.msra.mxu0 %v6438_v39  ;;  %v8664_v39 = vld [vmem:[#allocation23_spill] sm:$0xff] }
 0xd3b   : > { %1901 = vmatprep.subr.bf16.mxu0 %v6441_v41  ;;  %v8665_v41 = vld [vmem:[#allocation20_spill] sm:$0xff] }
 0xd3e   : > { %1902 = vmatpush1.bf16.msra.mxu0 %v6444_v43  ;;  %v8667_v43 = vld [vmem:[#allocation73_spill] sm:$0xff] }
 0xd3f   : > { %1903 = vmatprep.subr.bf16.mxu0 %v6447_v45  ;;  %v8668_v45 = vld [vmem:[#allocation74_spill] sm:$0xff] }
 0xd42   : > { %1904 = vmatpush1.bf16.msra.mxu0 %v6450_v47  ;;  %v8669_v47 = vld [vmem:[#allocation52_spill] sm:$0xff] }
 0xd43   : > { %1905 = vmatprep.subr.bf16.mxu0 %v6453_v37  ;;  %v8666_v37 = vld [vmem:[#allocation72_spill] sm:$0xff] }
 0xd46   : > { %1906 = vmatpush1.bf16.msra.mxu0 %v6588_v58 }
 0xd47   : > { %1907 = vmatprep.subr.bf16.mxu0 %v8657_v49 }
 0xd4a   : > { %1908 = vmatpush1.bf16.msra.mxu0 %v8658_v51 }
 0xd4b   : > { %1909 = vmatprep.subr.bf16.mxu0 %v8659_v53 }
 0xd4e   : > { %1910 = vmatpush1.bf16.msra.mxu0 %v8660_v59 }
 0xd4f   : > { %1911 = vmatprep.subr.bf16.mxu0 %v8661_v57 }
 0xd52   : > { %1912 = vmatpush1.bf16.msra.mxu0 %v8662_v56 }
 0xd53   : > { %1913 = vmatprep.subr.bf16.mxu0 %v8663_v35 }
 0xd56   : > { %1914 = vmatpush1.bf16.msra.mxu0 %v8664_v39 }
 0xd57   : > { %1915 = vmatprep.subr.bf16.mxu0 %v8665_v41 }
 0xd5a   : > { %1916 = vmatpush1.bf16.msra.mxu0 %v8666_v37 }
 0xd5b   : > { %1917 = vmatprep.subr.bf16.mxu0 %v8667_v43 }
 0xd5e   : > { %1918 = vmatpush1.bf16.msra.mxu0 %v8668_v45 }
 0xd5f   : > { %1919 = vmatprep.subr.bf16.mxu0 %v8669_v47 }
 0xd62   : > { %1920 = vmatpush1.bf16.msra.mxu0 %v8670_v62 }
 0xd63   : > { %1921 = vmatprep.subr.bf16.mxu0 %v8671_v20 }
 0xd66   : > { %1922 = vmatpush1.bf16.msra.mxu0 %v8672_v23 }
 0xd67   : > { %1983 = vmatprep.subr.bf16.mxu0 %v6919_v40 }
 0xdfc   : > { %v1833_v48 = vpop.f32.mrb[28].mxu0 }
 0xdfd   : > { %v1834_v50 = vadd.f32 %v1833_v48, %v6285_v42  ;;  %v1835_v52 = vpop.f32.mrb[29].mxu0  ;;  %v8687_v48 = vld [vmem:[#allocation29_spill] sm:$0xff] }
 0xdfe   : > { %v1836_v55 = vadd.f32 %v1835_v52, %v6288_v46  ;;  %v1837_v31 = vpop.f32.mrb[30].mxu0  ;;  %v8689_v52 = vld [vmem:[#allocation31_spill] sm:$0xff] }
 0xdff   : > { %v1840_v19 = vmul.f32 0.1, %v1834_v50  ;;  %v1838_v8 = vpop.f32.mrb[31].mxu0  ;;  %v8688_v50 = vld [vmem:[#allocation30_spill] sm:$0xff]  ;;  %v8691_v31 = vld [vmem:[#allocation33_spill] sm:$0xff] }
 0xe00   : > { %v1841_v14 = vmul.f32 0.1, %v1836_v55  ;;  %v8690_v55 = vld [vmem:[#allocation32_spill] sm:$0xff]  ;;  %v8693_v8 = vld [vmem:[#allocation35_spill] sm:$0xff] }
 0xe01   : > { %v6925_v17 = vadd.f32 %v1840_v19, %v6757_v28  ;;  %v8692_v19 = vld [vmem:[#allocation34_spill] sm:$0xff]  ;;  %v8697_v28 = vld [vmem:[#allocation77_spill] sm:$0xff] }
 0xe02   : > { %v6928_v25 = vadd.f32 %v1841_v14, %v6760_v0  ;;  %v8694_v14 = vld [vmem:[#allocation36_spill] sm:$0xff]  ;;  %v8698_v0 = vld [vmem:[#allocation78_spill] sm:$0xff] }
 0xe03   : > { %8673 = vst [vmem:[#allocation40_spill] sm:$0xff] %v6925_v17  ;;  %v1844_v30 = vpack.c.bf16 %v6925_v17, %v6925_v17 }
 0xe04   : > { %8674 = vst [vmem:[#allocation41_spill] sm:$0xff] %v6928_v25  ;;  %v1845_v26 = vpack.c.bf16 %v6928_v25, %v6928_v25 }
 0xe06   : > { %1878 = vmatprep.mubr.bf16.mxu1 %v1845_v26  ;;  %v8695_v26 = vld [vmem:[#allocation37_spill] sm:$0xff] }
 0xe07   : > { %1879 = vmatmul.mubr.bf16.vlgmr.msra.gmra.mrb[28].mxu1 %v1844_v30  ;;  %v8696_v30 = vld [vmem:[#allocation25_spill] sm:$0xff] }
 0xe08   : > { %1937 = vmatpush1.bf16.msra.mxu1 %v6766_v34 }
 0xe09   : > { %1938 = vmatprep.subr.bf16.mxu1 %v6769_v10 }
 0xe0c   : > { %1939 = vmatpush1.bf16.msra.mxu1 %v6772_v27 }
 0xe0d   : > { %1940 = vmatprep.subr.bf16.mxu1 %v8675_v38 }
 0xe10   : > { %1941 = vmatpush1.bf16.msra.mxu1 %v8676_v44 }
 0xe11   : > { %1942 = vmatprep.subr.bf16.mxu1 %v8677_v21 }
 0xe14   : > { %1943 = vmatpush1.bf16.msra.mxu1 %v8678_v22 }
 0xe15   : > { %1944 = vmatprep.subr.bf16.mxu1 %v8679_v24 }
 0xe18   : > { %1945 = vmatpush1.bf16.msra.mxu1 %v8680_v32 }
 0xe19   : > { %1946 = vmatprep.subr.bf16.mxu1 %v8681_v33 }
 0xe1c   : > { %1947 = vmatpush1.bf16.msra.mxu1 %v8682_v11 }
 0xe1d   : > { %1948 = vmatprep.subr.bf16.mxu1 %v8683_v12 }
 0xe20   : > { %1949 = vmatpush1.bf16.msra.mxu1 %v8684_v13 }
 0xe21   : > { %1950 = vmatprep.subr.bf16.mxu1 %v8685_v18 }
 0xe24   : > { %1951 = vmatpush1.bf16.msra.mxu1 %v8686_v16  ;;  %v6978_v16 = vld [vmem:[#allocation5] ss:$8 sps:$4 sm:$0xff]  }
 0xe25   : > { %1952 = vmatprep.subr.bf16.mxu1 %v8687_v48 }
 0xe28   : > { %1953 = vmatpush1.bf16.msra.mxu1 %v8688_v50  ;;  %v6961_v50 = vld [vmem:[#allocation8 + $0xe4] ss:$8 sps:$4 sm:$0xff]  }
 0xe29   : > { %1954 = vmatprep.subr.bf16.mxu1 %v8689_v52  ;;  %8699 = vst [vmem:[#allocation42_spill] sm:$0xff] %v6961_v50 }
 0xe2c   : > { %1955 = vmatpush1.bf16.msra.mxu1 %v8690_v55  ;;  %v6964_v55 = vld [vmem:[#allocation8 + $0xe0] ss:$8 sps:$4 sm:$0xff]  }
 0xe2d   : > { %1956 = vmatprep.subr.bf16.mxu1 %v8691_v31  ;;  %8700 = vst [vmem:[#allocation43_spill] sm:$0xff] %v6964_v55 }
 0xe30   : > { %1957 = vmatpush1.bf16.msra.mxu1 %v8692_v19  ;;  %v6967_v19 = vld [vmem:[#allocation8 + $0xf4] ss:$8 sps:$4 sm:$0xff]  }
 0xe31   : > { %1958 = vmatprep.subr.bf16.mxu1 %v8693_v8  ;;  %8701 = vst [vmem:[#allocation44_spill] sm:$0xff] %v6967_v19 }
 0xe34   : > { %1959 = vmatpush1.bf16.msra.mxu1 %v8694_v14  ;;  %v6970_v14 = vld [vmem:[#allocation8 + $0xf0] ss:$8 sps:$4 sm:$0xff]  }
 0xe35   : > { %1960 = vmatprep.subr.bf16.mxu1 %v8695_v26  ;;  %8702 = vst [vmem:[#allocation45_spill] sm:$0xff] %v6970_v14 }
 0xe38   : > { %1961 = vmatpush1.bf16.msra.mxu1 %v8696_v30  ;;  %v6973_v30 = vld [vmem:[#allocation7 + $0x4] ss:$8 sps:$4 sm:$0xff]  }
 0xe39   : > { %1962 = vmatprep.subr.bf16.mxu1 %v8697_v28 }
 0xe3c   : > { %1963 = vmatpush1.bf16.msra.mxu1 %v8698_v0 }
 0xe3d   : > { %1964 = vmatprep.subr.bf16.mxu1 %v6961_v50 }
 0xe40   : > { %1965 = vmatpush1.bf16.msra.mxu1 %v6964_v55 }
 0xe41   : > { %1966 = vmatprep.subr.bf16.mxu1 %v6967_v19 }
 0xe44   : > { %1967 = vmatpush1.bf16.msra.mxu1 %v6970_v14  ;;  %v6981_v14 = vld [vmem:[#allocation5 + $0x14] ss:$8 sps:$4 sm:$0xff]  }
 0xe45   : > { %2028 = vmatprep.subr.bf16.mxu1 %v6973_v30 }
 0xeda   : > { %v1880_v0 = vpop.f32.mrb[28].mxu1 }
 0xedb   : > { %v1881_v28 = vadd.f32 %v1880_v0, %v6184_v15  ;;  %v1882_v50 = vpop.f32.mrb[29].mxu1  ;;  %v6984_v0 = vld [vmem:[#allocation5 + $0x10] ss:$8 sps:$4 sm:$0xff]  }
 0xedc   : > { %v1883_v26 = vadd.f32 %v1882_v50, %v6187_v54  ;;  %v1884_v8 = vpop.f32.mrb[30].mxu1  ;;  %v6987_v50 = vld [vmem:[#allocation5 + $0x24] ss:$8 sps:$4 sm:$0xff]  }
 0xedd   : > { %v1887_v55 = vmax.f32 %v1881_v28, 0.0  ;;  %v1885_v31 = vpop.f32.mrb[31].mxu1  ;;  %v6990_v28 = vld [vmem:[#allocation5 + $0x20] ss:$8 sps:$4 sm:$0xff]   ;;  %v7008_v8 = vld [vmem:[#allocation5 + $0x50] ss:$8 sps:$4 sm:$0xff]  }
 0xede   : > { %v1888_v52 = vmax.f32 %v1883_v26, 0.0  ;;  %v7002_v31 = vld [vmem:[#allocation5 + $0x40] ss:$8 sps:$4 sm:$0xff]   ;;  %8707 = vst [vmem:[#allocation50_spill] sm:$0xff] %v7008_v8  ;;  %v7011_v26 = vld [vmem:[#allocation5 + $0x64] ss:$8 sps:$4 sm:$0xff]  }
 0xedf   : > { %v1889_v19 = vpack.c.bf16 %v1887_v55, %v1887_v55  ;;  %v6999_v55 = vld [vmem:[#allocation5 + $0x44] ss:$8 sps:$4 sm:$0xff]   ;;  %8705 = vst [vmem:[#allocation48_spill] sm:$0xff] %v7002_v31  ;;  %8708 = vst [vmem:[#allocation51_spill] sm:$0xff] %v7011_v26 }
 0xee0   : > { %v1890_v48 = vpack.c.bf16 %v1888_v52, %v1888_v52  ;;  %v6996_v52 = vld [vmem:[#allocation5 + $0x30] ss:$8 sps:$4 sm:$0xff]   ;;  %8704 = vst [vmem:[#allocation47_spill] sm:$0xff] %v6999_v55 }
 0xee1   : > { %8703 = vst [vmem:[#allocation46_spill] sm:$0xff] %v6996_v52 }
 0xee2   : > { %1923 = vmatprep.mubr.bf16.mxu0 %v1890_v48  ;;  %v6993_v48 = vld [vmem:[#allocation5 + $0x34] ss:$8 sps:$4 sm:$0xff]  }
 0xee3   : > { %1924 = vmatmul.mubr.bf16.vlgmr.msra.gmra.mrb[32].mxu0 %v1889_v19  ;;  %v7005_v19 = vld [vmem:[#allocation5 + $0x54] ss:$8 sps:$4 sm:$0xff]  }
 0xee4   : > { %1984 = vmatpush1.bf16.msra.mxu0 %v6978_v16  ;;  %8706 = vst [vmem:[#allocation49_spill] sm:$0xff] %v7005_v19 }
 0xee5   : > { %1985 = vmatprep.subr.bf16.mxu0 %v6981_v14 }
 0xee8   : > { %1986 = vmatpush1.bf16.msra.mxu0 %v6984_v0 }
 0xee9   : > { %1987 = vmatprep.subr.bf16.mxu0 %v6987_v50 }
 0xeec   : > { %1988 = vmatpush1.bf16.msra.mxu0 %v6990_v28 }
 0xeed   : > { %1989 = vmatprep.subr.bf16.mxu0 %v6993_v48 }
 0xef0   : > { %1990 = vmatpush1.bf16.msra.mxu0 %v6996_v52  ;;  %v7014_v52 = vld [vmem:[#allocation5 + $0x60] ss:$8 sps:$4 sm:$0xff]  }
 0xef1   : > { %1991 = vmatprep.subr.bf16.mxu0 %v6999_v55  ;;  %8709 = vst [vmem:[#allocation69_spill] sm:$0xff] %v7014_v52  ;;  %v7017_v55 = vld [vmem:[#allocation5 + $0x74] ss:$8 sps:$4 sm:$0xff]  }
 0xef2   : > { %8710 = vst [vmem:[#allocation70_spill] sm:$0xff] %v7017_v55 }
 0xef4   : > { %1992 = vmatpush1.bf16.msra.mxu0 %v7002_v31  ;;  %v7020_v31 = vld [vmem:[#allocation5 + $0x70] ss:$8 sps:$4 sm:$0xff]  }
 0xef5   : > { %1993 = vmatprep.subr.bf16.mxu0 %v7005_v19  ;;  %8711 = vst [vmem:[#allocation71_spill] sm:$0xff] %v7020_v31  ;;  %v7023_v19 = vld [vmem:[#allocation5 + $0x84] ss:$8 sps:$4 sm:$0xff]  }
 0xef6   : > { %8712 = vst [vmem:[#allocation23_spill] sm:$0xff] %v7023_v19 }
 0xef8   : > { %1994 = vmatpush1.bf16.msra.mxu0 %v7008_v8  ;;  %v7026_v8 = vld [vmem:[#allocation5 + $0x80] ss:$8 sps:$4 sm:$0xff]  }
 0xef9   : > { %1995 = vmatprep.subr.bf16.mxu0 %v7011_v26  ;;  %8713 = vst [vmem:[#allocation20_spill] sm:$0xff] %v7026_v8  ;;  %v7029_v26 = vld [vmem:[#allocation5 + $0x94] ss:$8 sps:$4 sm:$0xff]  }
 0xefa   : > { %8714 = vst [vmem:[#allocation72_spill] sm:$0xff] %v7029_v26 }
 0xefc   : > { %1996 = vmatpush1.bf16.msra.mxu0 %v7014_v52  ;;  %v7032_v52 = vld [vmem:[#allocation5 + $0x90] ss:$8 sps:$4 sm:$0xff]  }
 0xefd   : > { %1997 = vmatprep.subr.bf16.mxu0 %v7017_v55  ;;  %8715 = vst [vmem:[#allocation73_spill] sm:$0xff] %v7032_v52  ;;  %v7035_v55 = vld [vmem:[#allocation5 + $0xa4] ss:$8 sps:$4 sm:$0xff]  }
 0xefe   : > { %8716 = vst [vmem:[#allocation74_spill] sm:$0xff] %v7035_v55 }
 0xf00   : > { %1998 = vmatpush1.bf16.msra.mxu0 %v7020_v31  ;;  %v7038_v31 = vld [vmem:[#allocation5 + $0xa0] ss:$8 sps:$4 sm:$0xff]  }
 0xf01   : > { %1999 = vmatprep.subr.bf16.mxu0 %v7023_v19  ;;  %8717 = vst [vmem:[#allocation52_spill] sm:$0xff] %v7038_v31 }
 0xf04   : > { %2000 = vmatpush1.bf16.msra.mxu0 %v7026_v8 }
 0xf05   : > { %2001 = vmatprep.subr.bf16.mxu0 %v7029_v26 }
 0xf08   : > { %2002 = vmatpush1.bf16.msra.mxu0 %v7032_v52 }
 0xf09   : > { %2003 = vmatprep.subr.bf16.mxu0 %v7035_v55 }
 0xf0c   : > { %2004 = vmatpush1.bf16.msra.mxu0 %v7038_v31 }
 0xf0d   : > { %2005 = vmatprep.subr.bf16.mxu0 %v8649_v63 }
 0xf10   : > { %2006 = vmatpush1.bf16.msra.mxu0 %v8650_v3 }
 0xf11   : > { %2007 = vmatprep.subr.bf16.mxu0 %v8651_v4 }
 0xf14   : > { %2008 = vmatpush1.bf16.msra.mxu0 %v8652_v5 }
 0xf15   : > { %2009 = vmatprep.subr.bf16.mxu0 %v8653_v60 }
 0xf18   : > { %2010 = vmatpush1.bf16.msra.mxu0 %v8654_v61 }
 0xf19   : > { %2011 = vmatprep.subr.bf16.mxu0 %v8655_v1 }
 0xf1c   : > { %2012 = vmatpush1.bf16.msra.mxu0 %v8656_v2  ;;  %v7054_v2 = vld [vmem:[#allocation7] ss:$8 sps:$4 sm:$0xff]  }
 0xf1d   : > { %2013 = vmatprep.subr.bf16.mxu0 %v6565_v29  ;;  %v7060_v29 = vld [vmem:[#allocation7 + $0x10] ss:$8 sps:$4 sm:$0xff]  }
 0xf20   : > { %2014 = vmatpush1.bf16.msra.mxu0 %v6568_v9  ;;  %v7057_v9 = vld [vmem:[#allocation7 + $0x14] ss:$8 sps:$4 sm:$0xff]  }
 0xf21   : > { %2073 = vmatprep.subr.bf16.mxu0 %v6709_v36 }
 0xfb6   : > { %v1925_v63 = vpop.f32.mrb[32].mxu0 }
 0xfb7   : > { %v1926_v3 = vadd.f32 %v1925_v63, %v6240_v6  ;;  %v1927_v4 = vpop.f32.mrb[33].mxu0  ;;  %v7072_v63 = vld [vmem:[#allocation7 + $0x30] ss:$8 sps:$4 sm:$0xff]  }
 0xfb8   : > { %v1928_v5 = vadd.f32 %v1927_v4, %v6243_v7  ;;  %v1929_v31 = vpop.f32.mrb[34].mxu0  ;;  %v7078_v4 = vld [vmem:[#allocation7 + $0x40] ss:$8 sps:$4 sm:$0xff]  }
 0xfb9   : > { %v1932_v60 = vmax.f32 %v1926_v3, 0.0  ;;  %v1930_v55 = vpop.f32.mrb[35].mxu0  ;;  %v7063_v31 = vld [vmem:[#allocation7 + $0x24] ss:$8 sps:$4 sm:$0xff]  }
 0xfba   : > { %v1933_v61 = vmax.f32 %v1928_v5, 0.0  ;;  %v7066_v55 = vld [vmem:[#allocation7 + $0x20] ss:$8 sps:$4 sm:$0xff]   ;;  %v7075_v3 = vld [vmem:[#allocation7 + $0x44] ss:$8 sps:$4 sm:$0xff]  }
 0xfbb   : > { %v1934_v1 = vpack.c.bf16 %v1932_v60, %v1932_v60  ;;  %8718 = vst [vmem:[#allocation53_spill] sm:$0xff] %v7075_v3  ;;  %v7081_v5 = vld [vmem:[#allocation7 + $0x54] ss:$8 sps:$4 sm:$0xff]   ;;  %v7084_v60 = vld [vmem:[#allocation7 + $0x50] ss:$8 sps:$4 sm:$0xff]  }
 0xfbc   : > { %v1935_v52 = vpack.c.bf16 %v1933_v61, %v1933_v61  ;;  %v7087_v61 = vld [vmem:[#allocation7 + $0x64] ss:$8 sps:$4 sm:$0xff]  }
 0xfbe   : > { %1968 = vmatprep.mubr.bf16.mxu1 %v1935_v52  ;;  %v7069_v52 = vld [vmem:[#allocation7 + $0x34] ss:$8 sps:$4 sm:$0xff]  }
 0xfbf   : > { %1969 = vmatmul.mubr.bf16.vlgmr.msra.gmra.mrb[32].mxu1 %v1934_v1  ;;  %v7090_v1 = vld [vmem:[#allocation7 + $0x60] ss:$8 sps:$4 sm:$0xff]  }
 0xfc0   : > { %2029 = vmatpush1.bf16.msra.mxu1 %v7054_v2 }
 0xfc1   : > { %2030 = vmatprep.subr.bf16.mxu1 %v7057_v9 }
 0xfc4   : > { %2031 = vmatpush1.bf16.msra.mxu1 %v7060_v29 }
 0xfc5   : > { %2032 = vmatprep.subr.bf16.mxu1 %v7063_v31 }
 0xfc8   : > { %2033 = vmatpush1.bf16.msra.mxu1 %v7066_v55 }
 0xfc9   : > { %2034 = vmatprep.subr.bf16.mxu1 %v7069_v52 }
 0xfcc   : > { %2035 = vmatpush1.bf16.msra.mxu1 %v7072_v63 }
 0xfcd   : > { %2036 = vmatprep.subr.bf16.mxu1 %v7075_v3  ;;  %v7093_v3 = vld [vmem:[#allocation7 + $0x74] ss:$8 sps:$4 sm:$0xff]  }
 0xfd0   : > { %2037 = vmatpush1.bf16.msra.mxu1 %v7078_v4 }
 0xfd1   : > { %2038 = vmatprep.subr.bf16.mxu1 %v7081_v5 }
 0xfd4   : > { %2039 = vmatpush1.bf16.msra.mxu1 %v7084_v60 }
 0xfd5   : > { %2040 = vmatprep.subr.bf16.mxu1 %v7087_v61 }
 0xfd8   : > { %2041 = vmatpush1.bf16.msra.mxu1 %v7090_v1 }
 0xfd9   : > { %2042 = vmatprep.subr.bf16.mxu1 %v7093_v3 }
 0xfdc   : > { %2043 = vmatpush1.bf16.msra.mxu1 %v6588_v58 }
 0xfdd   : > { %2044 = vmatprep.subr.bf16.mxu1 %v8657_v49 }
 0xfe0   : > { %2045 = vmatpush1.bf16.msra.mxu1 %v8658_v51 }
 0xfe1   : > { %2046 = vmatprep.subr.bf16.mxu1 %v8659_v53 }
 0xfe4   : > { %2047 = vmatpush1.bf16.msra.mxu1 %v8660_v59 }
 0xfe5   : > { %2048 = vmatprep.subr.bf16.mxu1 %v8661_v57 }
 0xfe8   : > { %2049 = vmatpush1.bf16.msra.mxu1 %v8662_v56 }
 0xfe9   : > { %2050 = vmatprep.subr.bf16.mxu1 %v8663_v35 }
 0xfec   : > { %2051 = vmatpush1.bf16.msra.mxu1 %v8664_v39 }
 0xfed   : > { %2052 = vmatprep.subr.bf16.mxu1 %v8665_v41 }
 0xff0   : > { %2053 = vmatpush1.bf16.msra.mxu1 %v8666_v37 }
 0xff1   : > { %2054 = vmatprep.subr.bf16.mxu1 %v8667_v43 }
 0xff4   : > { %2055 = vmatpush1.bf16.msra.mxu1 %v8668_v45  ;;  %v8721_v45 = vld [vmem:[#allocation28_spill] sm:$0xff] }
 0xff5   : > { %2056 = vmatprep.subr.bf16.mxu1 %v8669_v47 }
 0xff8   : > { %2057 = vmatpush1.bf16.msra.mxu1 %v8670_v62 }
 0xff9   : > { %2058 = vmatprep.subr.bf16.mxu1 %v8671_v20 }
 0xffc   : > { %2059 = vmatpush1.bf16.msra.mxu1 %v8672_v23 }
 0xffd   : > { %2120 = vmatprep.subr.bf16.mxu1 %v6919_v40 }
0x1092   : > { %v1970_v58 = vpop.f32.mrb[32].mxu1 }
0x1093   : > { %v1971_v49 = vadd.f32 %v1970_v58, %v6285_v42  ;;  %v1972_v51 = vpop.f32.mrb[33].mxu1  ;;  %v8722_v58 = vld [vmem:[#allocation29_spill] sm:$0xff] }
0x1094   : > { %v1973_v53 = vadd.f32 %v1972_v51, %v6288_v46  ;;  %v1974_v59 = vpop.f32.mrb[34].mxu1  ;;  %v8724_v51 = vld [vmem:[#allocation31_spill] sm:$0xff] }
0x1095   : > { %v1977_v57 = vmul.f32 0.1, %v1971_v49  ;;  %v1975_v56 = vpop.f32.mrb[35].mxu1  ;;  %v8723_v49 = vld [vmem:[#allocation30_spill] sm:$0xff]  ;;  %v8726_v59 = vld [vmem:[#allocation33_spill] sm:$0xff] }
0x1096   : > { %v1978_v35 = vmul.f32 0.1, %v1973_v53  ;;  %v8725_v53 = vld [vmem:[#allocation32_spill] sm:$0xff]  ;;  %v8728_v56 = vld [vmem:[#allocation35_spill] sm:$0xff] }
0x1097   : > { %v7117_v39 = vadd.f32 %v1977_v57, %v6925_v17  ;;  %v8727_v57 = vld [vmem:[#allocation34_spill] sm:$0xff]  ;;  %v8732_v17 = vld [vmem:[#allocation77_spill] sm:$0xff] }
0x1098   : > { %v7120_v41 = vadd.f32 %v1978_v35, %v6928_v25  ;;  %v8729_v35 = vld [vmem:[#allocation36_spill] sm:$0xff]  ;;  %v8733_v25 = vld [vmem:[#allocation78_spill] sm:$0xff] }
0x1099   : > { %8719 = vst [vmem:[#allocation54_spill] sm:$0xff] %v7117_v39  ;;  %v1981_v43 = vpack.c.bf16 %v7117_v39, %v7117_v39 }
0x109a   : > { %8720 = vst [vmem:[#allocation55_spill] sm:$0xff] %v7120_v41  ;;  %v1982_v37 = vpack.c.bf16 %v7120_v41, %v7120_v41 }
0x109c   : > { %2015 = vmatprep.mubr.bf16.mxu0 %v1982_v37  ;;  %v8730_v37 = vld [vmem:[#allocation37_spill] sm:$0xff] }
0x109d   : > { %2016 = vmatmul.mubr.bf16.vlgmr.msra.gmra.mrb[36].mxu0 %v1981_v43  ;;  %v8731_v43 = vld [vmem:[#allocation25_spill] sm:$0xff] }
0x109e   : > { %2074 = vmatpush1.bf16.msra.mxu0 %v6766_v34 }
0x109f   : > { %2075 = vmatprep.subr.bf16.mxu0 %v6769_v10 }
0x10a2   : > { %2076 = vmatpush1.bf16.msra.mxu0 %v6772_v27 }
0x10a3   : > { %2077 = vmatprep.subr.bf16.mxu0 %v8675_v38 }
0x10a6   : > { %2078 = vmatpush1.bf16.msra.mxu0 %v8676_v44 }
0x10a7   : > { %2079 = vmatprep.subr.bf16.mxu0 %v8677_v21 }
0x10aa   : > { %2080 = vmatpush1.bf16.msra.mxu0 %v8678_v22 }
0x10ab   : > { %2081 = vmatprep.subr.bf16.mxu0 %v8679_v24 }
0x10ae   : > { %2082 = vmatpush1.bf16.msra.mxu0 %v8680_v32 }
0x10af   : > { %2083 = vmatprep.subr.bf16.mxu0 %v8681_v33 }
0x10b2   : > { %2084 = vmatpush1.bf16.msra.mxu0 %v8682_v11 }
0x10b3   : > { %2085 = vmatprep.subr.bf16.mxu0 %v8683_v12 }
0x10b6   : > { %2086 = vmatpush1.bf16.msra.mxu0 %v8684_v13 }
0x10b7   : > { %2087 = vmatprep.subr.bf16.mxu0 %v8685_v18 }
0x10ba   : > { %2088 = vmatpush1.bf16.msra.mxu0 %v8721_v45 }
0x10bb   : > { %2089 = vmatprep.subr.bf16.mxu0 %v8722_v58 }
0x10be   : > { %2090 = vmatpush1.bf16.msra.mxu0 %v8723_v49  ;;  %v8734_v49 = vld [vmem:[#allocation42_spill] sm:$0xff] }
0x10bf   : > { %2091 = vmatprep.subr.bf16.mxu0 %v8724_v51  ;;  %v8735_v51 = vld [vmem:[#allocation43_spill] sm:$0xff] }
0x10c2   : > { %2092 = vmatpush1.bf16.msra.mxu0 %v8725_v53  ;;  %v8736_v53 = vld [vmem:[#allocation44_spill] sm:$0xff] }
0x10c3   : > { %2093 = vmatprep.subr.bf16.mxu0 %v8726_v59  ;;  %v8737_v59 = vld [vmem:[#allocation45_spill] sm:$0xff] }
0x10c6   : > { %2094 = vmatpush1.bf16.msra.mxu0 %v8727_v57 }
0x10c7   : > { %2095 = vmatprep.subr.bf16.mxu0 %v8728_v56 }
0x10ca   : > { %2096 = vmatpush1.bf16.msra.mxu0 %v8729_v35 }
0x10cb   : > { %2097 = vmatprep.subr.bf16.mxu0 %v8730_v37 }
0x10ce   : > { %2098 = vmatpush1.bf16.msra.mxu0 %v8731_v43 }
0x10cf   : > { %2099 = vmatprep.subr.bf16.mxu0 %v8732_v17 }
0x10d2   : > { %2100 = vmatpush1.bf16.msra.mxu0 %v8733_v25 }
0x10d3   : > { %2101 = vmatprep.subr.bf16.mxu0 %v8734_v49 }
0x10d6   : > { %2102 = vmatpush1.bf16.msra.mxu0 %v8735_v51 }
0x10d7   : > { %2103 = vmatprep.subr.bf16.mxu0 %v8736_v53 }
0x10da   : > { %2104 = vmatpush1.bf16.msra.mxu0 %v8737_v59 }
0x10db   : > { %2165 = vmatprep.subr.bf16.mxu0 %v6973_v30 }
0x1170   : > { %v2017_v56 = vpop.f32.mrb[36].mxu0 }
0x1171   : > { %v2018_v35 = vadd.f32 %v2017_v56, %v6184_v15  ;;  %v2019_v37 = vpop.f32.mrb[37].mxu0  ;;  %v8744_v56 = vld [vmem:[#allocation69_spill] sm:$0xff] }
0x1172   : > { %v2020_v43 = vadd.f32 %v2019_v37, %v6187_v54  ;;  %v2021_v57 = vpop.f32.mrb[38].mxu0  ;;  %v8746_v37 = vld [vmem:[#allocation71_spill] sm:$0xff] }
0x1173   : > { %v2024_v17 = vmax.f32 %v2018_v35, 0.0  ;;  %v2022_v58 = vpop.f32.mrb[39].mxu0  ;;  %v8738_v57 = vld [vmem:[#allocation46_spill] sm:$0xff] }
0x1174   : > { %v2025_v25 = vmax.f32 %v2020_v43, 0.0  ;;  %v8739_v58 = vld [vmem:[#allocation47_spill] sm:$0xff]  ;;  %v8745_v35 = vld [vmem:[#allocation70_spill] sm:$0xff]  ;;  %v8747_v43 = vld [vmem:[#allocation73_spill] sm:$0xff] }
0x1175   : > { %v2026_v49 = vpack.c.bf16 %v2024_v17, %v2024_v17  ;;  %v8741_v17 = vld [vmem:[#allocation49_spill] sm:$0xff] }
0x1176   : > { %v2027_v45 = vpack.c.bf16 %v2025_v25, %v2025_v25  ;;  %v8740_v25 = vld [vmem:[#allocation48_spill] sm:$0xff] }
0x1178   : > { %2060 = vmatprep.mubr.bf16.mxu1 %v2027_v45  ;;  %v8742_v45 = vld [vmem:[#allocation50_spill] sm:$0xff] }
0x1179   : > { %2061 = vmatmul.mubr.bf16.vlgmr.msra.gmra.mrb[36].mxu1 %v2026_v49  ;;  %v8743_v49 = vld [vmem:[#allocation51_spill] sm:$0xff] }
0x117a   : > { %2121 = vmatpush1.bf16.msra.mxu1 %v6978_v16 }
0x117b   : > { %2122 = vmatprep.subr.bf16.mxu1 %v6981_v14 }
0x117e   : > { %2123 = vmatpush1.bf16.msra.mxu1 %v6984_v0 }
0x117f   : > { %2124 = vmatprep.subr.bf16.mxu1 %v6987_v50 }
0x1182   : > { %2125 = vmatpush1.bf16.msra.mxu1 %v6990_v28 }
0x1183   : > { %2126 = vmatprep.subr.bf16.mxu1 %v6993_v48 }
0x1186   : > { %2127 = vmatpush1.bf16.msra.mxu1 %v8738_v57 }
0x1187   : > { %2128 = vmatprep.subr.bf16.mxu1 %v8739_v58 }
0x118a   : > { %2129 = vmatpush1.bf16.msra.mxu1 %v8740_v25  ;;  %v8748_v25 = vld [vmem:[#allocation74_spill] sm:$0xff] }
0x118b   : > { %2130 = vmatprep.subr.bf16.mxu1 %v8741_v17  ;;  %v8749_v17 = vld [vmem:[#allocation52_spill] sm:$0xff] }
0x118e   : > { %2131 = vmatpush1.bf16.msra.mxu1 %v8742_v45  ;;  %v7181_v45 = vld [vmem:[#allocation5 + $0xb4] ss:$8 sps:$4 sm:$0xff]  }
0x118f   : > { %2132 = vmatprep.subr.bf16.mxu1 %v8743_v49  ;;  %8750 = vst [vmem:[#allocation58_spill] sm:$0xff] %v7181_v45 }
0x1192   : > { %2133 = vmatpush1.bf16.msra.mxu1 %v8744_v56  ;;  %v7184_v56 = vld [vmem:[#allocation5 + $0xb0] ss:$8 sps:$4 sm:$0xff]  }
0x1193   : > { %2134 = vmatprep.subr.bf16.mxu1 %v8745_v35  ;;  %8751 = vst [vmem:[#allocation59_spill] sm:$0xff] %v7184_v56 }
0x1196   : > { %2135 = vmatpush1.bf16.msra.mxu1 %v8746_v37  ;;  %v7187_v37 = vld [vmem:[#allocation5 + $0xc4] ss:$8 sps:$4 sm:$0xff]  }
0x1197   : > { %2136 = vmatprep.subr.bf16.mxu1 %v7023_v19  ;;  %8752 = vst [vmem:[#allocation60_spill] sm:$0xff] %v7187_v37 }
0x119a   : > { %2137 = vmatpush1.bf16.msra.mxu1 %v7026_v8  ;;  %v7190_v8 = vld [vmem:[#allocation5 + $0xc0] ss:$8 sps:$4 sm:$0xff]  }
0x119b   : > { %2138 = vmatprep.subr.bf16.mxu1 %v7029_v26  ;;  %8753 = vst [vmem:[#allocation61_spill] sm:$0xff] %v7190_v8 }
0x119e   : > { %2139 = vmatpush1.bf16.msra.mxu1 %v8747_v43  ;;  %v7193_v43 = vld [vmem:[#allocation5 + $0xd4] ss:$8 sps:$4 sm:$0xff]  }
0x119f   : > { %2140 = vmatprep.subr.bf16.mxu1 %v8748_v25  ;;  %8754 = vst [vmem:[#allocation62_spill] sm:$0xff] %v7193_v43 }
0x11a2   : > { %2141 = vmatpush1.bf16.msra.mxu1 %v8749_v17  ;;  %v7196_v17 = vld [vmem:[#allocation5 + $0xd0] ss:$8 sps:$4 sm:$0xff]  }
0x11a3   : > { %2142 = vmatprep.subr.bf16.mxu1 %v7181_v45  ;;  %8755 = vst [vmem:[#allocation63_spill] sm:$0xff] %v7196_v17  ;;  %v7199_v45 = vld [vmem:[#allocation5 + $0xe4] ss:$8 sps:$4 sm:$0xff]  }
0x11a4   : > { %8756 = vst [vmem:[#allocation64_spill] sm:$0xff] %v7199_v45 }
0x11a6   : > { %2143 = vmatpush1.bf16.msra.mxu1 %v7184_v56  ;;  %v7202_v56 = vld [vmem:[#allocation5 + $0xe0] ss:$8 sps:$4 sm:$0xff]  }
0x11a7   : > { %2144 = vmatprep.subr.bf16.mxu1 %v7187_v37  ;;  %8757 = vst [vmem:[#allocation68_spill] sm:$0xff] %v7202_v56  ;;  %v7205_v37 = vld [vmem:[#allocation5 + $0xf4] ss:$8 sps:$4 sm:$0xff]  }
0x11aa   : > { %2145 = vmatpush1.bf16.msra.mxu1 %v7190_v8  ;;  %v7208_v8 = vld [vmem:[#allocation5 + $0xf0] ss:$8 sps:$4 sm:$0xff]  }
0x11ab   : > { %2146 = vmatprep.subr.bf16.mxu1 %v7193_v43 }
0x11ae   : > { %2147 = vmatpush1.bf16.msra.mxu1 %v7196_v17 }
0x11af   : > { %2148 = vmatprep.subr.bf16.mxu1 %v7199_v45 }
0x11b2   : > { %2149 = vmatpush1.bf16.msra.mxu1 %v7202_v56 }
0x11b3   : > { %2150 = vmatprep.subr.bf16.mxu1 %v7205_v37 }
0x11b6   : > { %2151 = vmatpush1.bf16.msra.mxu1 %v7208_v8 }
0x11b7   : > { %2210 = vmatprep.subr.bf16.mxu1 %v6709_v36  ;;  %v8758_v36 = vld [vmem:[#allocation53_spill] sm:$0xff] }
0x124c   : > { %v2062_v43 = vpop.f32.mrb[36].mxu1 }
0x124d   : > { %v2063_v17 = vadd.f32 %v2062_v43, %v6240_v6  ;;  %v2064_v25 = vpop.f32.mrb[37].mxu1  ;;  %v7255_v43 = vld [vmem:[#allocation7 + $0xc4] ss:$8 sps:$4 sm:$0xff]  }
0x124e   : > { %v2065_v45 = vadd.f32 %v2064_v25, %v6243_v7  ;;  %v2066_v26 = vpop.f32.mrb[38].mxu1  ;;  %v7237_v25 = vld [vmem:[#allocation7 + $0x94] ss:$8 sps:$4 sm:$0xff]   ;;  %8767 = vst [vmem:[#allocation79_spill] sm:$0xff] %v7255_v43 }
0x124f   : > { %v2069_v19 = vmax.f32 %v2063_v17, 0.0  ;;  %v2067_v35 = vpop.f32.mrb[39].mxu1  ;;  %v7231_v26 = vld [vmem:[#allocation7 + $0x84] ss:$8 sps:$4 sm:$0xff]   ;;  %8761 = vst [vmem:[#allocation27_spill] sm:$0xff] %v7237_v25 }
0x1250   : > { %v2070_v56 = vmax.f32 %v2065_v45, 0.0  ;;  %8759 = vst [vmem:[#allocation24_spill] sm:$0xff] %v7231_v26  ;;  %v7240_v17 = vld [vmem:[#allocation7 + $0x90] ss:$8 sps:$4 sm:$0xff]   ;;  %v7243_v45 = vld [vmem:[#allocation7 + $0xa4] ss:$8 sps:$4 sm:$0xff]  }
0x1251   : > { %v2071_v58 = vpack.c.bf16 %v2069_v19, %v2069_v19  ;;  %v7228_v19 = vld [vmem:[#allocation7 + $0x70] ss:$8 sps:$4 sm:$0xff]   ;;  %8762 = vst [vmem:[#allocation43_spill] sm:$0xff] %v7240_v17  ;;  %8763 = vst [vmem:[#allocation44_spill] sm:$0xff] %v7243_v45 }
0x1252   : > { %v2072_v49 = vpack.c.bf16 %v2070_v56, %v2070_v56  ;;  %v7249_v56 = vld [vmem:[#allocation7 + $0xb4] ss:$8 sps:$4 sm:$0xff]   ;;  %v7252_v35 = vld [vmem:[#allocation7 + $0xb0] ss:$8 sps:$4 sm:$0xff]  }
0x1253   : > { %8765 = vst [vmem:[#allocation46_spill] sm:$0xff] %v7249_v56  ;;  %8766 = vst [vmem:[#allocation53_spill] sm:$0xff] %v7252_v35 }
0x1254   : > { %2105 = vmatprep.mubr.bf16.mxu0 %v2072_v49  ;;  %v7246_v49 = vld [vmem:[#allocation7 + $0xa0] ss:$8 sps:$4 sm:$0xff]  }
0x1255   : > { %2106 = vmatmul.mubr.bf16.vlgmr.msra.gmra.mrb[40].mxu0 %v2071_v58  ;;  %v7234_v58 = vld [vmem:[#allocation7 + $0x80] ss:$8 sps:$4 sm:$0xff]   ;;  %8764 = vst [vmem:[#allocation45_spill] sm:$0xff] %v7246_v49 }
0x1256   : > { %2166 = vmatpush1.bf16.msra.mxu0 %v7054_v2  ;;  %8760 = vst [vmem:[#allocation26_spill] sm:$0xff] %v7234_v58 }
0x1257   : > { %2167 = vmatprep.subr.bf16.mxu0 %v7057_v9 }
0x125a   : > { %2168 = vmatpush1.bf16.msra.mxu0 %v7060_v29 }
0x125b   : > { %2169 = vmatprep.subr.bf16.mxu0 %v7063_v31 }
0x125e   : > { %2170 = vmatpush1.bf16.msra.mxu0 %v7066_v55 }
0x125f   : > { %2171 = vmatprep.subr.bf16.mxu0 %v7069_v52 }
0x1262   : > { %2172 = vmatpush1.bf16.msra.mxu0 %v7072_v63 }
0x1263   : > { %2173 = vmatprep.subr.bf16.mxu0 %v8758_v36 }
0x1266   : > { %2174 = vmatpush1.bf16.msra.mxu0 %v7078_v4 }
0x1267   : > { %2175 = vmatprep.subr.bf16.mxu0 %v7081_v5 }
0x126a   : > { %2176 = vmatpush1.bf16.msra.mxu0 %v7084_v60 }
0x126b   : > { %2177 = vmatprep.subr.bf16.mxu0 %v7087_v61 }
0x126e   : > { %2178 = vmatpush1.bf16.msra.mxu0 %v7090_v1 }
0x126f   : > { %2179 = vmatprep.subr.bf16.mxu0 %v7093_v3 }
0x1272   : > { %2180 = vmatpush1.bf16.msra.mxu0 %v7228_v19 }
0x1273   : > { %2181 = vmatprep.subr.bf16.mxu0 %v7231_v26 }
0x1276   : > { %2182 = vmatpush1.bf16.msra.mxu0 %v7234_v58 }
0x1277   : > { %2183 = vmatprep.subr.bf16.mxu0 %v7237_v25 }
0x127a   : > { %2184 = vmatpush1.bf16.msra.mxu0 %v7240_v17  ;;  %v7258_v17 = vld [vmem:[#allocation7 + $0xc0] ss:$8 sps:$4 sm:$0xff]  }
0x127b   : > { %2185 = vmatprep.subr.bf16.mxu0 %v7243_v45  ;;  %8768 = vst [vmem:[#allocation80_spill] sm:$0xff] %v7258_v17  ;;  %v7261_v45 = vld [vmem:[#allocation7 + $0xd4] ss:$8 sps:$4 sm:$0xff]  }
0x127c   : > { %8769 = vst [vmem:[#allocation81_spill] sm:$0xff] %v7261_v45 }
0x127e   : > { %2186 = vmatpush1.bf16.msra.mxu0 %v7246_v49  ;;  %v7264_v49 = vld [vmem:[#allocation7 + $0xd0] ss:$8 sps:$4 sm:$0xff]  }
0x127f   : > { %2187 = vmatprep.subr.bf16.mxu0 %v7249_v56  ;;  %8770 = vst [vmem:[#allocation82_spill] sm:$0xff] %v7264_v49 }
0x1282   : > { %2188 = vmatpush1.bf16.msra.mxu0 %v7252_v35 }
0x1283   : > { %2189 = vmatprep.subr.bf16.mxu0 %v7255_v43 }
0x1286   : > { %2190 = vmatpush1.bf16.msra.mxu0 %v7258_v17 }
0x1287   : > { %2191 = vmatprep.subr.bf16.mxu0 %v7261_v45 }
0x128a   : > { %2192 = vmatpush1.bf16.msra.mxu0 %v7264_v49 }
0x128b   : > { %2193 = vmatprep.subr.bf16.mxu0 %v8669_v47 }
0x128e   : > { %2194 = vmatpush1.bf16.msra.mxu0 %v8670_v62 }
0x128f   : > { %2195 = vmatprep.subr.bf16.mxu0 %v8671_v20 }
0x1292   : > { %2196 = vmatpush1.bf16.msra.mxu0 %v8672_v23 }
0x1293   : > { %2257 = vmatprep.subr.bf16.mxu0 %v6919_v40 }
0x1328   : > { %v2107_v43 = vpop.f32.mrb[40].mxu0 }
0x1329   : > { %v2108_v17 = vadd.f32 %v2107_v43, %v6285_v42  ;;  %v2109_v35 = vpop.f32.mrb[41].mxu0 }
0x132a   : > { %v2110_v45 = vadd.f32 %v2109_v35, %v6288_v46  ;;  %v2111_v56 = vpop.f32.mrb[42].mxu0 }
0x132b   : > { %v2114_v25 = vmul.f32 0.1, %v2108_v17  ;;  %v2112_v58 = vpop.f32.mrb[43].mxu0 }
0x132c   : > { %v2115_v49 = vmul.f32 0.1, %v2110_v45 }
0x132d   : > { %v7275_v47 = vadd.f32 %v2114_v25, %v7117_v39 }
0x132e   : > { %v7278_v62 = vadd.f32 %v2115_v49, %v7120_v41 }
0x132f   : > { %8771 = vst [vmem:[#allocation83_spill] sm:$0xff] %v7275_v47  ;;  %v2118_v23 = vpack.c.bf16 %v7275_v47, %v7275_v47 }
0x1330   : > { %8772 = vst [vmem:[#allocation84_spill] sm:$0xff] %v7278_v62  ;;  %v2119_v20 = vpack.c.bf16 %v7278_v62, %v7278_v62 }
0x1332   : > { %2152 = vmatprep.mubr.bf16.mxu1 %v2119_v20 }
0x1333   : > { %2153 = vmatmul.mubr.bf16.vlgmr.msra.gmra.mrb[40].mxu1 %v2118_v23 }
0x1334   : > { %2211 = vmatpush1.bf16.msra.mxu1 %v6766_v34  ;;  %v8773_v34 = vld [vmem:[#allocation28_spill] sm:$0xff] }
0x1335   : > { %2212 = vmatprep.subr.bf16.mxu1 %v6769_v10  ;;  %v8774_v10 = vld [vmem:[#allocation29_spill] sm:$0xff] }
0x1338   : > { %2213 = vmatpush1.bf16.msra.mxu1 %v6772_v27  ;;  %v8775_v27 = vld [vmem:[#allocation30_spill] sm:$0xff] }
0x1339   : > { %2214 = vmatprep.subr.bf16.mxu1 %v8675_v38  ;;  %v8776_v38 = vld [vmem:[#allocation31_spill] sm:$0xff] }
0x133c   : > { %2215 = vmatpush1.bf16.msra.mxu1 %v8676_v44  ;;  %v8777_v44 = vld [vmem:[#allocation32_spill] sm:$0xff] }
0x133d   : > { %2216 = vmatprep.subr.bf16.mxu1 %v8677_v21  ;;  %v8778_v21 = vld [vmem:[#allocation33_spill] sm:$0xff] }
0x1340   : > { %2217 = vmatpush1.bf16.msra.mxu1 %v8678_v22  ;;  %v8779_v22 = vld [vmem:[#allocation34_spill] sm:$0xff] }
0x1341   : > { %2218 = vmatprep.subr.bf16.mxu1 %v8679_v24  ;;  %v8780_v24 = vld [vmem:[#allocation35_spill] sm:$0xff] }
0x1344   : > { %2219 = vmatpush1.bf16.msra.mxu1 %v8680_v32  ;;  %v8781_v32 = vld [vmem:[#allocation36_spill] sm:$0xff] }
0x1345   : > { %2220 = vmatprep.subr.bf16.mxu1 %v8681_v33  ;;  %v8782_v33 = vld [vmem:[#allocation37_spill] sm:$0xff] }
0x1348   : > { %2221 = vmatpush1.bf16.msra.mxu1 %v8682_v11  ;;  %v8783_v11 = vld [vmem:[#allocation25_spill] sm:$0xff] }
0x1349   : > { %2222 = vmatprep.subr.bf16.mxu1 %v8683_v12  ;;  %v8784_v12 = vld [vmem:[#allocation77_spill] sm:$0xff] }
0x134c   : > { %2223 = vmatpush1.bf16.msra.mxu1 %v8684_v13  ;;  %v8785_v13 = vld [vmem:[#allocation78_spill] sm:$0xff] }
0x134d   : > { %2224 = vmatprep.subr.bf16.mxu1 %v8685_v18  ;;  %v8786_v18 = vld [vmem:[#allocation42_spill] sm:$0xff] }
0x1350   : > { %2225 = vmatpush1.bf16.msra.mxu1 %v8773_v34  ;;  %v8787_v34 = vld [vmem:[#allocation47_spill] sm:$0xff] }
0x1351   : > { %2226 = vmatprep.subr.bf16.mxu1 %v8774_v10  ;;  %v8788_v10 = vld [vmem:[#allocation48_spill] sm:$0xff] }
0x1354   : > { %2227 = vmatpush1.bf16.msra.mxu1 %v8775_v27  ;;  %v8789_v27 = vld [vmem:[#allocation49_spill] sm:$0xff] }
0x1355   : > { %2228 = vmatprep.subr.bf16.mxu1 %v8776_v38  ;;  %v8790_v38 = vld [vmem:[#allocation50_spill] sm:$0xff] }
0x1358   : > { %2229 = vmatpush1.bf16.msra.mxu1 %v8777_v44  ;;  %v8791_v44 = vld [vmem:[#allocation51_spill] sm:$0xff] }
0x1359   : > { %2230 = vmatprep.subr.bf16.mxu1 %v8778_v21  ;;  %v8792_v21 = vld [vmem:[#allocation69_spill] sm:$0xff] }
0x135c   : > { %2231 = vmatpush1.bf16.msra.mxu1 %v8779_v22  ;;  %v8793_v22 = vld [vmem:[#allocation70_spill] sm:$0xff] }
0x135d   : > { %2232 = vmatprep.subr.bf16.mxu1 %v8780_v24  ;;  %v8794_v24 = vld [vmem:[#allocation71_spill] sm:$0xff] }
0x1360   : > { %2233 = vmatpush1.bf16.msra.mxu1 %v8781_v32  ;;  %v8795_v32 = vld [vmem:[#allocation23_spill] sm:$0xff] }
0x1361   : > { %2234 = vmatprep.subr.bf16.mxu1 %v8782_v33  ;;  %v8796_v33 = vld [vmem:[#allocation20_spill] sm:$0xff] }
0x1364   : > { %2235 = vmatpush1.bf16.msra.mxu1 %v8783_v11  ;;  %v8797_v11 = vld [vmem:[#allocation72_spill] sm:$0xff] }
0x1365   : > { %2236 = vmatprep.subr.bf16.mxu1 %v8784_v12  ;;  %v8798_v12 = vld [vmem:[#allocation73_spill] sm:$0xff] }
0x1368   : > { %2237 = vmatpush1.bf16.msra.mxu1 %v8785_v13  ;;  %v8799_v13 = vld [vmem:[#allocation74_spill] sm:$0xff] }
0x1369   : > { %2238 = vmatprep.subr.bf16.mxu1 %v8786_v18 }
0x136c   : > { %2239 = vmatpush1.bf16.msra.mxu1 %v8735_v51 }
0x136d   : > { %2240 = vmatprep.subr.bf16.mxu1 %v8736_v53 }
0x1370   : > { %2241 = vmatpush1.bf16.msra.mxu1 %v8737_v59 }
0x1371   : > { %2302 = vmatprep.subr.bf16.mxu1 %v6973_v30 }
0x1406   : > { %v2154_v58 = vpop.f32.mrb[40].mxu1 }
0x1407   : > { %v2155_v25 = vadd.f32 %v2154_v58, %v6184_v15  ;;  %v2156_v17 = vpop.f32.mrb[41].mxu1  ;;  %v8800_v58 = vld [vmem:[#allocation52_spill] sm:$0xff] }
0x1408   : > { %v2157_v45 = vadd.f32 %v2156_v17, %v6187_v54  ;;  %v2158_v49 = vpop.f32.mrb[42].mxu1  ;;  %v8802_v17 = vld [vmem:[#allocation59_spill] sm:$0xff] }
0x1409   : > { %v2161_v56 = vmax.f32 %v2155_v25, 0.0  ;;  %v2159_v35 = vpop.f32.mrb[43].mxu1  ;;  %v8801_v25 = vld [vmem:[#allocation58_spill] sm:$0xff]  ;;  %v8804_v49 = vld [vmem:[#allocation61_spill] sm:$0xff] }
0x140a   : > { %v2162_v43 = vmax.f32 %v2157_v45, 0.0  ;;  %v8803_v45 = vld [vmem:[#allocation60_spill] sm:$0xff]  ;;  %v8806_v35 = vld [vmem:[#allocation63_spill] sm:$0xff] }
0x140b   : > { %v2163_v23 = vpack.c.bf16 %v2161_v56, %v2161_v56  ;;  %v8805_v56 = vld [vmem:[#allocation62_spill] sm:$0xff] }
0x140c   : > { %v2164_v20 = vpack.c.bf16 %v2162_v43, %v2162_v43  ;;  %v8807_v43 = vld [vmem:[#allocation64_spill] sm:$0xff] }
0x140e   : > { %2197 = vmatprep.mubr.bf16.mxu0 %v2164_v20  ;;  %v8808_v20 = vld [vmem:[#allocation68_spill] sm:$0xff] }
0x140f   : > { %2198 = vmatmul.mubr.bf16.vlgmr.msra.gmra.mrb[44].mxu0 %v2163_v23  ;;  %v7349_v23 = vld [vmem:[#allocation8 + $0x4] ss:$8 sps:$4 sm:$0xff]  }
0x1410   : > { %2258 = vmatpush1.bf16.msra.mxu0 %v6978_v16 }
0x1411   : > { %2259 = vmatprep.subr.bf16.mxu0 %v6981_v14 }
0x1414   : > { %2260 = vmatpush1.bf16.msra.mxu0 %v6984_v0 }
0x1415   : > { %2261 = vmatprep.subr.bf16.mxu0 %v6987_v50 }
0x1418   : > { %2262 = vmatpush1.bf16.msra.mxu0 %v6990_v28 }
0x1419   : > { %2263 = vmatprep.subr.bf16.mxu0 %v6993_v48 }
0x141c   : > { %2264 = vmatpush1.bf16.msra.mxu0 %v8738_v57 }
0x141d   : > { %2265 = vmatprep.subr.bf16.mxu0 %v8787_v34 }
0x1420   : > { %2266 = vmatpush1.bf16.msra.mxu0 %v8788_v10 }
0x1421   : > { %2267 = vmatprep.subr.bf16.mxu0 %v8789_v27 }
0x1424   : > { %2268 = vmatpush1.bf16.msra.mxu0 %v8790_v38 }
0x1425   : > { %2269 = vmatprep.subr.bf16.mxu0 %v8791_v44 }
0x1428   : > { %2270 = vmatpush1.bf16.msra.mxu0 %v8792_v21 }
0x1429   : > { %2271 = vmatprep.subr.bf16.mxu0 %v8793_v22 }
0x142c   : > { %2272 = vmatpush1.bf16.msra.mxu0 %v8794_v24 }
0x142d   : > { %2273 = vmatprep.subr.bf16.mxu0 %v8795_v32 }
0x1430   : > { %2274 = vmatpush1.bf16.msra.mxu0 %v8796_v33 }
0x1431   : > { %2275 = vmatprep.subr.bf16.mxu0 %v8797_v11 }
0x1434   : > { %2276 = vmatpush1.bf16.msra.mxu0 %v8798_v12 }
0x1435   : > { %2277 = vmatprep.subr.bf16.mxu0 %v8799_v13 }
0x1438   : > { %2278 = vmatpush1.bf16.msra.mxu0 %v8800_v58 }
0x1439   : > { %2279 = vmatprep.subr.bf16.mxu0 %v8801_v25 }
0x143c   : > { %2280 = vmatpush1.bf16.msra.mxu0 %v8802_v17 }
0x143d   : > { %2281 = vmatprep.subr.bf16.mxu0 %v8803_v45 }
0x1440   : > { %2282 = vmatpush1.bf16.msra.mxu0 %v8804_v49 }
0x1441   : > { %2283 = vmatprep.subr.bf16.mxu0 %v8805_v56 }
0x1444   : > { %2284 = vmatpush1.bf16.msra.mxu0 %v8806_v35 }
0x1445   : > { %2285 = vmatprep.subr.bf16.mxu0 %v8807_v43 }
0x1448   : > { %2286 = vmatpush1.bf16.msra.mxu0 %v8808_v20 }
0x1449   : > { %2287 = vmatprep.subr.bf16.mxu0 %v7205_v37 }
0x144c   : > { %2288 = vmatpush1.bf16.msra.mxu0 %v7208_v8 }
0x144d   : > { %2347 = vmatprep.subr.bf16.mxu0 %v7349_v23 }
0x14e2   : > { %v2199_v39 = vpop.f32.mrb[44].mxu0 }
0x14e3   : > { %v2200_v41 = vadd.f32 %v2199_v39, %v6240_v6  ;;  %v2201_v49 = vpop.f32.mrb[45].mxu0  ;;  %v8809_v39 = vld [vmem:[#allocation26_spill] sm:$0xff] }
0x14e4   : > { %v2202_v56 = vadd.f32 %v2201_v49, %v6243_v7  ;;  %v2203_v45 = vpop.f32.mrb[46].mxu0  ;;  %v8814_v49 = vld [vmem:[#allocation46_spill] sm:$0xff] }
0x14e5   : > { %v2206_v35 = vmax.f32 %v2200_v41, 0.0  ;;  %v2204_v17 = vpop.f32.mrb[47].mxu0  ;;  %v8810_v41 = vld [vmem:[#allocation27_spill] sm:$0xff]  ;;  %v8813_v45 = vld [vmem:[#allocation45_spill] sm:$0xff] }
0x14e6   : > { %v2207_v43 = vmax.f32 %v2202_v56, 0.0  ;;  %v8812_v17 = vld [vmem:[#allocation44_spill] sm:$0xff]  ;;  %v8815_v56 = vld [vmem:[#allocation53_spill] sm:$0xff] }
0x14e7   : > { %v2208_v20 = vpack.c.bf16 %v2206_v35, %v2206_v35  ;;  %v8816_v35 = vld [vmem:[#allocation79_spill] sm:$0xff] }
0x14e8   : > { %v2209_v25 = vpack.c.bf16 %v2207_v43, %v2207_v43  ;;  %v8817_v43 = vld [vmem:[#allocation80_spill] sm:$0xff] }
0x14ea   : > { %2242 = vmatprep.mubr.bf16.mxu1 %v2209_v25  ;;  %v8811_v25 = vld [vmem:[#allocation43_spill] sm:$0xff] }
0x14eb   : > { %2243 = vmatmul.mubr.bf16.vlgmr.msra.gmra.mrb[44].mxu1 %v2208_v20  ;;  %v8818_v20 = vld [vmem:[#allocation81_spill] sm:$0xff] }
0x14ec   : > { %2303 = vmatpush1.bf16.msra.mxu1 %v7054_v2 }
0x14ed   : > { %2304 = vmatprep.subr.bf16.mxu1 %v7057_v9 }
0x14f0   : > { %2305 = vmatpush1.bf16.msra.mxu1 %v7060_v29 }
0x14f1   : > { %2306 = vmatprep.subr.bf16.mxu1 %v7063_v31 }
0x14f4   : > { %2307 = vmatpush1.bf16.msra.mxu1 %v7066_v55 }
0x14f5   : > { %2308 = vmatprep.subr.bf16.mxu1 %v7069_v52 }
0x14f8   : > { %2309 = vmatpush1.bf16.msra.mxu1 %v7072_v63 }
0x14f9   : > { %2310 = vmatprep.subr.bf16.mxu1 %v8758_v36 }
0x14fc   : > { %2311 = vmatpush1.bf16.msra.mxu1 %v7078_v4 }
0x14fd   : > { %2312 = vmatprep.subr.bf16.mxu1 %v7081_v5 }
0x1500   : > { %2313 = vmatpush1.bf16.msra.mxu1 %v7084_v60 }
0x1501   : > { %2314 = vmatprep.subr.bf16.mxu1 %v7087_v61 }
0x1504   : > { %2315 = vmatpush1.bf16.msra.mxu1 %v7090_v1 }
0x1505   : > { %2316 = vmatprep.subr.bf16.mxu1 %v7093_v3 }
0x1508   : > { %2317 = vmatpush1.bf16.msra.mxu1 %v7228_v19 }
0x1509   : > { %2318 = vmatprep.subr.bf16.mxu1 %v7231_v26  ;;  %v8819_v26 = vld [vmem:[#allocation82_spill] sm:$0xff] }
0x150c   : > { %2319 = vmatpush1.bf16.msra.mxu1 %v8809_v39  ;;  %v7381_v39 = vld [vmem:[#allocation7 + $0xe4] ss:$8 sps:$4 sm:$0xff]  }
0x150d   : > { %2320 = vmatprep.subr.bf16.mxu1 %v8810_v41  ;;  %8820 = vst [vmem:[#allocation28_spill] sm:$0xff] %v7381_v39 }
0x1510   : > { %2321 = vmatpush1.bf16.msra.mxu1 %v8811_v25  ;;  %v7384_v25 = vld [vmem:[#allocation7 + $0xe0] ss:$8 sps:$4 sm:$0xff]  }
0x1511   : > { %2322 = vmatprep.subr.bf16.mxu1 %v8812_v17  ;;  %8821 = vst [vmem:[#allocation29_spill] sm:$0xff] %v7384_v25 }
0x1514   : > { %2323 = vmatpush1.bf16.msra.mxu1 %v8813_v45  ;;  %v7387_v45 = vld [vmem:[#allocation7 + $0xf4] ss:$8 sps:$4 sm:$0xff]  }
0x1515   : > { %2324 = vmatprep.subr.bf16.mxu1 %v8814_v49  ;;  %8822 = vst [vmem:[#allocation30_spill] sm:$0xff] %v7387_v45 }
0x1518   : > { %2325 = vmatpush1.bf16.msra.mxu1 %v8815_v56  ;;  %v7390_v56 = vld [vmem:[#allocation7 + $0xf0] ss:$8 sps:$4 sm:$0xff]  }
0x1519   : > { %2326 = vmatprep.subr.bf16.mxu1 %v8816_v35  ;;  %8823 = vst [vmem:[#allocation31_spill] sm:$0xff] %v7390_v56 }
0x151c   : > { %2327 = vmatpush1.bf16.msra.mxu1 %v8817_v43 }
0x151d   : > { %2328 = vmatprep.subr.bf16.mxu1 %v8818_v20 }
0x1520   : > { %2329 = vmatpush1.bf16.msra.mxu1 %v8819_v26 }
0x1521   : > { %2330 = vmatprep.subr.bf16.mxu1 %v7381_v39 }
0x1524   : > { %2331 = vmatpush1.bf16.msra.mxu1 %v7384_v25 }
0x1525   : > { %2332 = vmatprep.subr.bf16.mxu1 %v7387_v45 }
0x1528   : > { %2333 = vmatpush1.bf16.msra.mxu1 %v7390_v56 }
0x1529   : > { %2394 = vmatprep.subr.bf16.mxu1 %v6919_v40 }
0x15be   : > { %v2244_v20 = vpop.f32.mrb[44].mxu1 }
0x15bf   : > { %v2245_v26 = vadd.f32 %v2244_v20, %v6285_v42  ;;  %v2246_v43 = vpop.f32.mrb[45].mxu1  ;;  %v7406_v20 = vld [vmem:[#allocation8] ss:$8 sps:$4 sm:$0xff]  }
0x15c0   : > { %v2247_v39 = vadd.f32 %v2246_v43, %v6288_v46  ;;  %v2248_v35 = vpop.f32.mrb[46].mxu1  ;;  %v7430_v43 = vld [vmem:[#allocation8 + $0x40] ss:$8 sps:$4 sm:$0xff]  }
0x15c1   : > { %v2251_v49 = vmul.f32 0.1, %v2245_v26  ;;  %v2249_v17 = vpop.f32.mrb[47].mxu1  ;;  %v7409_v26 = vld [vmem:[#allocation8 + $0x14] ss:$8 sps:$4 sm:$0xff]   ;;  %8829 = vst [vmem:[#allocation37_spill] sm:$0xff] %v7430_v43 }
0x15c2   : > { %v2252_v25 = vmul.f32 0.1, %v2247_v39  ;;  %v7412_v39 = vld [vmem:[#allocation8 + $0x10] ss:$8 sps:$4 sm:$0xff]   ;;  %v7418_v17 = vld [vmem:[#allocation8 + $0x20] ss:$8 sps:$4 sm:$0xff]  }
0x15c3   : > { %v7397_v41 = vadd.f32 %v2251_v49, %v7275_v47  ;;  %8825 = vst [vmem:[#allocation33_spill] sm:$0xff] %v7418_v17  ;;  %v7421_v49 = vld [vmem:[#allocation8 + $0x34] ss:$8 sps:$4 sm:$0xff]   ;;  %v7427_v35 = vld [vmem:[#allocation8 + $0x44] ss:$8 sps:$4 sm:$0xff]  }
0x15c4   : > { %v7400_v45 = vadd.f32 %v2252_v25, %v7278_v62  ;;  %v7415_v25 = vld [vmem:[#allocation8 + $0x24] ss:$8 sps:$4 sm:$0xff]   ;;  %8826 = vst [vmem:[#allocation34_spill] sm:$0xff] %v7421_v49  ;;  %8828 = vst [vmem:[#allocation36_spill] sm:$0xff] %v7427_v35  ;;  %v7436_v47 = vld [vmem:[#allocation8 + $0x50] ss:$8 sps:$4 sm:$0xff]  }
0x15c5   : > { %v2255_v40 = vpack.c.bf16 %v7397_v41, %v7397_v41  ;;  %8824 = vst [vmem:[#allocation32_spill] sm:$0xff] %v7415_v25  ;;  %8831 = vst [vmem:[#allocation77_spill] sm:$0xff] %v7436_v47  ;;  %v7439_v62 = vld [vmem:[#allocation8 + $0x64] ss:$8 sps:$4 sm:$0xff]  }
0x15c6   : > { %v2256_v56 = vpack.c.bf16 %v7400_v45, %v7400_v45  ;;  %8832 = vst [vmem:[#allocation78_spill] sm:$0xff] %v7439_v62 }
0x15c8   : > { %2289 = vmatprep.mubr.bf16.mxu0 %v2256_v56  ;;  %v7424_v56 = vld [vmem:[#allocation8 + $0x30] ss:$8 sps:$4 sm:$0xff]  }
0x15c9   : > { %2290 = vmatmul.mubr.bf16.vlgmr.msra.gmra.mrb[48].mxu0 %v2255_v40  ;;  %8827 = vst [vmem:[#allocation35_spill] sm:$0xff] %v7424_v56  ;;  %v7433_v40 = vld [vmem:[#allocation8 + $0x54] ss:$8 sps:$4 sm:$0xff]  }
0x15ca   : > { %2348 = vmatpush1.bf16.msra.mxu0 %v7406_v20  ;;  %8830 = vst [vmem:[#allocation25_spill] sm:$0xff] %v7433_v40 }
0x15cb   : > { %2349 = vmatprep.subr.bf16.mxu0 %v7409_v26 }
0x15ce   : > { %2350 = vmatpush1.bf16.msra.mxu0 %v7412_v39 }
0x15cf   : > { %2351 = vmatprep.subr.bf16.mxu0 %v7415_v25 }
0x15d2   : > { %2352 = vmatpush1.bf16.msra.mxu0 %v7418_v17 }
0x15d3   : > { %2353 = vmatprep.subr.bf16.mxu0 %v7421_v49 }
0x15d6   : > { %2354 = vmatpush1.bf16.msra.mxu0 %v7424_v56  ;;  %v7442_v56 = vld [vmem:[#allocation8 + $0x60] ss:$8 sps:$4 sm:$0xff]  }
0x15d7   : > { %2355 = vmatprep.subr.bf16.mxu0 %v7427_v35  ;;  %8833 = vst [vmem:[#allocation42_spill] sm:$0xff] %v7442_v56  ;;  %v7445_v35 = vld [vmem:[#allocation8 + $0x74] ss:$8 sps:$4 sm:$0xff]  }
0x15d8   : > { %8834 = vst [vmem:[#allocation47_spill] sm:$0xff] %v7445_v35 }
0x15da   : > { %2356 = vmatpush1.bf16.msra.mxu0 %v7430_v43  ;;  %v7448_v43 = vld [vmem:[#allocation8 + $0x70] ss:$8 sps:$4 sm:$0xff]  }
0x15db   : > { %2357 = vmatprep.subr.bf16.mxu0 %v7433_v40  ;;  %8835 = vst [vmem:[#allocation48_spill] sm:$0xff] %v7448_v43  ;;  %v7451_v40 = vld [vmem:[#allocation8 + $0x84] ss:$8 sps:$4 sm:$0xff]  }
0x15dc   : > { %8836 = vst [vmem:[#allocation49_spill] sm:$0xff] %v7451_v40 }
0x15de   : > { %2358 = vmatpush1.bf16.msra.mxu0 %v7436_v47  ;;  %v7454_v47 = vld [vmem:[#allocation8 + $0x80] ss:$8 sps:$4 sm:$0xff]  }
0x15df   : > { %2359 = vmatprep.subr.bf16.mxu0 %v7439_v62  ;;  %8837 = vst [vmem:[#allocation50_spill] sm:$0xff] %v7454_v47  ;;  %v7457_v62 = vld [vmem:[#allocation8 + $0x94] ss:$8 sps:$4 sm:$0xff]  }
0x15e0   : > { %8838 = vst [vmem:[#allocation51_spill] sm:$0xff] %v7457_v62 }
0x15e2   : > { %2360 = vmatpush1.bf16.msra.mxu0 %v7442_v56  ;;  %v7460_v56 = vld [vmem:[#allocation8 + $0x90] ss:$8 sps:$4 sm:$0xff]  }
0x15e3   : > { %2361 = vmatprep.subr.bf16.mxu0 %v7445_v35  ;;  %8839 = vst [vmem:[#allocation69_spill] sm:$0xff] %v7460_v56  ;;  %v7463_v35 = vld [vmem:[#allocation8 + $0xa4] ss:$8 sps:$4 sm:$0xff]  }
0x15e4   : > { %8840 = vst [vmem:[#allocation70_spill] sm:$0xff] %v7463_v35 }
0x15e6   : > { %2362 = vmatpush1.bf16.msra.mxu0 %v7448_v43  ;;  %v7466_v43 = vld [vmem:[#allocation8 + $0xa0] ss:$8 sps:$4 sm:$0xff]  }
0x15e7   : > { %2363 = vmatprep.subr.bf16.mxu0 %v7451_v40  ;;  %8841 = vst [vmem:[#allocation71_spill] sm:$0xff] %v7466_v43  ;;  %v7469_v40 = vld [vmem:[#allocation8 + $0xb4] ss:$8 sps:$4 sm:$0xff]  }
0x15e8   : > { %8842 = vst [vmem:[#allocation23_spill] sm:$0xff] %v7469_v40 }
0x15ea   : > { %2364 = vmatpush1.bf16.msra.mxu0 %v7454_v47  ;;  %v7472_v47 = vld [vmem:[#allocation8 + $0xb0] ss:$8 sps:$4 sm:$0xff]  }
0x15eb   : > { %2365 = vmatprep.subr.bf16.mxu0 %v7457_v62  ;;  %8843 = vst [vmem:[#allocation20_spill] sm:$0xff] %v7472_v47  ;;  %v7475_v62 = vld [vmem:[#allocation8 + $0xc4] ss:$8 sps:$4 sm:$0xff]  }
0x15ec   : > { %8844 = vst [vmem:[#allocation72_spill] sm:$0xff] %v7475_v62 }
0x15ee   : > { %2366 = vmatpush1.bf16.msra.mxu0 %v7460_v56  ;;  %v7478_v56 = vld [vmem:[#allocation8 + $0xc0] ss:$8 sps:$4 sm:$0xff]  }
0x15ef   : > { %2367 = vmatprep.subr.bf16.mxu0 %v7463_v35  ;;  %8845 = vst [vmem:[#allocation73_spill] sm:$0xff] %v7478_v56  ;;  %v7481_v35 = vld [vmem:[#allocation8 + $0xd4] ss:$8 sps:$4 sm:$0xff]  }
0x15f0   : > { %8846 = vst [vmem:[#allocation74_spill] sm:$0xff] %v7481_v35 }
0x15f2   : > { %2368 = vmatpush1.bf16.msra.mxu0 %v7466_v43  ;;  %v7484_v43 = vld [vmem:[#allocation8 + $0xd0] ss:$8 sps:$4 sm:$0xff]  }
0x15f3   : > { %2369 = vmatprep.subr.bf16.mxu0 %v7469_v40  ;;  %8847 = vst [vmem:[#allocation52_spill] sm:$0xff] %v7484_v43 }
0x15f6   : > { %2370 = vmatpush1.bf16.msra.mxu0 %v7472_v47 }
0x15f7   : > { %2371 = vmatprep.subr.bf16.mxu0 %v7475_v62 }
0x15fa   : > { %2372 = vmatpush1.bf16.msra.mxu0 %v7478_v56 }
0x15fb   : > { %2373 = vmatprep.subr.bf16.mxu0 %v7481_v35 }
0x15fe   : > { %2374 = vmatpush1.bf16.msra.mxu0 %v7484_v43 }
0x15ff   : > { %2375 = vmatprep.subr.bf16.mxu0 %v8786_v18 }
0x1602   : > { %2376 = vmatpush1.bf16.msra.mxu0 %v8735_v51  ;;  %v8855_v51 = vld [vmem:[#allocation68_spill] sm:$0xff] }
0x1603   : > { %2377 = vmatprep.subr.bf16.mxu0 %v8736_v53 }
0x1606   : > { %2378 = vmatpush1.bf16.msra.mxu0 %v8737_v59 }
0x1607   : > { %2439 = vmatprep.subr.bf16.mxu0 %v6973_v30  ;;  %v8850_v30 = vld [vmem:[#allocation60_spill] sm:$0xff] }
0x169c   : > { %v2291_v62 = vpop.f32.mrb[48].mxu0 }
0x169d   : > { %v2292_v56 = vadd.f32 %v2291_v62, %v6184_v15  ;;  %v2293_v47 = vpop.f32.mrb[49].mxu0 }
0x169e   : > { %v2294_v35 = vadd.f32 %v2293_v47, %v6187_v54  ;;  %v2295_v40 = vpop.f32.mrb[50].mxu0 }
0x169f   : > { %v2298_v49 = vmax.f32 %v2292_v56, 0.0  ;;  %v2296_v17 = vpop.f32.mrb[51].mxu0  ;;  %v8874_v56 = vld [vmem:[#allocation34_spill] sm:$0xff]  ;;  %v8877_v40 = vld [vmem:[#allocation37_spill] sm:$0xff] }
0x16a0   : > { %v2299_v43 = vmax.f32 %v2294_v35, 0.0  ;;  %v8872_v17 = vld [vmem:[#allocation32_spill] sm:$0xff]  ;;  %v8875_v35 = vld [vmem:[#allocation35_spill] sm:$0xff] }
0x16a1   : > { %v2300_v18 = vpack.c.bf16 %v2298_v49, %v2298_v49  ;;  %v8873_v49 = vld [vmem:[#allocation33_spill] sm:$0xff] }
0x16a2   : > { %v2301_v25 = vpack.c.bf16 %v2299_v43, %v2299_v43  ;;  %v8876_v43 = vld [vmem:[#allocation36_spill] sm:$0xff] }
0x16a4   : > { %2334 = vmatprep.mubr.bf16.mxu1 %v2301_v25 }
0x16a5   : > { %2335 = vmatmul.mubr.bf16.vlgmr.msra.gmra.mrb[48].mxu1 %v2300_v18  ;;  %v8878_v18 = vld [vmem:[#allocation25_spill] sm:$0xff] }
0x16a6   : > { %2395 = vmatpush1.bf16.msra.mxu1 %v6978_v16  ;;  %v8848_v16 = vld [vmem:[#allocation58_spill] sm:$0xff] }
0x16a7   : > { %2396 = vmatprep.subr.bf16.mxu1 %v6981_v14  ;;  %v8849_v14 = vld [vmem:[#allocation59_spill] sm:$0xff] }
0x16aa   : > { %2397 = vmatpush1.bf16.msra.mxu1 %v6984_v0  ;;  %v8851_v0 = vld [vmem:[#allocation61_spill] sm:$0xff] }
0x16ab   : > { %2398 = vmatprep.subr.bf16.mxu1 %v6987_v50  ;;  %v8852_v50 = vld [vmem:[#allocation62_spill] sm:$0xff] }
0x16ae   : > { %2399 = vmatpush1.bf16.msra.mxu1 %v6990_v28  ;;  %v8853_v28 = vld [vmem:[#allocation63_spill] sm:$0xff] }
0x16af   : > { %2400 = vmatprep.subr.bf16.mxu1 %v6993_v48  ;;  %v8854_v48 = vld [vmem:[#allocation64_spill] sm:$0xff] }
0x16b2   : > { %2401 = vmatpush1.bf16.msra.mxu1 %v8738_v57 }
0x16b3   : > { %2402 = vmatprep.subr.bf16.mxu1 %v8787_v34 }
0x16b6   : > { %2403 = vmatpush1.bf16.msra.mxu1 %v8788_v10 }
0x16b7   : > { %2404 = vmatprep.subr.bf16.mxu1 %v8789_v27 }
0x16ba   : > { %2405 = vmatpush1.bf16.msra.mxu1 %v8790_v38 }
0x16bb   : > { %2406 = vmatprep.subr.bf16.mxu1 %v8791_v44 }
0x16be   : > { %2407 = vmatpush1.bf16.msra.mxu1 %v8792_v21 }
0x16bf   : > { %2408 = vmatprep.subr.bf16.mxu1 %v8793_v22 }
0x16c2   : > { %2409 = vmatpush1.bf16.msra.mxu1 %v8794_v24 }
0x16c3   : > { %2410 = vmatprep.subr.bf16.mxu1 %v8795_v32 }
0x16c6   : > { %2411 = vmatpush1.bf16.msra.mxu1 %v8796_v33 }
0x16c7   : > { %2412 = vmatprep.subr.bf16.mxu1 %v8797_v11 }
0x16ca   : > { %2413 = vmatpush1.bf16.msra.mxu1 %v8798_v12 }
0x16cb   : > { %2414 = vmatprep.subr.bf16.mxu1 %v8799_v13 }
0x16ce   : > { %2415 = vmatpush1.bf16.msra.mxu1 %v8800_v58 }
0x16cf   : > { %2416 = vmatprep.subr.bf16.mxu1 %v8848_v16  ;;  %v8879_v16 = vld [vmem:[#allocation77_spill] sm:$0xff] }
0x16d2   : > { %2417 = vmatpush1.bf16.msra.mxu1 %v8849_v14  ;;  %v8883_v14 = vld [vmem:[#allocation48_spill] sm:$0xff] }
0x16d3   : > { %2418 = vmatprep.subr.bf16.mxu1 %v8850_v30  ;;  %v8884_v30 = vld [vmem:[#allocation49_spill] sm:$0xff] }
0x16d6   : > { %2419 = vmatpush1.bf16.msra.mxu1 %v8851_v0  ;;  %v8885_v0 = vld [vmem:[#allocation50_spill] sm:$0xff] }
0x16d7   : > { %2420 = vmatprep.subr.bf16.mxu1 %v8852_v50  ;;  %v8886_v50 = vld [vmem:[#allocation51_spill] sm:$0xff] }
0x16da   : > { %2421 = vmatpush1.bf16.msra.mxu1 %v8853_v28  ;;  %v8887_v28 = vld [vmem:[#allocation69_spill] sm:$0xff] }
0x16db   : > { %2422 = vmatprep.subr.bf16.mxu1 %v8854_v48  ;;  %v8888_v48 = vld [vmem:[#allocation70_spill] sm:$0xff] }
0x16de   : > { %2423 = vmatpush1.bf16.msra.mxu1 %v8855_v51  ;;  %v8889_v51 = vld [vmem:[#allocation71_spill] sm:$0xff] }
0x16df   : > { %2424 = vmatprep.subr.bf16.mxu1 %v7205_v37  ;;  %v8870_v37 = vld [vmem:[#allocation30_spill] sm:$0xff] }
0x16e2   : > { %2425 = vmatpush1.bf16.msra.mxu1 %v7208_v8  ;;  %v8856_v8 = vld [vmem:[#allocation24_spill] sm:$0xff] }
0x16e3   : > { %2484 = vmatprep.subr.bf16.mxu1 %v7349_v23 }
0x1778   : > { %v2336_v53 = vpop.f32.mrb[48].mxu1 }
0x1779   : > { %v2337_v59 = vadd.f32 %v2336_v53, %v6240_v6  ;;  %v2338_v57 = vpop.f32.mrb[49].mxu1  ;;  %v8890_v53 = vld [vmem:[#allocation23_spill] sm:$0xff] }
0x177a   : > { %v2339_v47 = vadd.f32 %v2338_v57, %v6243_v7  ;;  %v2340_v62 = vpop.f32.mrb[50].mxu1  ;;  %v8892_v57 = vld [vmem:[#allocation72_spill] sm:$0xff] }
0x177b   : > { %v2343_v34 = vmax.f32 %v2337_v59, 0.0  ;;  %v2341_v10 = vpop.f32.mrb[51].mxu1  ;;  %v8891_v59 = vld [vmem:[#allocation20_spill] sm:$0xff]  ;;  %v8894_v62 = vld [vmem:[#allocation74_spill] sm:$0xff] }
0x177c   : > { %v2344_v27 = vmax.f32 %v2339_v47, 0.0  ;;  %v8893_v47 = vld [vmem:[#allocation73_spill] sm:$0xff]  ;;  %v5229_v10 = vld [vmem:[#allocation8 + $0xe4] ss:$8 sps:$4 sm:$0xff]  }
0x177d   : > { %v2345_v44 = vpack.c.bf16 %v2343_v34, %v2343_v34  ;;  %v8895_v34 = vld [vmem:[#allocation52_spill] sm:$0xff] }
0x177e   : > { %v2346_v38 = vpack.c.bf16 %v2344_v27, %v2344_v27  ;;  %v5230_v27 = vld [vmem:[#allocation8 + $0xe0] ss:$8 sps:$4 sm:$0xff]  }
0x1780   : > { %2379 = vmatprep.mubr.bf16.mxu0 %v2346_v38  ;;  %v5231_v38 = vld [vmem:[#allocation8 + $0xf4] ss:$8 sps:$4 sm:$0xff]  }
0x1781   : > { %2380 = vmatmul.mubr.bf16.vlgmr.msra.gmra.mrb[52].mxu0 %v2345_v44  ;;  %v5232_v44 = vld [vmem:[#allocation8 + $0xf0] ss:$8 sps:$4 sm:$0xff]  }
0x1782   : > { %2440 = vmatpush1.bf16.msra.mxu0 %v7054_v2  ;;  %v8857_v2 = vld [vmem:[#allocation26_spill] sm:$0xff] }
0x1783   : > { %2441 = vmatprep.subr.bf16.mxu0 %v7057_v9  ;;  %v8858_v9 = vld [vmem:[#allocation27_spill] sm:$0xff] }
0x1786   : > { %2442 = vmatpush1.bf16.msra.mxu0 %v7060_v29  ;;  %v8859_v29 = vld [vmem:[#allocation43_spill] sm:$0xff] }
0x1787   : > { %2443 = vmatprep.subr.bf16.mxu0 %v7063_v31  ;;  %v8860_v31 = vld [vmem:[#allocation44_spill] sm:$0xff] }
0x178a   : > { %2444 = vmatpush1.bf16.msra.mxu0 %v7066_v55  ;;  %v8861_v55 = vld [vmem:[#allocation45_spill] sm:$0xff] }
0x178b   : > { %2445 = vmatprep.subr.bf16.mxu0 %v7069_v52  ;;  %v8862_v52 = vld [vmem:[#allocation46_spill] sm:$0xff] }
0x178e   : > { %2446 = vmatpush1.bf16.msra.mxu0 %v7072_v63  ;;  %v8863_v63 = vld [vmem:[#allocation53_spill] sm:$0xff] }
0x178f   : > { %2447 = vmatprep.subr.bf16.mxu0 %v8758_v36  ;;  %v8871_v36 = vld [vmem:[#allocation31_spill] sm:$0xff] }
0x1792   : > { %2448 = vmatpush1.bf16.msra.mxu0 %v7078_v4  ;;  %v8864_v4 = vld [vmem:[#allocation79_spill] sm:$0xff] }
0x1793   : > { %2449 = vmatprep.subr.bf16.mxu0 %v7081_v5  ;;  %v8866_v5 = vld [vmem:[#allocation81_spill] sm:$0xff] }
0x1796   : > { %2450 = vmatpush1.bf16.msra.mxu0 %v7084_v60  ;;  %v8867_v60 = vld [vmem:[#allocation82_spill] sm:$0xff] }
0x1797   : > { %2451 = vmatprep.subr.bf16.mxu0 %v7087_v61  ;;  %v8868_v61 = vld [vmem:[#allocation28_spill] sm:$0xff] }
0x179a   : > { %2452 = vmatpush1.bf16.msra.mxu0 %v7090_v1  ;;  %v8869_v1 = vld [vmem:[#allocation29_spill] sm:$0xff] }
0x179b   : > { %2453 = vmatprep.subr.bf16.mxu0 %v7093_v3  ;;  %v8865_v3 = vld [vmem:[#allocation80_spill] sm:$0xff] }
0x179e   : > { %2454 = vmatpush1.bf16.msra.mxu0 %v7228_v19 }
0x179f   : > { %2455 = vmatprep.subr.bf16.mxu0 %v8856_v8  ;;  %v4835_v8 = vld [vmem:[#allocation10 + $0x4] ss:$16 sps:$4 sm:$0xff]  }
0x17a2   : > { %2456 = vmatpush1.bf16.msra.mxu0 %v8857_v2 }
0x17a3   : > { %2457 = vmatprep.subr.bf16.mxu0 %v8858_v9 }
0x17a6   : > { %2458 = vmatpush1.bf16.msra.mxu0 %v8859_v29 }
0x17a7   : > { %2459 = vmatprep.subr.bf16.mxu0 %v8860_v31 }
0x17aa   : > { %2460 = vmatpush1.bf16.msra.mxu0 %v8861_v55 }
0x17ab   : > { %2461 = vmatprep.subr.bf16.mxu0 %v8862_v52 }
0x17ae   : > { %2462 = vmatpush1.bf16.msra.mxu0 %v8863_v63 }
0x17af   : > { %2463 = vmatprep.subr.bf16.mxu0 %v8864_v4 }
0x17b2   : > { %2464 = vmatpush1.bf16.msra.mxu0 %v8865_v3 }
0x17b3   : > { %2465 = vmatprep.subr.bf16.mxu0 %v8866_v5  ;;  %v4833_v5 = vld [vmem:[#allocation10] ss:$16 sps:$4 sm:$0xff]  }
0x17b6   : > { %2466 = vmatpush1.bf16.msra.mxu0 %v8867_v60 }
0x17b7   : > { %2467 = vmatprep.subr.bf16.mxu0 %v8868_v61  ;;  %v4838_v61 = vld [vmem:[#allocation10 + $0x24] ss:$16 sps:$4 sm:$0xff]  }
0x17ba   : > { %2468 = vmatpush1.bf16.msra.mxu0 %v8869_v1  ;;  %v5233_v1 = vld [vmem:[%s5867_s30 + $0x8] sm:$0xff] }
0x17bb   : > { %2469 = vmatprep.subr.bf16.mxu0 %v8870_v37  ;;  %v8896_v37 = vld [vmem:[#allocation22_spill] sm:$0xff] }
0x17be   : > { %2470 = vmatpush1.bf16.msra.mxu0 %v8871_v36  ;;  %v7602_v36 = vpack.c.bf16 %v8896_v37, %v5233_v1  ;;  %v4929_v1 = vld [vmem:[#allocation11] ss:$8 sps:$4 sm:$0xff]   ;;  %v4931_v37 = vld [vmem:[#allocation11 + $0x4] ss:$8 sps:$4 sm:$0xff]  }
0x17bf   : > { %2947 = vmatprep.subr.bf16.mxu0 %v4835_v8 }
0x1854   : > { %v2381_v19 = vpop.f32.mrb[52].mxu0 }
0x1855   : > { %v2382_v21 = vadd.f32 %v2381_v19, %v6285_v42  ;;  %v2383_v22 = vpop.f32.mrb[53].mxu0  ;;  %v4839_v19 = vld [vmem:[#allocation10 + $0x40] ss:$16 sps:$4 sm:$0xff]  }
0x1856   : > { %v2384_v24 = vadd.f32 %v2383_v22, %v6288_v46  ;;  %v2385_v32 = vpop.f32.mrb[54].mxu0  ;;  %v4842_v22 = vld [vmem:[#allocation10 + $0x60] ss:$16 sps:$4 sm:$0xff]  }
0x1857   : > { %v2388_v33 = vmul.f32 0.1, %v2382_v21  ;;  %v2386_v11 = vpop.f32.mrb[55].mxu0  ;;  %v4844_v21 = vld [vmem:[#allocation10 + $0x64] ss:$16 sps:$4 sm:$0xff]  }
0x1858   : > { %v2389_v12 = vmul.f32 0.1, %v2384_v24  ;;  %v4847_v24 = vld [vmem:[#allocation10 + $0x84] ss:$16 sps:$4 sm:$0xff]   ;;  %v4845_v32 = vld [vmem:[#allocation10 + $0x80] ss:$16 sps:$4 sm:$0xff]  }
0x1859   : > { %v7562_v13 = vadd.f32 %v2388_v33, %v7397_v41  ;;  %v4850_v33 = vld [vmem:[#allocation10 + $0xa4] ss:$16 sps:$4 sm:$0xff]   ;;  %v4848_v11 = vld [vmem:[#allocation10 + $0xa0] ss:$16 sps:$4 sm:$0xff]  }
0x185a   : > { %v7565_v58 = vadd.f32 %v2389_v12, %v7400_v45  ;;  %v4853_v12 = vld [vmem:[#allocation10 + $0xc4] ss:$16 sps:$4 sm:$0xff]  }
0x185b   : > { %v2392_v25 = vpack.c.bf16 %v7562_v13, %v7562_v13 }
0x185c   : > { %v2393_v23 = vpack.c.bf16 %v7565_v58, %v7565_v58 }
0x185e   : > { %2426 = vmatprep.mubr.bf16.mxu1 %v2393_v23  ;;  %v4851_v23 = vld [vmem:[#allocation10 + $0xc0] ss:$16 sps:$4 sm:$0xff]  }
0x185f   : > { %2427 = vmatmul.mubr.bf16.vlgmr.msra.gmra.mrb[52].mxu1 %v2392_v25  ;;  %v4856_v25 = vld [vmem:[#allocation10 + $0xe4] ss:$16 sps:$4 sm:$0xff]  }
0x1860   : > { %2485 = vmatpush1.bf16.msra.mxu1 %v7406_v20  ;;  %v8880_v20 = vld [vmem:[#allocation78_spill] sm:$0xff] }
0x1861   : > { %2486 = vmatprep.subr.bf16.mxu1 %v7409_v26  ;;  %v8881_v26 = vld [vmem:[#allocation42_spill] sm:$0xff] }
0x1864   : > { %2487 = vmatpush1.bf16.msra.mxu1 %v7412_v39  ;;  %v8882_v39 = vld [vmem:[#allocation47_spill] sm:$0xff] }
0x1865   : > { %2488 = vmatprep.subr.bf16.mxu1 %v8872_v17  ;;  %v4854_v17 = vld [vmem:[#allocation10 + $0xe0] ss:$16 sps:$4 sm:$0xff]  }
0x1868   : > { %2489 = vmatpush1.bf16.msra.mxu1 %v8873_v49  ;;  %v4859_v49 = vld [vmem:[#allocation10 + $0x104] ss:$16 sps:$4 sm:$0xff]  }
0x1869   : > { %2490 = vmatprep.subr.bf16.mxu1 %v8874_v56  ;;  %v4857_v56 = vld [vmem:[#allocation10 + $0x100] ss:$16 sps:$4 sm:$0xff]  }
0x186c   : > { %2491 = vmatpush1.bf16.msra.mxu1 %v8875_v35  ;;  %v4862_v35 = vld [vmem:[#allocation10 + $0x124] ss:$16 sps:$4 sm:$0xff]  }
0x186d   : > { %2492 = vmatprep.subr.bf16.mxu1 %v8876_v43  ;;  %v4860_v43 = vld [vmem:[#allocation10 + $0x120] ss:$16 sps:$4 sm:$0xff]  }
0x1870   : > { %2493 = vmatpush1.bf16.msra.mxu1 %v8877_v40  ;;  %v4865_v40 = vld [vmem:[#allocation10 + $0x144] ss:$16 sps:$4 sm:$0xff]  }
0x1871   : > { %2494 = vmatprep.subr.bf16.mxu1 %v8878_v18  ;;  %v4863_v18 = vld [vmem:[#allocation10 + $0x140] ss:$16 sps:$4 sm:$0xff]  }
0x1874   : > { %2495 = vmatpush1.bf16.msra.mxu1 %v8879_v16  ;;  %v4868_v16 = vld [vmem:[#allocation10 + $0x164] ss:$16 sps:$4 sm:$0xff]  }
0x1875   : > { %2496 = vmatprep.subr.bf16.mxu1 %v8880_v20  ;;  %v4866_v20 = vld [vmem:[#allocation10 + $0x160] ss:$16 sps:$4 sm:$0xff]  }
0x1878   : > { %2497 = vmatpush1.bf16.msra.mxu1 %v8881_v26  ;;  %v4871_v26 = vld [vmem:[#allocation10 + $0x184] ss:$16 sps:$4 sm:$0xff]  }
0x1879   : > { %2498 = vmatprep.subr.bf16.mxu1 %v8882_v39  ;;  %v4869_v39 = vld [vmem:[#allocation10 + $0x180] ss:$16 sps:$4 sm:$0xff]  }
0x187c   : > { %2499 = vmatpush1.bf16.msra.mxu1 %v8883_v14  ;;  %v4874_v14 = vld [vmem:[#allocation10 + $0x1a4] ss:$16 sps:$4 sm:$0xff]  }
0x187d   : > { %2500 = vmatprep.subr.bf16.mxu1 %v8884_v30  ;;  %v4872_v30 = vld [vmem:[#allocation10 + $0x1a0] ss:$16 sps:$4 sm:$0xff]  }
0x1880   : > { %2501 = vmatpush1.bf16.msra.mxu1 %v8885_v0  ;;  %v4877_v0 = vld [vmem:[#allocation10 + $0x1c4] ss:$16 sps:$4 sm:$0xff]  }
0x1881   : > { %2502 = vmatprep.subr.bf16.mxu1 %v8886_v50  ;;  %v4875_v50 = vld [vmem:[#allocation10 + $0x1c0] ss:$16 sps:$4 sm:$0xff]  }
0x1884   : > { %2503 = vmatpush1.bf16.msra.mxu1 %v8887_v28  ;;  %v4880_v28 = vld [vmem:[#allocation10 + $0x1e4] ss:$16 sps:$4 sm:$0xff]  }
0x1885   : > { %2504 = vmatprep.subr.bf16.mxu1 %v8888_v48  ;;  %v4878_v48 = vld [vmem:[#allocation10 + $0x1e0] ss:$16 sps:$4 sm:$0xff]  }
0x1888   : > { %2505 = vmatpush1.bf16.msra.mxu1 %v8889_v51  ;;  %v5234_v51 = vld [vmem:[%s5867_s30] sm:$0xff]  ;;  %s8914_s30 = sld [smem:[#allocation88_spill]] }
0x1889   : > { %2506 = vmatprep.subr.bf16.mxu1 %v8890_v53  ;;  %v8897_v53 = vld [vmem:[#allocation21_spill] sm:$0xff] }
0x188c   : > { %2507 = vmatpush1.bf16.msra.mxu1 %v8891_v59  ;;  %v7607_v59 = vpack.c.bf16 %v8897_v53, %v5234_v51  ;;  %v4887_v51 = vld [vmem:[#allocation10 + $0x48] ss:$16 sps:$4 sm:$0xff]   ;;  %v4892_v53 = vld [vmem:[#allocation10 + $0x6c] ss:$16 sps:$4 sm:$0xff]  }
0x188d   : > { %2508 = vmatprep.subr.bf16.mxu1 %v8892_v57  ;;  %v8898_v57 = vld [vmem:[#allocation39_spill] sm:$0xff] }
0x1890   : > { %2509 = vmatpush1.bf16.msra.mxu1 %v8893_v47  ;;  %v8899_v47 = vld [vmem:[#allocation76_spill] sm:$0xff] }
0x1891   : > { %2510 = vmatprep.subr.bf16.mxu1 %v8894_v62  ;;  %v7611_v62 = vpack.c.bf16 %v8899_v47, %v8898_v57  ;;  %v4959_v57 = vld [vmem:[#allocation11 + $0xa0] ss:$8 sps:$4 sm:$0xff]   ;;  %v4964_v47 = vld [vmem:[#allocation11 + $0xb4] ss:$8 sps:$4 sm:$0xff]  }
0x1894   : > { %2511 = vmatpush1.bf16.msra.mxu1 %v8895_v34  ;;  %v8900_v34 = vld [vmem:[#allocation38_spill] sm:$0xff] }
0x1895   : > { %2512 = vmatprep.subr.bf16.mxu1 %v5229_v10  ;;  %v8901_v10 = vld [vmem:[#allocation75_spill] sm:$0xff] }
0x1898   : > { %2513 = vmatpush1.bf16.msra.mxu1 %v5230_v27  ;;  %v7617_v27 = vpack.c.bf16 %v8901_v10, %v8900_v34  ;;  %v4890_v34 = vld [vmem:[#allocation10 + $0x68] ss:$16 sps:$4 sm:$0xff]   ;;  %v4895_v10 = vld [vmem:[#allocation10 + $0x8c] ss:$16 sps:$4 sm:$0xff]  }
0x1899   : > { %2514 = vmatprep.subr.bf16.mxu1 %v5231_v38  ;;  %v8902_v38 = vld [vmem:[#allocation57_spill] sm:$0xff] }
0x189c   : > { %2515 = vmatpush1.bf16.msra.mxu1 %v5232_v44  ;;  %v8903_v44 = vld [vmem:[#allocation41_spill] sm:$0xff] }
0x189d   : > { %v7621_v8 = vpack.c.bf16 %v8903_v44, %v8902_v38  ;;  %v4893_v38 = vld [vmem:[#allocation10 + $0x88] ss:$16 sps:$4 sm:$0xff]   ;;  %v4898_v44 = vld [vmem:[#allocation10 + $0xac] ss:$16 sps:$4 sm:$0xff]  }
0x1932   : > { %v2428_v2 = vpop.f32.mrb[52].mxu1 }
0x1933   : > { %v2429_v9 = vadd.f32 %v2428_v2, %v6184_v15  ;;  %v2430_v29 = vpop.f32.mrb[53].mxu1  ;;  %v4836_v15 = vld [vmem:[#allocation10 + $0x20] ss:$16 sps:$4 sm:$0xff]  }
0x1934   : > { %v2431_v31 = vadd.f32 %v2430_v29, %v6187_v54  ;;  %v2432_v55 = vpop.f32.mrb[54].mxu1  ;;  %v4841_v54 = vld [vmem:[#allocation10 + $0x44] ss:$16 sps:$4 sm:$0xff]  }
0x1935   : > { %v2435_v52 = vmax.f32 %v2429_v9, 0.0  ;;  %v2433_v63 = vpop.f32.mrb[55].mxu1  ;;  %v8904_v2 = vld [vmem:[#allocation56_spill] sm:$0xff] }
0x1936   : > { %v2436_v4 = vmax.f32 %v2431_v31, 0.0  ;;  %v8905_v9 = vld [vmem:[#allocation40_spill] sm:$0xff]  ;;  %v8906_v31 = vld [vmem:[#allocation55_spill] sm:$0xff]  ;;  %v8908_v63 = vld [vmem:[#allocation54_spill] sm:$0xff] }
0x1937   : > { %v2437_v60 = vpack.c.bf16 %v2435_v52, %v2435_v52  ;;  %v7627_v29 = vpack.c.bf16 %v8905_v9, %v8904_v2  ;;  %v8907_v55 = vld [vmem:[#allocation84_spill] sm:$0xff]  ;;  %v4896_v2 = vld [vmem:[#allocation10 + $0xa8] ss:$16 sps:$4 sm:$0xff]   ;;  %v4901_v9 = vld [vmem:[#allocation10 + $0xcc] ss:$16 sps:$4 sm:$0xff]  }
0x1938   : > { %v2438_v3 = vpack.c.bf16 %v2436_v4, %v2436_v4  ;;  %v7631_v52 = vpack.c.bf16 %v8907_v55, %v8906_v31  ;;  %v8909_v4 = vld [vmem:[#allocation83_spill] sm:$0xff] }
0x1939   : > { %v4899_v31 = vld [vmem:[#allocation10 + $0xc8] ss:$16 sps:$4 sm:$0xff]   ;;  %v4904_v55 = vld [vmem:[#allocation10 + $0xec] ss:$16 sps:$4 sm:$0xff]  }
0x193a   : > { %2471 = vmatprep.mubr.bf16.mxu0 %v2438_v3  ;;  %v7637_v3 = vpack.c.bf16 %v8909_v4, %v8908_v63  ;;  %v4902_v63 = vld [vmem:[#allocation10 + $0xe8] ss:$16 sps:$4 sm:$0xff]   ;;  %v4907_v4 = vld [vmem:[#allocation10 + $0x10c] ss:$16 sps:$4 sm:$0xff]  }
0x193b   : > { %2472 = vmatmul.mubr.bf16.vlgmr.msra.gmra.mrb[56].mxu0 %v2437_v60  ;;  %v4883_v60 = vld [vmem:[#allocation10 + $0xc] ss:$16 sps:$4 sm:$0xff]  }
0x193c   : > { %2948 = vmatpush1.bf16.msra.mxu0 %v4833_v5  ;;  %2979 = vmatprep.mubr.bf16.mxu0 %v7602_v36  ;;  %v7641_v5 = vpack.c.bf16 %v7565_v58, %v7400_v45  ;;  %v4937_v45 = vld [vmem:[#allocation11 + $0x24] ss:$8 sps:$4 sm:$0xff]  }
0x193d   : > { %2949 = vmatprep.subr.bf16.mxu0 %v4838_v61  ;;  %3038 = vmatprep.subr.bf16.mxu1 %v4883_v60  ;;  %v7647_v61 = vpack.c.bf16 %v7562_v13, %v7397_v41  ;;  %v4941_v41 = vld [vmem:[#allocation11 + $0x40] ss:$8 sps:$4 sm:$0xff]  }
0x193e   : > { %v4905_v60 = vld [vmem:[#allocation10 + $0x108] ss:$16 sps:$4 sm:$0xff]  }
0x1940   : > { %2950 = vmatpush1.bf16.msra.mxu0 %v4836_v15  ;;  %v4934_v15 = vld [vmem:[#allocation11 + $0x14] ss:$8 sps:$4 sm:$0xff]  }
0x1941   : > { %2951 = vmatprep.subr.bf16.mxu0 %v4841_v54  ;;  %v4932_v54 = vld [vmem:[#allocation11 + $0x10] ss:$8 sps:$4 sm:$0xff]  }
0x1944   : > { %2952 = vmatpush1.bf16.msra.mxu0 %v4839_v19  ;;  %v4935_v19 = vld [vmem:[#allocation11 + $0x20] ss:$8 sps:$4 sm:$0xff]  }
0x1945   : > { %2953 = vmatprep.subr.bf16.mxu0 %v4844_v21  ;;  %v4940_v21 = vld [vmem:[#allocation11 + $0x34] ss:$8 sps:$4 sm:$0xff]  }
0x1948   : > { %2954 = vmatpush1.bf16.msra.mxu0 %v4842_v22  ;;  %v4938_v22 = vld [vmem:[#allocation11 + $0x30] ss:$8 sps:$4 sm:$0xff]  }
0x1949   : > { %2955 = vmatprep.subr.bf16.mxu0 %v4847_v24  ;;  %v4943_v24 = vld [vmem:[#allocation11 + $0x44] ss:$8 sps:$4 sm:$0xff]  }
0x194c   : > { %2956 = vmatpush1.bf16.msra.mxu0 %v4845_v32  ;;  %v4946_v32 = vld [vmem:[#allocation11 + $0x54] ss:$8 sps:$4 sm:$0xff]  }
0x194d   : > { %2957 = vmatprep.subr.bf16.mxu0 %v4850_v33  ;;  %v4944_v33 = vld [vmem:[#allocation11 + $0x50] ss:$8 sps:$4 sm:$0xff]  }
0x1950   : > { %2958 = vmatpush1.bf16.msra.mxu0 %v4848_v11  ;;  %v4949_v11 = vld [vmem:[#allocation11 + $0x64] ss:$8 sps:$4 sm:$0xff]  }
0x1951   : > { %2959 = vmatprep.subr.bf16.mxu0 %v4853_v12 }
0x1954   : > { %2960 = vmatpush1.bf16.msra.mxu0 %v4851_v23  ;;  %v4947_v23 = vld [vmem:[#allocation11 + $0x60] ss:$8 sps:$4 sm:$0xff]  }
0x1955   : > { %2961 = vmatprep.subr.bf16.mxu0 %v4856_v25 }
0x1958   : > { %2962 = vmatpush1.bf16.msra.mxu0 %v4854_v17 }
0x1959   : > { %2963 = vmatprep.subr.bf16.mxu0 %v4859_v49  ;;  %v4952_v49 = vld [vmem:[#allocation11 + $0x74] ss:$8 sps:$4 sm:$0xff]  }
0x195c   : > { %2964 = vmatpush1.bf16.msra.mxu0 %v4857_v56 }
0x195d   : > { %2965 = vmatprep.subr.bf16.mxu0 %v4862_v35 }
0x1960   : > { %2966 = vmatpush1.bf16.msra.mxu0 %v4860_v43 }
0x1961   : > { %2967 = vmatprep.subr.bf16.mxu0 %v4865_v40 }
0x1964   : > { %2968 = vmatpush1.bf16.msra.mxu0 %v4863_v18 }
0x1965   : > { %2969 = vmatprep.subr.bf16.mxu0 %v4868_v16  ;;  %v4950_v16 = vld [vmem:[#allocation11 + $0x70] ss:$8 sps:$4 sm:$0xff]  }
0x1968   : > { %2970 = vmatpush1.bf16.msra.mxu0 %v4866_v20  ;;  %v4955_v20 = vld [vmem:[#allocation11 + $0x84] ss:$8 sps:$4 sm:$0xff]  }
0x1969   : > { %2971 = vmatprep.subr.bf16.mxu0 %v4871_v26 }
0x196c   : > { %2972 = vmatpush1.bf16.msra.mxu0 %v4869_v39  ;;  %v4881_v39 = vld [vmem:[#allocation10 + $0x8] ss:$16 sps:$4 sm:$0xff]  }
0x196d   : > { %2973 = vmatprep.subr.bf16.mxu0 %v4874_v14 }
0x1970   : > { %2974 = vmatpush1.bf16.msra.mxu0 %v4872_v30  ;;  %v4886_v30 = vld [vmem:[#allocation10 + $0x2c] ss:$16 sps:$4 sm:$0xff]  }
0x1971   : > { %2975 = vmatprep.subr.bf16.mxu0 %v4877_v0  ;;  %v4958_v0 = vld [vmem:[#allocation11 + $0x94] ss:$8 sps:$4 sm:$0xff]  }
0x1974   : > { %2976 = vmatpush1.bf16.msra.mxu0 %v4875_v50  ;;  %v4889_v50 = vld [vmem:[#allocation10 + $0x4c] ss:$16 sps:$4 sm:$0xff]  }
0x1975   : > { %2977 = vmatprep.subr.bf16.mxu0 %v4880_v28  ;;  %v4956_v28 = vld [vmem:[#allocation11 + $0x90] ss:$8 sps:$4 sm:$0xff]  }
0x1978   : > { %2978 = vmatpush1.bf16.msra.mxu0 %v4878_v48  ;;  %v4961_v48 = vld [vmem:[#allocation11 + $0xa4] ss:$8 sps:$4 sm:$0xff]  }
0x1979   : > { %3593 = vmatprep.subr.bf16.mxu0 %v4931_v37  ;;  %v4908_v37 = vld [vmem:[#allocation10 + $0x128] ss:$16 sps:$4 sm:$0xff]  }
0x197b   : > { %2980 = vmatmul.mubr.bf16.vlgmr.msra.gmra.mrb[60].mxu0 %v7607_v59 }
0x197c   : > { %2989 = vmatprep.mubr.bf16.mxu0 %v7611_v62  ;;  %3594 = vmatpush1.bf16.msra.mxu0 %v4929_v1  ;;  %v4910_v1 = vld [vmem:[#allocation10 + $0x12c] ss:$16 sps:$4 sm:$0xff]  }
0x197d   : > { %3595 = vmatprep.subr.bf16.mxu0 %v4934_v15  ;;  %v4913_v15 = vld [vmem:[#allocation10 + $0x14c] ss:$16 sps:$4 sm:$0xff]  }
0x1980   : > { %3596 = vmatpush1.bf16.msra.mxu0 %v4932_v54  ;;  %v4911_v54 = vld [vmem:[#allocation10 + $0x148] ss:$16 sps:$4 sm:$0xff]  }
0x1981   : > { %3597 = vmatprep.subr.bf16.mxu0 %v4937_v45  ;;  %v4916_v45 = vld [vmem:[#allocation10 + $0x16c] ss:$16 sps:$4 sm:$0xff]  }
0x1983   : > { %2990 = vmatmul.mubr.bf16.gmra.mrb[64].mxu0 %v7617_v27 }
0x1984   : > { %2999 = vmatprep.mubr.bf16.mxu0 %v7621_v8  ;;  %3598 = vmatpush1.bf16.msra.mxu0 %v4935_v19  ;;  %v4914_v19 = vld [vmem:[#allocation10 + $0x168] ss:$16 sps:$4 sm:$0xff]  }
0x1985   : > { %3599 = vmatprep.subr.bf16.mxu0 %v4940_v21  ;;  %v4919_v21 = vld [vmem:[#allocation10 + $0x18c] ss:$16 sps:$4 sm:$0xff]  }
0x1988   : > { %3600 = vmatpush1.bf16.msra.mxu0 %v4938_v22  ;;  %v4917_v22 = vld [vmem:[#allocation10 + $0x188] ss:$16 sps:$4 sm:$0xff]  }
0x1989   : > { %3601 = vmatprep.subr.bf16.mxu0 %v4943_v24  ;;  %v4922_v24 = vld [vmem:[#allocation10 + $0x1ac] ss:$16 sps:$4 sm:$0xff]  }
0x198b   : > { %3000 = vmatmul.mubr.bf16.gmra.mrb[68].mxu0 %v7627_v29 }
0x198c   : > { %3009 = vmatprep.mubr.bf16.mxu0 %v7631_v52  ;;  %3602 = vmatpush1.bf16.msra.mxu0 %v4941_v41  ;;  %v4920_v41 = vld [vmem:[#allocation10 + $0x1a8] ss:$16 sps:$4 sm:$0xff]  }
0x198d   : > { %3603 = vmatprep.subr.bf16.mxu0 %v4946_v32  ;;  %v7656_v32 = vld [vmem:[%s8910_s17] sm:$0xf]  ;;  %s8916_s17 = sld [smem:[#allocation90_spill]] }
0x1990   : > { %3604 = vmatpush1.bf16.msra.mxu0 %v4944_v33  ;;  %v4925_v33 = vld [vmem:[#allocation10 + $0x1cc] ss:$16 sps:$4 sm:$0xff]  }
0x1991   : > { %3605 = vmatprep.subr.bf16.mxu0 %v4949_v11  ;;  %v8911_v11 = vld [vmem:[#allocation66_spill] sm:$0xff] }
0x1993   : > { %3010 = vmatmul.mubr.bf16.gmra.mrb[72].mxu0 %v7637_v3  ;;  %s7961_s23 = scalar_lea.hbm %s8916_s17, %s4573_s1 }
0x1994   : > { %3019 = vmatprep.mubr.bf16.mxu0 %v7641_v5  ;;  %3606 = vmatpush1.bf16.msra.mxu0 %v4947_v23  ;;  %v8912_v23 = vld [vmem:[#allocation67_spill] sm:$0xff] }
0x1995   : > { %3607 = vmatprep.subr.bf16.mxu0 %v4952_v49  ;;  %v4928_v49 = vld [vmem:[#allocation10 + $0x1ec] ss:$16 sps:$4 sm:$0xff]  }
0x1998   : > { %3608 = vmatpush1.bf16.msra.mxu0 %v4950_v16  ;;  %v4926_v16 = vld [vmem:[#allocation10 + $0x1e8] ss:$16 sps:$4 sm:$0xff]  }
0x1999   : > { %3609 = vmatprep.subr.bf16.mxu0 %v4955_v20 }
0x199b   : > { %3020 = vmatmul.mubr.bf16.gmra.mrb[76].mxu0 %v7647_v61 }
0x1a0e   : > { %v2473_v12 = vpop.f32.mrb[56].mxu0 }
0x1a0f   : > { %v2474_v25 = vadd.f32 %v2473_v12, %v6240_v6  ;;  %v2475_v17 = vpop.f32.mrb[57].mxu0  ;;  %v4953_v6 = vld [vmem:[#allocation11 + $0x80] ss:$8 sps:$4 sm:$0xff]   ;;  %v7660_v12 = vrot.slane %v7656_v32, %v8911_v11 }
0x1a10   : > { %v2476_v56 = vadd.f32 %v2475_v17, %v6243_v7  ;;  %v2477_v35 = vpop.f32.mrb[58].mxu0  ;;  %v4884_v7 = vld [vmem:[#allocation10 + $0x28] ss:$16 sps:$4 sm:$0xff]   ;;  %3610 = vmatpush1.bf16.msra.mxu0 %v4953_v6 }
0x1a11   : > { %v2480_v43 = vmax.f32 %v2474_v25, 0.0  ;;  %v2478_v40 = vpop.f32.mrb[59].mxu0  ;;  %3611 = vmatprep.subr.bf16.mxu0 %v4958_v0  ;;  %v7664_v25 = vrot.slane %v7656_v32, %v8912_v23  ;;  %v4923_v17 = vld [vmem:[#allocation10 + $0x1c8] ss:$16 sps:$4 sm:$0xff]  }
0x1a12   : > { %v2481_v18 = vmax.f32 %v2476_v56, 0.0 }
0x1a13   : > { %v2482_v14 = vpack.c.bf16 %v2480_v43, %v2480_v43 }
0x1a14   : > { %v2483_v26 = vpack.c.bf16 %v2481_v18, %v2481_v18  ;;  %3612 = vmatpush1.bf16.msra.mxu0 %v4956_v28 }
0x1a15   : > { %3613 = vmatprep.subr.bf16.mxu0 %v4961_v48 }
0x1a16   : > { %2516 = vmatprep.mubr.bf16.mxu1 %v2483_v26 }
0x1a17   : > { %2517 = vmatmul.mubr.bf16.vlgmr.msra.gmra.mrb[56].mxu1 %v2482_v14 }
0x1a18   : > { %3039 = vmatpush1.bf16.msra.mxu1 %v4881_v39  ;;  %3070 = vmatprep.mubr.bf16.mxu1 %v7602_v36  ;;  %v4962_v36 = vld [vmem:[#allocation11 + $0xb0] ss:$8 sps:$4 sm:$0xff]  }
0x1a19   : > { %3040 = vmatprep.subr.bf16.mxu1 %v4886_v30  ;;  %3614 = vmatpush1.bf16.msra.mxu0 %v4959_v57 }
0x1a1a   : > { %3615 = vmatprep.subr.bf16.mxu0 %v4964_v47 }
0x1a1c   : > { %3041 = vmatpush1.bf16.msra.mxu1 %v4884_v7 }
0x1a1d   : > { %3042 = vmatprep.subr.bf16.mxu1 %v4889_v50  ;;  %3616 = vmatpush1.bf16.msra.mxu0 %v4962_v36 }
0x1a20   : > { %3043 = vmatpush1.bf16.msra.mxu1 %v4887_v51 }
0x1a21   : > { %3044 = vmatprep.subr.bf16.mxu1 %v4892_v53 }
0x1a24   : > { %3045 = vmatpush1.bf16.msra.mxu1 %v4890_v34 }
0x1a25   : > { %3046 = vmatprep.subr.bf16.mxu1 %v4895_v10 }
0x1a28   : > { %3047 = vmatpush1.bf16.msra.mxu1 %v4893_v38 }
0x1a29   : > { %3048 = vmatprep.subr.bf16.mxu1 %v4898_v44 }
0x1a2c   : > { %3049 = vmatpush1.bf16.msra.mxu1 %v4896_v2 }
0x1a2d   : > { %3050 = vmatprep.subr.bf16.mxu1 %v4901_v9 }
0x1a30   : > { %3051 = vmatpush1.bf16.msra.mxu1 %v4899_v31 }
0x1a31   : > { %3052 = vmatprep.subr.bf16.mxu1 %v4904_v55 }
0x1a34   : > { %3053 = vmatpush1.bf16.msra.mxu1 %v4902_v63 }
0x1a35   : > { %3054 = vmatprep.subr.bf16.mxu1 %v4907_v4 }
0x1a38   : > { %3055 = vmatpush1.bf16.msra.mxu1 %v4905_v60 }
0x1a39   : > { %3056 = vmatprep.subr.bf16.mxu1 %v4910_v1 }
0x1a3c   : > { %3057 = vmatpush1.bf16.msra.mxu1 %v4908_v37 }
0x1a3d   : > { %3058 = vmatprep.subr.bf16.mxu1 %v4913_v15 }
0x1a40   : > { %3059 = vmatpush1.bf16.msra.mxu1 %v4911_v54 }
0x1a41   : > { %3060 = vmatprep.subr.bf16.mxu1 %v4916_v45 }
0x1a44   : > { %3061 = vmatpush1.bf16.msra.mxu1 %v4914_v19 }
0x1a45   : > { %3062 = vmatprep.subr.bf16.mxu1 %v4919_v21 }
0x1a48   : > { %3063 = vmatpush1.bf16.msra.mxu1 %v4917_v22 }
0x1a49   : > { %3064 = vmatprep.subr.bf16.mxu1 %v4922_v24 }
0x1a4c   : > { %3065 = vmatpush1.bf16.msra.mxu1 %v4920_v41 }
0x1a4d   : > { %3066 = vmatprep.subr.bf16.mxu1 %v4925_v33 }
0x1a4e   : > { %v2981_v56 = vpop.f32.mrb[60].mxu0 }
0x1a4f   : > { %v2982_v35 = vadd.f32 %v2981_v56, %v7660_v12  ;;  %v2983_v43 = vpop.f32.mrb[61].mxu0 }
0x1a50   : > { %v2984_v40 = vadd.f32 %v2983_v43, %v7664_v25  ;;  %v2985_v18 = vpop.f32.mrb[62].mxu0  ;;  %3067 = vmatpush1.bf16.msra.mxu1 %v4923_v17 }
0x1a51   : > { %v2986_v20 = vadd.f32 %v2985_v18, %v7660_v12  ;;  %v2987_v26 = vpop.f32.mrb[63].mxu0  ;;  %3068 = vmatprep.subr.bf16.mxu1 %v4928_v49  ;;  %v3129_v14 = vmax.f32 %v2982_v35, 0.0 }
0x1a52   : > { %v2988_v39 = vadd.f32 %v2987_v26, %v7664_v25  ;;  %v3130_v6 = vmax.f32 %v2984_v40, 0.0  ;;  %v4965_v26 = vld [vmem:[#allocation11 + $0xc0] ss:$8 sps:$4 sm:$0xff]  }
0x1a53   : > { %v3133_v30 = vmax.f32 %v2986_v20, 0.0 }
0x1a54   : > { %v3134_v0 = vmax.f32 %v2988_v39, 0.0  ;;  %3069 = vmatpush1.bf16.msra.mxu1 %v4926_v16  ;;  %v4967_v16 = vld [vmem:[#allocation11 + $0xc4] ss:$8 sps:$4 sm:$0xff]  }
0x1a55   : > { %v7670_v7 = vpack.c.bf16 %v3133_v30, %v3129_v14  ;;  %3617 = vmatprep.subr.bf16.mxu0 %v4967_v16  ;;  %v7786_v16 = vld [vmem:[#allocation11 + $0x1c0] ss:$8 sps:$4 sm:$0xff]  }
0x1a56   : > { %v7672_v50 = vpack.c.bf16 %v3134_v0, %v3130_v6  ;;  %v2991_v28 = vpop.f32.mrb[64].mxu0  ;;  %3618 = vmatpush1.bf16.msra.mxu0 %v4965_v26  ;;  %v4970_v0 = vld [vmem:[#allocation11 + $0xd4] ss:$8 sps:$4 sm:$0xff]  }
0x1a57   : > { %v2992_v48 = vadd.f32 %v2991_v28, %v7660_v12  ;;  %v2993_v51 = vpop.f32.mrb[65].mxu0  ;;  %3071 = vmatmul.mubr.bf16.vlgmr.msra.gmra.mrb[60].mxu1 %v7607_v59  ;;  %3619 = vmatprep.subr.bf16.mxu0 %v4970_v0  ;;  %v7790_v26 = vld [vmem:[#allocation11 + $0x1d4] ss:$8 sps:$4 sm:$0xff]  }
0x1a58   : > { %v2994_v53 = vadd.f32 %v2993_v51, %v7664_v25  ;;  %v2995_v57 = vpop.f32.mrb[66].mxu0  ;;  %3080 = vmatprep.mubr.bf16.mxu1 %v7611_v62  ;;  %v4968_v51 = vld [vmem:[#allocation11 + $0xd0] ss:$8 sps:$4 sm:$0xff]  }
0x1a59   : > { %v2996_v47 = vadd.f32 %v2995_v57, %v7660_v12  ;;  %v2997_v34 = vpop.f32.mrb[67].mxu0  ;;  %v3137_v36 = vmax.f32 %v2992_v48, 0.0 }
0x1a5a   : > { %v2998_v10 = vadd.f32 %v2997_v34, %v7664_v25  ;;  %v3138_v44 = vmax.f32 %v2994_v53, 0.0  ;;  %3620 = vmatpush1.bf16.msra.mxu0 %v4968_v51 }
0x1a5b   : > { %v3141_v38 = vmax.f32 %v2996_v47, 0.0 }
0x1a5c   : > { %v3142_v2 = vmax.f32 %v2998_v10, 0.0 }
0x1a5d   : > { %v7680_v9 = vpack.c.bf16 %v3141_v38, %v3137_v36  ;;  %v4971_v38 = vld [vmem:[#allocation11 + $0xe0] ss:$8 sps:$4 sm:$0xff]  }
0x1a5e   : > { %v7682_v31 = vpack.c.bf16 %v3142_v2, %v3138_v44  ;;  %v3001_v55 = vpop.f32.mrb[68].mxu0  ;;  %v4974_v2 = vld [vmem:[#allocation11 + $0xf0] ss:$8 sps:$4 sm:$0xff]  }
0x1a5f   : > { %v3002_v59 = vadd.f32 %v3001_v55, %v7660_v12  ;;  %v3003_v63 = vpop.f32.mrb[69].mxu0  ;;  %3081 = vmatmul.mubr.bf16.gmra.mrb[64].mxu1 %v7617_v27  ;;  %v7715_v55 = vld [vmem:[#allocation11 + $0x100] ss:$8 sps:$4 sm:$0xff]  }
0x1a60   : > { %v3004_v62 = vadd.f32 %v3003_v63, %v7664_v25  ;;  %v3005_v4 = vpop.f32.mrb[70].mxu0  ;;  %3090 = vmatprep.mubr.bf16.mxu1 %v7621_v8  ;;  %v7718_v63 = vld [vmem:[#allocation11 + $0x110] ss:$8 sps:$4 sm:$0xff]  }
0x1a61   : > { %v3006_v60 = vadd.f32 %v3005_v4, %v7660_v12  ;;  %v3007_v1 = vpop.f32.mrb[71].mxu0  ;;  %v3145_v15 = vmax.f32 %v3002_v59, 0.0  ;;  %v4979_v59 = vld [vmem:[#allocation11 + $0x104] ss:$8 sps:$4 sm:$0xff]  }
0x1a62   : > { %v3008_v37 = vadd.f32 %v3007_v1, %v7664_v25  ;;  %v3146_v45 = vmax.f32 %v3004_v62, 0.0  ;;  %4496 = vmatprep.subr.bf16.mxu1 %v4979_v59  ;;  %v7720_v62 = vld [vmem:[#allocation11 + $0x114] ss:$8 sps:$4 sm:$0xff]   ;;  %v7722_v4 = vld [vmem:[#allocation11 + $0x124] ss:$8 sps:$4 sm:$0xff]  }
0x1a63   : > { %v3149_v54 = vmax.f32 %v3006_v60, 0.0  ;;  %4512 = vmatpush1.bf16.msra.mxu1 %v7715_v55  ;;  %v7730_v60 = vld [vmem:[#allocation11 + $0x130] ss:$8 sps:$4 sm:$0xff]   ;;  %v7732_v1 = vld [vmem:[#allocation11 + $0x134] ss:$8 sps:$4 sm:$0xff]  }
0x1a64   : > { %v3150_v19 = vmax.f32 %v3008_v37, 0.0  ;;  %4497 = vmatprep.subr.bf16.mxu1 %v7720_v62  ;;  %v7734_v37 = vld [vmem:[#allocation11 + $0x144] ss:$8 sps:$4 sm:$0xff]  }
0x1a65   : > { %v7690_v21 = vpack.c.bf16 %v3149_v54, %v3145_v15  ;;  %v7738_v15 = vld [vmem:[#allocation11 + $0x140] ss:$8 sps:$4 sm:$0xff]   ;;  %v7742_v54 = vld [vmem:[#allocation11 + $0x150] ss:$8 sps:$4 sm:$0xff]  }
0x1a66   : > { %v7692_v22 = vpack.c.bf16 %v3150_v19, %v3146_v45  ;;  %v3011_v24 = vpop.f32.mrb[72].mxu0  ;;  %v7744_v45 = vld [vmem:[#allocation11 + $0x154] ss:$8 sps:$4 sm:$0xff]   ;;  %v7746_v19 = vld [vmem:[#allocation11 + $0x164] ss:$8 sps:$4 sm:$0xff]  }
0x1a67   : > { %v3012_v27 = vadd.f32 %v3011_v24, %v7660_v12  ;;  %v3013_v41 = vpop.f32.mrb[73].mxu0  ;;  %3091 = vmatmul.mubr.bf16.gmra.mrb[68].mxu1 %v7627_v29  ;;  %v7750_v24 = vld [vmem:[#allocation11 + $0x160] ss:$8 sps:$4 sm:$0xff]  }
0x1a68   : > { %v3014_v8 = vadd.f32 %v3013_v41, %v7664_v25  ;;  %v3015_v33 = vpop.f32.mrb[74].mxu0  ;;  %3100 = vmatprep.mubr.bf16.mxu1 %v7631_v52  ;;  %4513 = vmatpush1.bf16.msra.mxu1 %v7718_v63  ;;  %v7756_v41 = vld [vmem:[#allocation11 + $0x174] ss:$8 sps:$4 sm:$0xff]  }
0x1a69   : > { %v3016_v17 = vadd.f32 %v3015_v33, %v7660_v12  ;;  %v3017_v49 = vpop.f32.mrb[75].mxu0  ;;  %v3153_v35 = vmax.f32 %v3012_v27, 0.0  ;;  %4498 = vmatprep.subr.bf16.mxu1 %v7722_v4  ;;  %v7754_v27 = vld [vmem:[#allocation11 + $0x170] ss:$8 sps:$4 sm:$0xff]   ;;  %v7762_v33 = vld [vmem:[#allocation11 + $0x180] ss:$8 sps:$4 sm:$0xff]  }
0x1a6a   : > { %v3018_v56 = vadd.f32 %v3017_v49, %v7664_v25  ;;  %v3154_v40 = vmax.f32 %v3014_v8, 0.0  ;;  %v7758_v8 = vld [vmem:[#allocation11 + $0x184] ss:$8 sps:$4 sm:$0xff]   ;;  %v7768_v49 = vld [vmem:[#allocation11 + $0x190] ss:$8 sps:$4 sm:$0xff]  }
0x1a6b   : > { %v3157_v43 = vmax.f32 %v3016_v17, 0.0  ;;  %v7765_v17 = vld [vmem:[#allocation11 + $0x194] ss:$8 sps:$4 sm:$0xff]  }
0x1a6c   : > { %v3158_v18 = vmax.f32 %v3018_v56, 0.0  ;;  %v7772_v56 = vld [vmem:[#allocation11 + $0x1a4] ss:$8 sps:$4 sm:$0xff]  }
0x1a6d   : > { %v7700_v20 = vpack.c.bf16 %v3157_v43, %v3153_v35  ;;  %v7774_v35 = vld [vmem:[#allocation11 + $0x1a0] ss:$8 sps:$4 sm:$0xff]   ;;  %v7778_v43 = vld [vmem:[#allocation11 + $0x1b4] ss:$8 sps:$4 sm:$0xff]  }
0x1a6e   : > { %v7702_v39 = vpack.c.bf16 %v3158_v18, %v3154_v40  ;;  %v3021_v29 = vpop.f32.mrb[76].mxu0  ;;  %v7780_v40 = vld [vmem:[#allocation11 + $0x1b0] ss:$8 sps:$4 sm:$0xff]   ;;  %v7784_v18 = vld [vmem:[#allocation11 + $0x1c4] ss:$8 sps:$4 sm:$0xff]  }
0x1a6f   : > { %v3022_v14 = vadd.f32 %v3021_v29, %v7660_v12  ;;  %v3023_v52 = vpop.f32.mrb[77].mxu0  ;;  %3101 = vmatmul.mubr.bf16.gmra.mrb[72].mxu1 %v7637_v3  ;;  %v4973_v3 = vld [vmem:[#allocation11 + $0xe4] ss:$8 sps:$4 sm:$0xff]   ;;  %v7792_v29 = vld [vmem:[#allocation11 + $0x1d0] ss:$8 sps:$4 sm:$0xff]  }
0x1a70   : > { %v3024_v30 = vadd.f32 %v3023_v52, %v7664_v25  ;;  %v3025_v6 = vpop.f32.mrb[78].mxu0  ;;  %3110 = vmatprep.mubr.bf16.mxu1 %v7641_v5  ;;  %3621 = vmatprep.subr.bf16.mxu0 %v4973_v3  ;;  %v4976_v5 = vld [vmem:[#allocation11 + $0xf4] ss:$8 sps:$4 sm:$0xff]   ;;  %v7798_v52 = vld [vmem:[#allocation11 + $0x1e0] ss:$8 sps:$4 sm:$0xff]  }
0x1a71   : > { %v3026_v28 = vadd.f32 %v3025_v6, %v7660_v12  ;;  %v3027_v48 = vpop.f32.mrb[79].mxu0  ;;  %v3161_v57 = vmax.f32 %v3022_v14, 0.0  ;;  %3622 = vmatpush1.bf16.msra.mxu0 %v4971_v38  ;;  %v7796_v14 = vld [vmem:[#allocation11 + $0x1e4] ss:$8 sps:$4 sm:$0xff]   ;;  %v7804_v6 = vld [vmem:[#allocation11 + $0x1f0] ss:$8 sps:$4 sm:$0xff]  }
0x1a72   : > { %v3028_v53 = vadd.f32 %v3027_v48, %v7664_v25  ;;  %v3162_v34 = vmax.f32 %v3024_v30, 0.0  ;;  %3623 = vmatprep.subr.bf16.mxu0 %v4976_v5  ;;  %v7802_v30 = vld [vmem:[#allocation11 + $0x1f4] ss:$8 sps:$4 sm:$0xff]  }
0x1a73   : > { %v3165_v47 = vmax.f32 %v3026_v28, 0.0 }
0x1a74   : > { %v3166_v10 = vmax.f32 %v3028_v53, 0.0 }
0x1a75   : > { %v7710_v36 = vpack.c.bf16 %v3165_v47, %v3161_v57  ;;  %3624 = vmatpush1.bf16.msra.mxu0 %v4974_v2 }
0x1a76   : > { %v7712_v44 = vpack.c.bf16 %v3166_v10, %v3162_v34  ;;  %3684 = vmatprep.subr.bf16.mxu0 %v4979_v59 }
0x1a77   : > { %3111 = vmatmul.mubr.bf16.gmra.mrb[76].mxu1 %v7647_v61  ;;  %v7726_v61 = vld [vmem:[#allocation11 + $0x120] ss:$8 sps:$4 sm:$0xff]  }
0x1a78   : > { %4514 = vmatpush1.bf16.msra.mxu1 %v7726_v61 }
0x1a79   : > { %4499 = vmatprep.subr.bf16.mxu1 %v7732_v1 }
0x1a7c   : > { %4515 = vmatpush1.bf16.msra.mxu1 %v7730_v60 }
0x1a7d   : > { %4500 = vmatprep.subr.bf16.mxu1 %v7734_v37 }
0x1a80   : > { %4516 = vmatpush1.bf16.msra.mxu1 %v7738_v15 }
0x1a81   : > { %4501 = vmatprep.subr.bf16.mxu1 %v7744_v45 }
0x1a84   : > { %4517 = vmatpush1.bf16.msra.mxu1 %v7742_v54 }
0x1a85   : > { %4502 = vmatprep.subr.bf16.mxu1 %v7746_v19 }
0x1a88   : > { %4518 = vmatpush1.bf16.msra.mxu1 %v7750_v24 }
0x1a89   : > { %4503 = vmatprep.subr.bf16.mxu1 %v7756_v41 }
0x1a8c   : > { %4519 = vmatpush1.bf16.msra.mxu1 %v7754_v27 }
0x1a8d   : > { %4504 = vmatprep.subr.bf16.mxu1 %v7758_v8 }
0x1a90   : > { %4520 = vmatpush1.bf16.msra.mxu1 %v7762_v33 }
0x1a91   : > { %4505 = vmatprep.subr.bf16.mxu1 %v7765_v17 }
0x1a94   : > { %4521 = vmatpush1.bf16.msra.mxu1 %v7768_v49 }
0x1a95   : > { %4506 = vmatprep.subr.bf16.mxu1 %v7772_v56 }
0x1a98   : > { %4522 = vmatpush1.bf16.msra.mxu1 %v7774_v35 }
0x1a99   : > { %4507 = vmatprep.subr.bf16.mxu1 %v7778_v43 }
0x1a9c   : > { %4523 = vmatpush1.bf16.msra.mxu1 %v7780_v40 }
0x1a9d   : > { %4508 = vmatprep.subr.bf16.mxu1 %v7784_v18 }
0x1aa0   : > { %4524 = vmatpush1.bf16.msra.mxu1 %v7786_v16 }
0x1aa1   : > { %4509 = vmatprep.subr.bf16.mxu1 %v7790_v26 }
0x1aa4   : > { %4525 = vmatpush1.bf16.msra.mxu1 %v7792_v29 }
0x1aa5   : > { %4510 = vmatprep.subr.bf16.mxu1 %v7796_v14 }
0x1aa8   : > { %4526 = vmatpush1.bf16.msra.mxu1 %v7798_v52 }
0x1aa9   : > { %4511 = vmatprep.subr.bf16.mxu1 %v7802_v30 }
0x1aac   : > { %4527 = vmatpush1.bf16.msra.mxu1 %v7804_v6 }
0x1aea   : > { %v2518_v0 = vpop.f32.mrb[56].mxu1 }
0x1aeb   : > { %v2519_v28 = vadd.f32 %v2518_v0, %v6285_v42  ;;  %v2520_v48 = vpop.f32.mrb[57].mxu1  ;;  %v8913_v42 = vld [vmem:[#allocation65_spill] sm:$0xff] }
0x1aec   : > { %v2521_v51 = vadd.f32 %v2520_v48, %v6288_v46  ;;  %v2522_v53 = vpop.f32.mrb[58].mxu1  ;;  %v2617_v46 = vsub.s32 2, %v8913_v42 }
0x1aed   : > { %v2525_v57 = vmul.f32 0.1, %v2519_v28  ;;  %v2523_v47 = vpop.f32.mrb[59].mxu1 }
0x1aee   : > { %v2526_v34 = vmul.f32 0.1, %v2521_v51 }
0x1aef   : > { %v2527_v10 = vadd.f32 %v2525_v57, %v7562_v13  ;;  %v2621_v13 = vsub.s32 3, %v8913_v42 }
0x1af0   : > { %v2528_v3 = vadd.f32 %v2526_v34, %v7565_v58  ;;  %v7846_v58 = vrot.slane %v7656_v32, %v2617_v46 }
0x1af1   : > { %v2539_v5 = vpack.c.bf16 %v2527_v10, %v2527_v10 }
0x1af2   : > { %v2540_v38 = vpack.c.bf16 %v2528_v3, %v2528_v3 }
0x1af4   : > { %3029 = vmatprep.mubr.bf16.mxu0 %v2540_v38  ;;  %3120 = vmatprep.mubr.bf16.mxu1 %v2540_v38 }
0x1af5   : > { %3030 = vmatmul.mubr.bf16.gmra.mrb[80].mxu0 %v2539_v5  ;;  %3121 = vmatmul.mubr.bf16.gmra.mrb[80].mxu1 %v2539_v5 }
0x1af6   : > { %3625 = vmatprep.mubr.bf16.mxu0 %v7672_v50 }
0x1afd   : > { %3626 = vmatmul.mubr.bf16.vlgmr.msra.gmra.mrb[84].mxu0 %v7670_v7  ;;  %v7850_v7 = vrot.slane %v7656_v32, %v2621_v13 }
0x1afe   : > { %3635 = vmatprep.mubr.bf16.mxu0 %v7682_v31  ;;  %3685 = vmatpush1.bf16.msra.mxu0 %v7715_v55 }
0x1aff   : > { %3686 = vmatprep.subr.bf16.mxu0 %v7720_v62 }
0x1b02   : > { %3687 = vmatpush1.bf16.msra.mxu0 %v7718_v63 }
0x1b03   : > { %3688 = vmatprep.subr.bf16.mxu0 %v7722_v4 }
0x1b05   : > { %3636 = vmatmul.mubr.bf16.gmra.mrb[88].mxu0 %v7680_v9 }
0x1b06   : > { %3645 = vmatprep.mubr.bf16.mxu0 %v7692_v22  ;;  %3689 = vmatpush1.bf16.msra.mxu0 %v7726_v61 }
0x1b07   : > { %3690 = vmatprep.subr.bf16.mxu0 %v7732_v1 }
0x1b0a   : > { %3691 = vmatpush1.bf16.msra.mxu0 %v7730_v60 }
0x1b0b   : > { %3692 = vmatprep.subr.bf16.mxu0 %v7734_v37 }
0x1b0d   : > { %3646 = vmatmul.mubr.bf16.gmra.mrb[92].mxu0 %v7690_v21 }
0x1b0e   : > { %3655 = vmatprep.mubr.bf16.mxu0 %v7702_v39  ;;  %3693 = vmatpush1.bf16.msra.mxu0 %v7738_v15 }
0x1b0f   : > { %3694 = vmatprep.subr.bf16.mxu0 %v7744_v45 }
0x1b12   : > { %3695 = vmatpush1.bf16.msra.mxu0 %v7742_v54 }
0x1b13   : > { %3696 = vmatprep.subr.bf16.mxu0 %v7746_v19 }
0x1b15   : > { %3656 = vmatmul.mubr.bf16.gmra.mrb[96].mxu0 %v7700_v20 }
0x1b16   : > { %3665 = vmatprep.mubr.bf16.mxu0 %v7712_v44  ;;  %3697 = vmatpush1.bf16.msra.mxu0 %v7750_v24 }
0x1b17   : > { %3698 = vmatprep.subr.bf16.mxu0 %v7756_v41 }
0x1b1a   : > { %3699 = vmatpush1.bf16.msra.mxu0 %v7754_v27 }
0x1b1b   : > { %3700 = vmatprep.subr.bf16.mxu0 %v7758_v8 }
0x1b1d   : > { %3666 = vmatmul.mubr.bf16.gmra.mrb[100].mxu0 %v7710_v36 }
0x1b1e   : > { %3701 = vmatpush1.bf16.msra.mxu0 %v7762_v33 }
0x1b1f   : > { %3702 = vmatprep.subr.bf16.mxu0 %v7765_v17 }
0x1b22   : > { %3703 = vmatpush1.bf16.msra.mxu0 %v7768_v49 }
0x1b23   : > { %3704 = vmatprep.subr.bf16.mxu0 %v7772_v56 }
0x1b26   : > { %3705 = vmatpush1.bf16.msra.mxu0 %v7774_v35 }
0x1b27   : > { %3706 = vmatprep.subr.bf16.mxu0 %v7778_v43 }
0x1b2a   : > { %v3072_v50 = vpop.f32.mrb[60].mxu1  ;;  %3707 = vmatpush1.bf16.msra.mxu0 %v7780_v40 }
0x1b2b   : > { %v3073_v9 = vadd.f32 %v3072_v50, %v7846_v58  ;;  %v3074_v31 = vpop.f32.mrb[61].mxu1  ;;  %3708 = vmatprep.subr.bf16.mxu0 %v7784_v18 }
0x1b2c   : > { %v3075_v21 = vadd.f32 %v3074_v31, %v7850_v7  ;;  %v3076_v22 = vpop.f32.mrb[62].mxu1 }
0x1b2d   : > { %v3077_v20 = vadd.f32 %v3076_v22, %v7846_v58  ;;  %v3078_v39 = vpop.f32.mrb[63].mxu1  ;;  %v3131_v32 = vmax.f32 %v3073_v9, 0.0 }
0x1b2e   : > { %v3079_v36 = vadd.f32 %v3078_v39, %v7850_v7  ;;  %3709 = vmatpush1.bf16.msra.mxu0 %v7786_v16  ;;  %v3132_v2 = vmax.f32 %v3075_v21, 0.0 }
0x1b2f   : > { %v3135_v44 = vmax.f32 %v3077_v20, 0.0  ;;  %3710 = vmatprep.subr.bf16.mxu0 %v7790_v26 }
0x1b30   : > { %v3136_v55 = vmax.f32 %v3079_v36, 0.0 }
0x1b31   : > { %v7860_v59 = vpack.c.bf16 %v3135_v44, %v3131_v32 }
0x1b32   : > { %v7862_v63 = vpack.c.bf16 %v3136_v55, %v3132_v2  ;;  %v3082_v62 = vpop.f32.mrb[64].mxu1  ;;  %3711 = vmatpush1.bf16.msra.mxu0 %v7792_v29 }
0x1b33   : > { %v3083_v4 = vadd.f32 %v3082_v62, %v7846_v58  ;;  %v3084_v61 = vpop.f32.mrb[65].mxu1  ;;  %3712 = vmatprep.subr.bf16.mxu0 %v7796_v14  ;;  %v5025_v62 = vld [vmem:[#allocation13 + $0x40] sm:$0xff]  }
0x1b34   : > { %v3085_v60 = vadd.f32 %v3084_v61, %v7850_v7  ;;  %v3086_v1 = vpop.f32.mrb[66].mxu1  ;;  %v5027_v61 = vld [vmem:[#allocation13 + $0x48] sm:$0xff]   ;;  %4444 = vmatprep.subr.bf16.mxu1 %v5025_v62 }
0x1b35   : > { %v3087_v37 = vadd.f32 %v3086_v1, %v7846_v58  ;;  %v3088_v15 = vpop.f32.mrb[67].mxu1  ;;  %v3139_v45 = vmax.f32 %v3083_v4, 0.0  ;;  %v5026_v4 = vld [vmem:[#allocation13] sm:$0xff]   ;;  %v5029_v1 = vld [vmem:[#allocation13 + $0x50] sm:$0xff]  }
0x1b36   : > { %v3089_v54 = vadd.f32 %v3088_v15, %v7850_v7  ;;  %3713 = vmatpush1.bf16.msra.mxu0 %v7798_v52  ;;  %v3140_v24 = vmax.f32 %v3085_v60, 0.0  ;;  %v5028_v60 = vld [vmem:[#allocation13 + $0x8] sm:$0xff]   ;;  %v5031_v15 = vld [vmem:[#allocation13 + $0x58] sm:$0xff]  }
0x1b37   : > { %v3143_v19 = vmax.f32 %v3087_v37, 0.0  ;;  %3714 = vmatprep.subr.bf16.mxu0 %v7802_v30  ;;  %v5030_v37 = vld [vmem:[#allocation13 + $0x10] sm:$0xff]  }
0x1b38   : > { %v3144_v27 = vmax.f32 %v3089_v54, 0.0  ;;  %v5032_v54 = vld [vmem:[#allocation13 + $0x18] sm:$0xff]  }
0x1b39   : > { %v7872_v41 = vpack.c.bf16 %v3143_v19, %v3139_v45 }
0x1b3a   : > { %v7874_v8 = vpack.c.bf16 %v3144_v27, %v3140_v24  ;;  %v3092_v33 = vpop.f32.mrb[68].mxu1  ;;  %3715 = vmatpush1.bf16.msra.mxu0 %v7804_v6 }
0x1b3b   : > { %v3093_v17 = vadd.f32 %v3092_v33, %v7846_v58  ;;  %v3094_v49 = vpop.f32.mrb[69].mxu1 }
0x1b3c   : > { %v3095_v56 = vadd.f32 %v3094_v49, %v7850_v7  ;;  %v3096_v35 = vpop.f32.mrb[70].mxu1 }
0x1b3d   : > { %v3097_v43 = vadd.f32 %v3096_v35, %v7846_v58  ;;  %v3098_v40 = vpop.f32.mrb[71].mxu1  ;;  %v3147_v16 = vmax.f32 %v3093_v17, 0.0 }
0x1b3e   : > { %v3099_v18 = vadd.f32 %v3098_v40, %v7850_v7  ;;  %v3148_v29 = vmax.f32 %v3095_v56, 0.0 }
0x1b3f   : > { %v3151_v26 = vmax.f32 %v3097_v43, 0.0 }
0x1b40   : > { %v3152_v14 = vmax.f32 %v3099_v18, 0.0 }
0x1b41   : > { %v3183_v52 = vpack.c.bf16 %v3151_v26, %v3147_v16 }
0x1b42   : > { %v3184_v30 = vpack.c.bf16 %v3152_v14, %v3148_v29  ;;  %v3102_v0 = vpop.f32.mrb[72].mxu1 }
0x1b43   : > { %v3103_v6 = vadd.f32 %v3102_v0, %v7846_v58  ;;  %v3104_v28 = vpop.f32.mrb[73].mxu1 }
0x1b44   : > { %v3105_v48 = vadd.f32 %v3104_v28, %v7850_v7  ;;  %v3106_v51 = vpop.f32.mrb[74].mxu1  ;;  %3736 = vmatprep.mubr.bf16.mxu1 %v3184_v30 }
0x1b45   : > { %v3107_v53 = vadd.f32 %v3106_v51, %v7846_v58  ;;  %v3108_v57 = vpop.f32.mrb[75].mxu1  ;;  %3737 = vmatmul.mubr.bf16.vlgmr.msra.gmra.mrb[84].mxu1 %v3183_v52  ;;  %v3155_v34 = vmax.f32 %v3103_v6, 0.0 }
0x1b46   : > { %v3109_v47 = vadd.f32 %v3108_v57, %v7850_v7  ;;  %v3156_v3 = vmax.f32 %v3105_v48, 0.0  ;;  %4445 = vmatpush3.bf16.msra.mxu1 %v5026_v4 }
0x1b47   : > { %v3159_v10 = vmax.f32 %v3107_v53, 0.0  ;;  %4446 = vmatprep.subr.bf16.mxu1 %v5027_v61 }
0x1b48   : > { %v3160_v38 = vmax.f32 %v3109_v47, 0.0 }
0x1b49   : > { %v3187_v5 = vpack.c.bf16 %v3159_v10, %v3155_v34 }
0x1b4a   : > { %v3188_v42 = vpack.c.bf16 %v3160_v38, %v3156_v3  ;;  %v3112_v46 = vpop.f32.mrb[76].mxu1  ;;  %4447 = vmatpush3.bf16.msra.mxu1 %v5028_v60 }
0x1b4b   : > { %v3113_v13 = vadd.f32 %v3112_v46, %v7846_v58  ;;  %v3114_v50 = vpop.f32.mrb[77].mxu1  ;;  %4448 = vmatprep.subr.bf16.mxu1 %v5029_v1 }
0x1b4c   : > { %v3115_v9 = vadd.f32 %v3114_v50, %v7850_v7  ;;  %v3116_v31 = vpop.f32.mrb[78].mxu1  ;;  %3746 = vmatprep.mubr.bf16.mxu1 %v3188_v42 }
0x1b4d   : > { %v3117_v21 = vadd.f32 %v3116_v31, %v7846_v58  ;;  %v3118_v22 = vpop.f32.mrb[79].mxu1  ;;  %3747 = vmatmul.mubr.bf16.gmra.mrb[88].mxu1 %v3187_v5  ;;  %v3163_v39 = vmax.f32 %v3113_v13, 0.0 }
0x1b4e   : > { %v3119_v20 = vadd.f32 %v3118_v22, %v7850_v7  ;;  %v3164_v32 = vmax.f32 %v3115_v9, 0.0  ;;  %4449 = vmatpush3.bf16.msra.mxu1 %v5030_v37 }
0x1b4f   : > { %v3167_v36 = vmax.f32 %v3117_v21, 0.0  ;;  %4450 = vmatprep.subr.bf16.mxu1 %v5031_v15 }
0x1b50   : > { %v3168_v44 = vmax.f32 %v3119_v20, 0.0 }
0x1b51   : > { %v3191_v2 = vpack.c.bf16 %v3167_v36, %v3163_v39 }
0x1b52   : > { %v3192_v55 = vpack.c.bf16 %v3168_v44, %v3164_v32  ;;  %4451 = vmatpush3.bf16.msra.mxu1 %v5032_v54 }
0x1b54   : > { %3756 = vmatprep.mubr.bf16.mxu1 %v3192_v55 }
0x1b55   : > { %3757 = vmatmul.mubr.bf16.gmra.mrb[92].mxu1 %v3191_v2 }
0x1bc8   : > { %v3031_v45 = vpop.f32.mrb[80].mxu0  ;;  %v3122_v19 = vpop.f32.mrb[80].mxu1 }
0x1bc9   : > { %v3032_v24 = vadd.f32 %v3031_v45, %v7660_v12  ;;  %v3123_v27 = vadd.f32 %v3122_v19, %v7846_v58  ;;  %v3033_v33 = vpop.f32.mrb[81].mxu0  ;;  %v3124_v17 = vpop.f32.mrb[81].mxu1 }
0x1bca   : > { %v3034_v49 = vadd.f32 %v3033_v33, %v7664_v25  ;;  %v3125_v56 = vadd.f32 %v3124_v17, %v7850_v7  ;;  %v3035_v35 = vpop.f32.mrb[82].mxu0  ;;  %v3126_v43 = vpop.f32.mrb[82].mxu1  ;;  %v5033_v17 = vld [vmem:[#allocation13 + $0x60] sm:$0xff]  }
0x1bcb   : > { %v3169_v40 = vmax.f32 %v3032_v24, 0.0  ;;  %v3171_v18 = vmax.f32 %v3123_v27, 0.0  ;;  %v3036_v16 = vpop.f32.mrb[83].mxu0  ;;  %v3127_v26 = vpop.f32.mrb[83].mxu1  ;;  %v5034_v35 = vld [vmem:[#allocation13 + $0x20] sm:$0xff]   ;;  %4452 = vmatprep.subr.bf16.mxu1 %v5033_v17 }
0x1bcc   : > { %v3170_v29 = vmax.f32 %v3034_v49, 0.0  ;;  %v3172_v14 = vmax.f32 %v3125_v56, 0.0  ;;  %4453 = vmatpush3.bf16.msra.mxu1 %v5034_v35 }
0x1bcd   : > { %v3193_v0 = vpack.c.bf16 %v3169_v40, %v3169_v40  ;;  %v3195_v12 = vpack.c.bf16 %v3171_v18, %v3171_v18 }
0x1bce   : > { %v3194_v52 = vpack.c.bf16 %v3170_v29, %v3170_v29  ;;  %v3196_v30 = vpack.c.bf16 %v3172_v14, %v3172_v14 }
0x1bd0   : > { %3675 = vmatprep.mubr.bf16.mxu0 %v3194_v52  ;;  %3766 = vmatprep.mubr.bf16.mxu1 %v3196_v30 }
0x1bd1   : > { %3676 = vmatmul.mubr.bf16.gmra.mrb[104].mxu0 %v3193_v0  ;;  %3767 = vmatmul.mubr.bf16.gmra.mrb[96].mxu1 %v3195_v12  ;;  %v5035_v0 = vld [vmem:[#allocation13 + $0x68] sm:$0xff]  }
0x1bd2   : > { %3716 = vmatprep.mubr.bf16.mxu0 %v7862_v63  ;;  %4454 = vmatprep.subr.bf16.mxu1 %v5035_v0 }
0x1bd9   : > { %3717 = vmatmul.mubr.bf16.vlgmr.msra.gmra.mrb[84].mxu0 %v7860_v59  ;;  %v3261_v59 = vld [vmem:[%s8914_s30] sm:$0x3]  ;;  %s5526_s30 = smov [#allocation14]  }
0x1bda   : > { %3726 = vmatprep.mubr.bf16.mxu0 %v7874_v8  ;;  %v7901_v63 = vrot.slane %v3261_v59, %v8911_v11  ;;  %v7904_v8 = vrot.slane %v3261_v59, %v8912_v23  ;;  %v5040_v59 = vld [vmem:[#allocation13 + $0x38] sm:$0xff]   ;;  %s5437_s15 = sshll.u32 %s5526_s30, 4  ;;  %s5438_s15 = int_to_ptr.vmem [resolvable:$false] %s5437_s15 }
0x1bdb   : > { %s5439_s6 = scalar_lea.vmem %s5438_s15, 2816  ;;  %p5440_p13 = scmp.lt.s32.totalorder %s7963_s24, %s5438_s15 }
0x1bdc   : > { %p5441_p0 = scmp.lt.s32.totalorder %s5439_s6, %s5433_s18 }
0x1bde   : > { %p5442_p2 = por %p5441_p0, %p5440_p13 }
0x1be0   : > { %v3647_v25 = vpop.f32.mrb[92].mxu0  ;;  %p5443_p3 = pnand %p5442_p2, %p5436_p1 }
0x1be1   : > { %v3649_v58 = vpop.f32.mrb[93].mxu0  ;;  %3727 = vmatmul.mubr.bf16.gmra.mrb[88].mxu0 %v7872_v41  ;;  %v3648_v41 = vadd.f32 %v3647_v25, %v7901_v63 }
0x1be2   : > { %v3651_v7 = vpop.f32.mrb[94].mxu0  ;;  %v3650_v3 = vadd.f32 %v3649_v58, %v7904_v8  ;;  %v5036_v58 = vld [vmem:[#allocation13 + $0x28] sm:$0xff]  }
0x1be3   : > { %v3653_v6 = vpop.f32.mrb[95].mxu0  ;;  %v3652_v5 = vadd.f32 %v3651_v7, %v7901_v63  ;;  %4455 = vmatpush3.bf16.msra.mxu1 %v5036_v58 }
0x1be4   : > { %v3654_v13 = vadd.f32 %v3653_v6, %v7904_v8 }
0x1be8   : > { %v3657_v28 = vpop.f32.mrb[96].mxu0 }
0x1be9   : > { %v3659_v48 = vpop.f32.mrb[97].mxu0  ;;  %v3658_v36 = vadd.f32 %v3657_v28, %v7901_v63 }
0x1bea   : > { %v3661_v51 = vpop.f32.mrb[98].mxu0  ;;  %v3660_v44 = vadd.f32 %v3659_v48, %v7904_v8 }
0x1beb   : > { %v3663_v53 = vpop.f32.mrb[99].mxu0  ;;  %v3662_v62 = vadd.f32 %v3661_v51, %v7901_v63 }
0x1bec   : > { %v3664_v60 = vadd.f32 %v3663_v53, %v7904_v8  ;;  %v5037_v53 = vld [vmem:[#allocation13 + $0x70] sm:$0xff]  }
0x1bed   : > { %4456 = vmatprep.subr.bf16.mxu1 %v5037_v53 }
0x1bf0   : > { %v3667_v57 = vpop.f32.mrb[100].mxu0 }
0x1bf1   : > { %v3669_v47 = vpop.f32.mrb[101].mxu0  ;;  %v3668_v49 = vadd.f32 %v3667_v57, %v7901_v63 }
0x1bf2   : > { %v3671_v34 = vpop.f32.mrb[102].mxu0  ;;  %v3670_v43 = vadd.f32 %v3669_v47, %v7904_v8  ;;  %v5038_v47 = vld [vmem:[#allocation13 + $0x30] sm:$0xff]  }
0x1bf3   : > { %v3673_v10 = vpop.f32.mrb[103].mxu0  ;;  %v3672_v16 = vadd.f32 %v3671_v34, %v7901_v63  ;;  %4457 = vmatpush3.bf16.msra.mxu1 %v5038_v47 }
0x1bf4   : > { %v3674_v14 = vadd.f32 %v3673_v10, %v7904_v8  ;;  %v5039_v10 = vld [vmem:[#allocation13 + $0x78] sm:$0xff]  }
0x1bf5   : > { %4458 = vmatprep.subr.bf16.mxu1 %v5039_v10 }
0x1bf7   : > { %4459 = vmatpush3.bf16.msra.mxu1 %v5040_v59 }
0x1c18   : > { %v3738_v38 = vpop.f32.mrb[84].mxu1 }
0x1c19   : > { %v3739_v42 = vadd.f32 %v3738_v38, %v3648_v41  ;;  %v3740_v46 = vpop.f32.mrb[85].mxu1 }
0x1c1a   : > { %v3741_v50 = vadd.f32 %v3740_v46, %v3650_v3  ;;  %v3742_v9 = vpop.f32.mrb[86].mxu1 }
0x1c1b   : > { %v3743_v31 = vadd.f32 %v3742_v9, %v3652_v5  ;;  %v3744_v21 = vpop.f32.mrb[87].mxu1  ;;  %v3783_v22 = vmax.f32 %v3739_v42, 0.0 }
0x1c1c   : > { %v3745_v11 = vadd.f32 %v3744_v21, %v3654_v13  ;;  %v3784_v23 = vmax.f32 %v3741_v50, 0.0 }
0x1c1d   : > { %v3785_v20 = vmax.f32 %v3743_v31, 0.0 }
0x1c1e   : > { %v3786_v39 = vmax.f32 %v3745_v11, 0.0 }
0x1c1f   : > { %v7911_v32 = vpack.c.bf16 %v3785_v20, %v3783_v22 }
0x1c20   : > { %v7914_v2 = vpack.c.bf16 %v3786_v39, %v3784_v23  ;;  %v3748_v55 = vpop.f32.mrb[88].mxu1 }
0x1c21   : > { %v3749_v4 = vadd.f32 %v3748_v55, %v3658_v36  ;;  %v3750_v61 = vpop.f32.mrb[89].mxu1 }
0x1c22   : > { %v3751_v1 = vadd.f32 %v3750_v61, %v3660_v44  ;;  %v3752_v37 = vpop.f32.mrb[90].mxu1 }
0x1c23   : > { %v3753_v15 = vadd.f32 %v3752_v37, %v3662_v62  ;;  %v3754_v54 = vpop.f32.mrb[91].mxu1  ;;  %v3787_v19 = vmax.f32 %v3749_v4, 0.0 }
0x1c24   : > { %v3755_v45 = vadd.f32 %v3754_v54, %v3664_v60  ;;  %v3788_v27 = vmax.f32 %v3751_v1, 0.0 }
0x1c25   : > { %v3789_v24 = vmax.f32 %v3753_v15, 0.0 }
0x1c26   : > { %v3790_v33 = vmax.f32 %v3755_v45, 0.0 }
0x1c27   : > { %v7919_v56 = vpack.c.bf16 %v3789_v24, %v3787_v19 }
0x1c28   : > { %v7922_v40 = vpack.c.bf16 %v3790_v33, %v3788_v27  ;;  %v3758_v18 = vpop.f32.mrb[92].mxu1 }
0x1c29   : > { %v3759_v26 = vadd.f32 %v3758_v18, %v3668_v49  ;;  %v3760_v29 = vpop.f32.mrb[93].mxu1 }
0x1c2a   : > { %v3761_v52 = vadd.f32 %v3760_v29, %v3670_v43  ;;  %v3762_v30 = vpop.f32.mrb[94].mxu1 }
0x1c2b   : > { %v3763_v12 = vadd.f32 %v3762_v30, %v3672_v16  ;;  %v3764_v25 = vpop.f32.mrb[95].mxu1  ;;  %v3791_v6 = vmax.f32 %v3759_v26, 0.0 }
0x1c2c   : > { %v3765_v7 = vadd.f32 %v3764_v25, %v3674_v14  ;;  %v3792_v48 = vmax.f32 %v3761_v52, 0.0 }
0x1c2d   : > { %v3793_v28 = vmax.f32 %v3763_v12, 0.0 }
0x1c2e   : > { %v3794_v51 = vmax.f32 %v3765_v7, 0.0 }
0x1c2f   : > { %v3805_v57 = vpack.c.bf16 %v3793_v28, %v3791_v6 }
0x1c30   : > { %v3806_v34 = vpack.c.bf16 %v3794_v51, %v3792_v48 }
0x1ca4   : > { %v3677_v41 = vpop.f32.mrb[104].mxu0  ;;  %v3768_v3 = vpop.f32.mrb[96].mxu1 }
0x1ca5   : > { %v3678_v38 = vadd.f32 %v3677_v41, %v7901_v63  ;;  %v3679_v5 = vpop.f32.mrb[105].mxu0  ;;  %v3770_v42 = vpop.f32.mrb[97].mxu1 }
0x1ca6   : > { %v3680_v46 = vadd.f32 %v3679_v5, %v7904_v8  ;;  %v3681_v13 = vpop.f32.mrb[106].mxu0  ;;  %v3772_v50 = vpop.f32.mrb[98].mxu1 }
0x1ca7   : > { %v3769_v9 = vadd.f32 %v3768_v3, %v3678_v38  ;;  %v3682_v31 = vpop.f32.mrb[107].mxu0  ;;  %v3773_v21 = vpop.f32.mrb[99].mxu1 }
0x1ca8   : > { %v3771_v11 = vadd.f32 %v3770_v42, %v3680_v46 }
0x1ca9   : > { %v3795_v14 = vmax.f32 %v3769_v9, 0.0 }
0x1cab   : > { %v3807_v52 = vpack.c.bf16 %v3795_v14, %v3795_v14 }
0x1cac   : > { %v3718_v22 = vpop.f32.mrb[84].mxu0 }
0x1cad   : > { %v4528_v20 = vadd.f32 %v3718_v22, %v7901_v63  ;;  %v3720_v23 = vpop.f32.mrb[85].mxu0 }
0x1cae   : > { %v4529_v39 = vadd.f32 %v3720_v23, %v7904_v8  ;;  %v3722_v36 = vpop.f32.mrb[86].mxu0 }
0x1caf   : > { %v4530_v44 = vadd.f32 %v3722_v36, %v7901_v63  ;;  %v3724_v55 = vpop.f32.mrb[87].mxu0  ;;  %v3775_v4 = vmax.f32 %v4528_v20, 0.0 }
0x1cb0   : > { %v4531_v62 = vadd.f32 %v3724_v55, %v7904_v8  ;;  %v3776_v60 = vmax.f32 %v4529_v39, 0.0 }
0x1cb1   : > { %v3777_v61 = vmax.f32 %v4530_v44, 0.0 }
0x1cb2   : > { %v3778_v1 = vmax.f32 %v4531_v62, 0.0 }
0x1cb3   : > { %v3797_v37 = vpack.c.bf16 %v3777_v61, %v3775_v4 }
0x1cb4   : > { %v3798_v15 = vpack.c.bf16 %v3778_v1, %v3776_v60  ;;  %v3728_v54 = vpop.f32.mrb[88].mxu0 }
0x1cb5   : > { %v4532_v45 = vadd.f32 %v3728_v54, %v7901_v63  ;;  %v3730_v19 = vpop.f32.mrb[89].mxu0 }
0x1cb6   : > { %v4533_v24 = vadd.f32 %v3730_v19, %v7904_v8  ;;  %v3732_v27 = vpop.f32.mrb[90].mxu0  ;;  %3976 = vmatprep.mubr.bf16.mxu1 %v3798_v15 }
0x1cb7   : > { %v4534_v33 = vadd.f32 %v3732_v27, %v7901_v63  ;;  %v3734_v17 = vpop.f32.mrb[91].mxu0  ;;  %3977 = vmatmul.mubr.bf16.vlgmr.msra.gmra.mrb[100].mxu1 %v3797_v37  ;;  %v3779_v35 = vmax.f32 %v4532_v45, 0.0  ;;  %v3796_v63 = vmax.f32 %v3771_v11, 0.0 }
0x1cb8   : > { %v4535_v49 = vadd.f32 %v3734_v17, %v7904_v8  ;;  %v3780_v18 = vmax.f32 %v4533_v24, 0.0 }
0x1cb9   : > { %v3781_v43 = vmax.f32 %v4534_v33, 0.0  ;;  %v3808_v8 = vpack.c.bf16 %v3796_v63, %v3796_v63 }
0x1cba   : > { %v3782_v16 = vmax.f32 %v4535_v49, 0.0 }
0x1cbb   : > { %v3799_v26 = vpack.c.bf16 %v3781_v43, %v3779_v35 }
0x1cbc   : > { %v3800_v29 = vpack.c.bf16 %v3782_v16, %v3780_v18 }
0x1cbe   : > { %3984 = vmatprep.mubr.bf16.mxu1 %v3800_v29 }
0x1cbf   : > { %3985 = vmatmul.mubr.bf16.gmra.mrb[104].mxu1 %v3799_v26 }
0x1cc0   : > { %3992 = vmatprep.mubr.bf16.mxu1 %v7914_v2  ;;  %v4423_v2 = vld [vmem:[%s8915_s13] ss:$0 sm:$0xff] }
0x1cc7   : > { %3993 = vmatmul.mubr.bf16.gmra.mrb[108].mxu1 %v7911_v32 }
0x1cc8   : > { %4000 = vmatprep.mubr.bf16.mxu1 %v7922_v40 }
0x1ccf   : > { %4001 = vmatmul.mubr.bf16.gmra.mrb[112].mxu1 %v7919_v56 }
0x1cd0   : > { %4008 = vmatprep.mubr.bf16.mxu1 %v3806_v34 }
0x1cd7   : > { %4009 = vmatmul.mubr.bf16.gmra.mrb[116].mxu1 %v3805_v57 }
0x1cd8   : > { %4016 = vmatprep.mubr.bf16.mxu1 %v3808_v8 }
0x1cdf   : > { %4017 = vmatmul.mubr.bf16.gmra.mrb[120].mxu1 %v3807_v52 }
0x1d8a   : > { %v4460_v30 = vpop.f32.mrb[100].mxu1 }
0x1d8b   : > { %v4461_v0 = vpop.f32.mrb[101].mxu1 }
0x1d8c   : > { %v4462_v32 = vadd.f32 %v4461_v0, %v4460_v30  ;;  %v4463_v12 = vpop.f32.mrb[102].mxu1 }
0x1d8d   : > { %v4464_v40 = vpop.f32.mrb[103].mxu1 }
0x1d8e   : > { %v3979_v25 = vadd.f32 %v4462_v32, %v4423_v2  ;;  %v4465_v56 = vadd.f32 %v4464_v40, %v4463_v12 }
0x1d90   : > { %4024 = vst [vmem:[%s7944_s10] sm:$0xff] %v3979_v25  ;;  %v3982_v58 = vadd.f32 %v4465_v56, %v4423_v2 }
0x1d92   : > { %4025 = vst [vmem:[%s7944_s10 + $0x8] sm:$0xff] %v3982_v58  ;;  %v4466_v7 = vpop.f32.mrb[104].mxu1 }
0x1d93   : > { %v4467_v6 = vpop.f32.mrb[105].mxu1 }
0x1d94   : > { %v4468_v28 = vadd.f32 %v4467_v6, %v4466_v7  ;;  %v4469_v48 = vpop.f32.mrb[106].mxu1 }
0x1d95   : > { %v4470_v51 = vpop.f32.mrb[107].mxu1 }
0x1d96   : > { %v3987_v53 = vadd.f32 %v4468_v28, %v4423_v2  ;;  %v4471_v57 = vadd.f32 %v4470_v51, %v4469_v48 }
0x1d98   : > { %4026 = vst [vmem:[%s7944_s10 + $0x10] sm:$0xff] %v3987_v53  ;;  %v3990_v47 = vadd.f32 %v4471_v57, %v4423_v2 }
0x1d9a   : > { %4027 = vst [vmem:[%s7944_s10 + $0x18] sm:$0xff] %v3990_v47  ;;  %v4472_v34 = vpop.f32.mrb[108].mxu1 }
0x1d9b   : > { %v4473_v10 = vpop.f32.mrb[109].mxu1 }
0x1d9c   : > { %v4474_v59 = vadd.f32 %v4473_v10, %v4472_v34  ;;  %v4475_v41 = vpop.f32.mrb[110].mxu1 }
0x1d9d   : > { %v4476_v3 = vpop.f32.mrb[111].mxu1 }
0x1d9e   : > { %v3995_v38 = vadd.f32 %v4474_v59, %v4423_v2  ;;  %v4477_v5 = vadd.f32 %v4476_v3, %v4475_v41 }
0x1da0   : > { %4028 = vst [vmem:[%s7944_s10 + $0x20] sm:$0xff] %v3995_v38  ;;  %v3998_v42 = vadd.f32 %v4477_v5, %v4423_v2 }
0x1da2   : > { %4029 = vst [vmem:[%s7944_s10 + $0x28] sm:$0xff] %v3998_v42  ;;  %v4478_v46 = vpop.f32.mrb[112].mxu1 }
0x1da3   : > { %v4479_v13 = vpop.f32.mrb[113].mxu1 }
0x1da4   : > { %v4480_v50 = vadd.f32 %v4479_v13, %v4478_v46  ;;  %v4481_v9 = vpop.f32.mrb[114].mxu1 }
0x1da5   : > { %v4482_v31 = vpop.f32.mrb[115].mxu1 }
0x1da6   : > { %v4003_v21 = vadd.f32 %v4480_v50, %v4423_v2  ;;  %v4483_v11 = vadd.f32 %v4482_v31, %v4481_v9 }
0x1da8   : > { %4030 = vst [vmem:[%s7944_s10 + $0x30] sm:$0xff] %v4003_v21  ;;  %v4006_v22 = vadd.f32 %v4483_v11, %v4423_v2 }
0x1daa   : > { %4031 = vst [vmem:[%s7944_s10 + $0x38] sm:$0xff] %v4006_v22  ;;  %v4484_v20 = vpop.f32.mrb[116].mxu1 }
0x1dab   : > { %v4485_v23 = vpop.f32.mrb[117].mxu1 }
0x1dac   : > { %v4486_v39 = vadd.f32 %v4485_v23, %v4484_v20  ;;  %v4487_v36 = vpop.f32.mrb[118].mxu1 }
0x1dad   : > { %v4488_v44 = vpop.f32.mrb[119].mxu1 }
0x1dae   : > { %v4011_v55 = vadd.f32 %v4486_v39, %v4423_v2  ;;  %v4489_v62 = vadd.f32 %v4488_v44, %v4487_v36 }
0x1db0   : > { %4032 = vst [vmem:[%s7944_s10 + $0x40] sm:$0xff] %v4011_v55  ;;  %v4014_v4 = vadd.f32 %v4489_v62, %v4423_v2 }
0x1db2   : > { %4033 = vst [vmem:[%s7944_s10 + $0x48] sm:$0xff] %v4014_v4  ;;  %v4490_v61 = vpop.f32.mrb[120].mxu1 }
0x1db3   : > { %v4491_v60 = vpop.f32.mrb[121].mxu1 }
0x1db4   : > { %v4492_v1 = vadd.f32 %v4491_v60, %v4490_v61  ;;  %v4493_v37 = vpop.f32.mrb[122].mxu1 }
0x1db5   : > { %v4494_v15 = vpop.f32.mrb[123].mxu1 }
0x1db6   : > { %v4019_v54 = vadd.f32 %v4492_v1, %v4423_v2 }
0x1db8   : > { %4034 = vst [vmem:[%s7944_s10 + $0x50] sm:$0xff] %v4019_v54 }
0x1db9   : > { %5446 = shalt.err (!%p5443_p3)
}
0x1dba   : > { %s5447_s16 = scalar_lea.hbm %s7961_s23, 1408  ;;  %s5451_s1 = scalar_lea.hbm %s8916_s17, 2816 }
0x1dbb   : > { %p5448_p4 = scmp.ne.s32.totalorder %s7961_s23, %s5447_s16  ;;  %p5452_p8 = scmp.lt.u32.totalorder %s7961_s23, %s8916_s17 }
0x1dbc   : > { %p5453_p5 = scmp.lt.u32.totalorder %s5451_s1, %s5447_s16  ;;  %p5455_p6 = scmp.lt.u32.totalorder %s5447_s16, %s7961_s23 }
0x1dbd   : > { %p5449_p10 = pnand %p5448_p4, %p8917_p9 }
0x1dbe   : > { %p5454_p7 = por %p5453_p5, %p5452_p8 }
0x1dbf   : > { %p5450_p11 = pneg %p5449_p10 }
0x1dc0   : > { %p5456_p12 = por %p5455_p6, %p5454_p7 }
0x1dc2   : > { %p5457_p1 = pnand %p5456_p12, %p5450_p11 }
0x1dc4   : > { %5460 = shalt.err (!%p5457_p1)
}
0x1dc5   : > { %s5527_s18 = smov 128   ;;  %s5528_s30 = smov 8  }
0x1dc6   : > { %4600 = dma.vmem_to_hbm [thread:$0]  (%p8917_p9), %s7963_s24, 1408, %s7961_s23, %s4036_s14, %s5527_s18, %s5527_s18, %s5528_s30  }
0x1dc7 PF: > { %s4064_s15 = sand.u32 1, %s5499_s25   ;;  %p8918_p13 = scmp.ne.s32.totalorder %s8393_s19, 0 }
0x1dc8   : > { %p8919_p0 = scmp.ge.s32.totalorder %s5511_s28, 2  ;;  %s4065_s6 = scalar_lea.sflag [#allocation4], %s4064_s15 }
0x1dca   : > { %p4626_p2 = pnand %p8919_p0, %p8918_p13 }
0x1dcc   : > { %5494 = dma.done.wait (!%p4626_p2), %s4065_s6, 1408  }
0x1dcd   : > { %5496 = vsyncadd (!%p4626_p2), %s4065_s6, 4294965888  ;;  %p29_p3 = scmp.ge.s32.totalorder %s5787_s20, 4   ;;  %s8920_s25 = smov %s5503_s26 }
0x1dce   : > { %s8921_s26 = smov %s5507_s27  ;;  %s8922_s27 = smov %s5798_s12 }
0x1dcf   : > { %s8923_s28 = smov %s5787_s20  ;;  %31 = sbr.rel (!%p29_p3) target bundleno = 15 (0xf), region = 141 }
0x1dd6   :  { %4070 = vsyncpa [#allocation3], 1 }
0x1dd7   :  { %4072 = vsyncpa [#allocation3 + $0x1], 1 }
0x1dd8   :  { %4073 = vsyncpa [#allocation6], 1 }
0x1dd9   :  { %4074 = vsyncpa [#allocation9], 1 }
0x1dda   :  { %4075 = vsyncpa [#allocation12], 1 }
0x1ddb   :  { %4076 = vsyncpa [#allocation4], 1 }
0x1ddc   :  { %4078 = vsyncpa [#allocation4 + $0x1], 1 }

</bundles_post_ra>
